<compile_context>
chip_gen: v7x
topology: tpu7x:2x2x1
jax: 0.10.0
libtpu: 0.0.40
codegen_flags: <defaults>
</compile_context>

<pallas_src>
import math
from functools import partial

import jax
import jax.numpy as jnp
import numpy as np
from jax.experimental import pallas as pl
from jax.experimental.pallas import tpu as pltpu

_VMEM_LIMIT_BYTES = 48 * 1024 * 1024   # > default scoped limit; < v7x 64 MiB physical
_NEG_INF = -1e9


# ----------------------------- tiling helpers -----------------------------

def _row_plan(M, pref=256):
    """Row-tile plan: prefer large tiles; pad M up rather than using tiny divisors."""
    for t in (pref, 128, 64):
        if M % t == 0:
            return t, M
    if M <= pref:
        tm = ((M + 7) // 8) * 8
        return tm, tm
    tm = pref
    return tm, ((M + tm - 1) // tm) * tm


def _col_plan(N, pref=512):
    for t in (pref, 256, 128):
        if N % t == 0:
            return t
    return N  # small test sizes / odd vocab: full width
    # TODO(synk): pad odd large N up to a multiple of 256 and slice the logits tail.


def _seq_tile(L, pref=256):
    for t in (pref, 128, 64, 32, 16, 8):
        if L % t == 0:
            return t
    return L
    # TODO(synk): pad ragged sequence lengths to a multiple of 128 and mask the tail.


def _pad_rows(x2d, Mp):
    M = x2d.shape[0]
    if Mp == M:
        return x2d
    return jnp.pad(x2d, ((0, Mp - M), (0, 0)))


# ----------------------------- Pallas kernels -----------------------------

def _linear_kernel(x_ref, w_ref, b_ref, o_ref):
    # bf16 x bf16 -> f32 accumulation on the MXU, bias in f32.
    o_ref[...] = (jnp.dot(x_ref[...], w_ref[...],
                          preferred_element_type=jnp.float32)
                  + b_ref[...]).astype(o_ref.dtype)


def _multi_proj_kernel(x_ref, w_ref, b_ref, o_ref):
    # Fused n-way projection (QKV / KV / Q): one x tile, n weight matrices,
    # n lane-dense output planes (o[j] = x @ w[j] + b[j]).
    x = x_ref[...]
    for j in range(w_ref.shape[0]):
        o_ref[j] = (jnp.dot(x, w_ref[j], preferred_element_type=jnp.float32)
                    + b_ref[j]).astype(o_ref.dtype)


def _ffn_ln_kernel(x_ref, w1_ref, b1_ref, w2_ref, b2_ref, g_ref, b_ref,
                   o_ref, acc_ref, *, eps):
    # LN(x + W2 @ relu(W1 @ x + b1) + b2), hidden dim H streamed in tiles.
    hj = pl.program_id(1)
    nh = pl.num_programs(1)

    @pl.when(hj == 0)
    def _():
        acc_ref[...] = jnp.zeros(acc_ref.shape, jnp.float32)

    x = x_ref[...]                                                   # bf16 [tm, D]
    h = jnp.dot(x, w1_ref[...], preferred_element_type=jnp.float32) + b1_ref[...]
    h = jnp.maximum(h, 0.0).astype(jnp.bfloat16)                     # ReLU
    acc_ref[...] += jnp.dot(h, w2_ref[...], preferred_element_type=jnp.float32)

    @pl.when(hj == nh - 1)
    def _():
        y = x.astype(jnp.float32) + acc_ref[...] + b2_ref[...]       # residual (f32)
        mean = jnp.mean(y, axis=-1, keepdims=True)
        var = jnp.mean((y - mean) ** 2, axis=-1, keepdims=True)
        o_ref[...] = ((y - mean) * jax.lax.rsqrt(var + eps) * g_ref[...]
                      + b_ref[...]).astype(o_ref.dtype)


def _flash_mha_ln_kernel(q_ref, k_ref, v_ref, m_ref, res_ref, wo_ref, bo_ref,
                         g_ref, b_ref, o_ref, m_scr, l_scr, acc_scr,
                         *, n_head, scale, causal, eps):
    # One (batch, Lq-tile) pair; K/V streamed over the last grid axis with online
    # softmax.  Heads accumulate straight into the wo projection (no concat).
    ki = pl.program_id(2)
    nk = pl.num_programs(2)
    tq, D = q_ref.shape[2], q_ref.shape[3]
    tk = k_ref.shape[2]
    Dh = D // n_head

    @pl.when(ki == 0)
    def _():
        m_scr[...] = jnp.full(m_scr.shape, -1e30, jnp.float32)
        l_scr[...] = jnp.zeros(l_scr.shape, jnp.float32)
        acc_scr[...] = jnp.zeros(acc_scr.shape, jnp.float32)

    q = q_ref[0, 0]                                   # [tq, D]  bf16
    k = k_ref[0, 0]                                   # [tk, D]  bf16
    v = v_ref[0, 0]                                   # [tk, D]  bf16

    # Combined additive mask (pad + causal) computed ONCE for all heads (f32).
    mask_add = m_ref[0]                               # [1, tk]
    if causal:
        qi = pl.program_id(1)
        row = jax.lax.broadcasted_iota(jnp.int32, (tq, tk), 0) + qi * tq
        col = jax.lax.broadcasted_iota(jnp.int32, (tq, tk), 1) + ki * tk
        mask_add = mask_add + jnp.where(col <= row, 0.0, _NEG_INF).astype(jnp.float32)

    for h in range(n_head):                           # static unroll (small n_head)
        qh = q[:, h * Dh:(h + 1) * Dh]
        kh = k[:, h * Dh:(h + 1) * Dh]
        vh = v[:, h * Dh:(h + 1) * Dh]
        # q . k^T without explicit transpose (contract last dims on the MXU).
        s = jax.lax.dot_general(qh, kh, (((1,), (1,)), ((), ())),
                                preferred_element_type=jnp.float32) * scale
        s = s + mask_add                              # f32 scores
        m_prev = m_scr[h]                             # [tq, 1]
        m_new = jnp.maximum(m_prev, jnp.max(s, axis=-1, keepdims=True))
        alpha = jnp.exp(m_prev - m_new)
        p = jnp.exp(s - m_new)                        # unnormalized probs (f32)
        l_scr[h] = alpha * l_scr[h] + jnp.sum(p, axis=-1, keepdims=True)
        acc_scr[h] = alpha * acc_scr[h] + jnp.dot(
            p.astype(jnp.bfloat16), vh, preferred_element_type=jnp.float32)
        m_scr[h] = m_new

    @pl.when(ki == nk - 1)
    def _():
        out = jnp.zeros((tq, D), jnp.float32)
        for h in range(n_head):
            # Deferred softmax normalization: scale the [tq, Dh] context, not [tq, Lk].
            inv_l = pl.reciprocal(l_scr[h], approx=True)
            ctx = (acc_scr[h] * inv_l).astype(jnp.bfloat16)
            out = out + jnp.dot(ctx, wo_ref[h * Dh:(h + 1) * Dh, :],
                                preferred_element_type=jnp.float32)
        y = res_ref[0].astype(jnp.float32) + out + bo_ref[...]        # residual
        mean = jnp.mean(y, axis=-1, keepdims=True)
        var = jnp.mean((y - mean) ** 2, axis=-1, keepdims=True)
        o_ref[0] = ((y - mean) * jax.lax.rsqrt(var + eps) * g_ref[...]
                    + b_ref[...]).astype(o_ref.dtype)


# ----------------------------- kernel wrappers -----------------------------

def linear(x2d, w, b, out_dtype=jnp.float32):
    # N-tiled (lane-dense stores); used for the vocab projection.
    # TODO(synk): add a K grid axis with an f32 accumulator for very large d_model.
    M, K = x2d.shape
    N = w.shape[1]
    tm, Mp = _row_plan(M)
    tn = _col_plan(N)
    out = pl.pallas_call(
        _linear_kernel,
        out_shape=jax.ShapeDtypeStruct((Mp, N), out_dtype),
        grid=(Mp // tm, N // tn),
        in_specs=[pl.BlockSpec((tm, K), lambda i, j: (i, 0)),
                  pl.BlockSpec((K, tn), lambda i, j: (0, j)),
                  pl.BlockSpec((1, tn), lambda i, j: (0, j))],
        out_specs=pl.BlockSpec((tm, tn), lambda i, j: (i, j)),
        compiler_params=pltpu.CompilerParams(
            dimension_semantics=("parallel", "parallel"),
            vmem_limit_bytes=_VMEM_LIMIT_BYTES),
    )(_pad_rows(x2d, Mp), w, b.reshape(1, N))
    return out if Mp == M else out[:M]


def multi_proj(x2d, w, b):
    # x2d [M, D] bf16, w [n, D, Dout] bf16, b [n, Dout] f32  ->  [n, M, Dout] bf16.
    M, D = x2d.shape
    n, _, Dout = w.shape
    tm, Mp = _row_plan(M)
    out = pl.pallas_call(
        _multi_proj_kernel,
        out_shape=jax.ShapeDtypeStruct((n, Mp, Dout), jnp.bfloat16),
        grid=(Mp // tm,),
        in_specs=[pl.BlockSpec((tm, D), lambda i: (i, 0)),
                  pl.BlockSpec((n, D, Dout), lambda i: (0, 0, 0)),
                  pl.BlockSpec((n, 1, Dout), lambda i: (0, 0, 0))],
        out_specs=pl.BlockSpec((n, tm, Dout), lambda i: (0, i, 0)),
        compiler_params=pltpu.CompilerParams(
            dimension_semantics=("parallel",),
            vmem_limit_bytes=_VMEM_LIMIT_BYTES),
    )(_pad_rows(x2d, Mp), w, b.reshape(n, 1, Dout))
    return out if Mp == M else out[:, :M, :]


def ffn_add_ln(x2d, w1, b1, w2, b2, gamma, beta, eps=1e-5):
    M, D = x2d.shape
    H = w1.shape[1]
    tm, Mp = _row_plan(M)
    tH = _col_plan(H)
    out = pl.pallas_call(
        partial(_ffn_ln_kernel, eps=eps),
        out_shape=jax.ShapeDtypeStruct((Mp, D), jnp.bfloat16),
        grid=(Mp // tm, H // tH),
        in_specs=[pl.BlockSpec((tm, D), lambda i, hj: (i, 0)),
                  pl.BlockSpec((D, tH), lambda i, hj: (0, hj)),
                  pl.BlockSpec((1, tH), lambda i, hj: (0, hj)),
                  pl.BlockSpec((tH, D), lambda i, hj: (hj, 0)),
                  pl.BlockSpec((1, D), lambda i, hj: (0, 0)),
                  pl.BlockSpec((1, D), lambda i, hj: (0, 0)),
                  pl.BlockSpec((1, D), lambda i, hj: (0, 0))],
        out_specs=pl.BlockSpec((tm, D), lambda i, hj: (i, 0)),
        scratch_shapes=[pltpu.VMEM((tm, D), jnp.float32)],
        compiler_params=pltpu.CompilerParams(
            dimension_semantics=("parallel", "arbitrary"),
            vmem_limit_bytes=_VMEM_LIMIT_BYTES),
    )(_pad_rows(x2d, Mp), w1, b1.reshape(1, H), w2, b2.reshape(1, D),
      gamma.reshape(1, D), beta.reshape(1, D))
    return out if Mp == M else out[:M]


def _q_map(slot):
    return lambda b, qi, ki: (slot, b, qi, 0)


def _kv_map(slot):
    return lambda b, qi, ki: (slot, b, ki, 0)


def attention_add_ln(q_arr, q_slot, kv_arr, k_slot, v_slot, pad_add, wo, bo,
                     residual, gamma, beta, n_head, causal, eps=1e-5):
    # q_arr: [Pq, B, Lq, D] bf16 (fused projection planes); kv_arr: [Pk, B, Lk, D].
    # For self-attention q_arr is the SAME array as kv_arr (slots 0/1/2): no host slicing.
    _, B, Lq, D = q_arr.shape
    Lk = kv_arr.shape[2]
    Dh = D // n_head
    scale = 1.0 / math.sqrt(Dh)
    tq = _seq_tile(Lq, 256)
    tk = _seq_tile(Lk, 512)
    kern = partial(_flash_mha_ln_kernel, n_head=n_head, scale=scale,
                   causal=causal, eps=eps)
    return pl.pallas_call(
        kern,
        out_shape=jax.ShapeDtypeStruct((B, Lq, D), jnp.bfloat16),
        grid=(B, Lq // tq, Lk // tk),
        in_specs=[pl.BlockSpec((1, 1, tq, D), _q_map(q_slot)),
                  pl.BlockSpec((1, 1, tk, D), _kv_map(k_slot)),
                  pl.BlockSpec((1, 1, tk, D), _kv_map(v_slot)),
                  pl.BlockSpec((1, 1, tk), lambda b, qi, ki: (b, 0, ki)),
                  pl.BlockSpec((1, tq, D), lambda b, qi, ki: (b, qi, 0)),
                  pl.BlockSpec((D, D), lambda b, qi, ki: (0, 0)),
                  pl.BlockSpec((1, D), lambda b, qi, ki: (0, 0)),
                  pl.BlockSpec((1, D), lambda b, qi, ki: (0, 0)),
                  pl.BlockSpec((1, D), lambda b, qi, ki: (0, 0))],
        out_specs=pl.BlockSpec((1, tq, D), lambda b, qi, ki: (b, qi, 0)),
        scratch_shapes=[pltpu.VMEM((n_head, tq, 1), jnp.float32),   # running max
                        pltpu.VMEM((n_head, tq, 1), jnp.float32),   # running denom
                        pltpu.VMEM((n_head, tq, Dh), jnp.float32)], # running ctx
        compiler_params=pltpu.CompilerParams(
            dimension_semantics=("parallel", "parallel", "arbitrary"),
            vmem_limit_bytes=_VMEM_LIMIT_BYTES),
    )(q_arr, kv_arr, kv_arr, pad_add, residual, wo, bo.reshape(1, D),
      gamma.reshape(1, D), beta.reshape(1, D))


# ----------------------------- model pieces (glue in JAX) -----------------------------

def self_attn_block(x, pad_add, p_attn, gamma, beta, n_head, causal):
    B, L, D = x.shape
    qkv = multi_proj(x.reshape(B * L, D), p_attn["w_qkv"], p_attn["b_qkv"])
    qkv = qkv.reshape(3, B, L, D)
    return attention_add_ln(qkv, 0, qkv, 1, 2, pad_add, p_attn["wo"], p_attn["bo"],
                            x, gamma, beta, n_head, causal)


def cross_attn_block(x, enc, pad_add, p_attn, gamma, beta, n_head):
    B, Lq, D = x.shape
    Lk = enc.shape[1]
    q = multi_proj(x.reshape(B * Lq, D), p_attn["wq"], p_attn["bq"]).reshape(1, B, Lq, D)
    kv = multi_proj(enc.reshape(B * Lk, D), p_attn["w_kv"], p_attn["b_kv"]).reshape(2, B, Lk, D)
    return attention_add_ln(q, 0, kv, 0, 1, pad_add, p_attn["wo"], p_attn["bo"],
                            x, gamma, beta, n_head, causal=False)


def encoder_layer(x, src_pad_add, p, n_head):
    x = self_attn_block(x, src_pad_add, p["attn"], p["ln1_g"], p["ln1_b"],
                        n_head, causal=False)
    B, L, D = x.shape
    x = ffn_add_ln(x.reshape(B * L, D), p["w1"], p["b1"], p["w2"], p["b2"],
                   p["ln2_g"], p["ln2_b"]).reshape(B, L, D)
    return x


def decoder_layer(y, enc, trg_pad_add, cross_pad_add, p, n_head):
    y = self_attn_block(y, trg_pad_add, p["self_attn"], p["ln1_g"], p["ln1_b"],
                        n_head, causal=True)
    y = cross_attn_block(y, enc, cross_pad_add, p["cross_attn"],
                         p["ln2_g"], p["ln2_b"], n_head)
    B, L, D = y.shape
    y = ffn_add_ln(y.reshape(B * L, D), p["w1"], p["b1"], p["w2"], p["b2"],
                   p["ln3_g"], p["ln3_b"]).reshape(B, L, D)
    return y


def sinusoidal_pos_encoding(max_len, d_model):
    pos = np.arange(max_len)[:, None].astype(np.float32)
    i = np.arange(d_model)[None, :]
    angle = pos / np.power(10000.0, (2 * (i // 2)) / d_model)
    pe = np.zeros((max_len, d_model), dtype=np.float32)
    pe[:, 0::2] = np.sin(angle[:, 0::2])
    pe[:, 1::2] = np.cos(angle[:, 1::2])
    return jnp.asarray(pe)


def additive_pad_mask(k_ids, pad_idx):
    # Additive key-padding mask [B, 1, Lk] (0 keep / -1e9 masked), kept in f32.
    keep = (k_ids != pad_idx)[:, None, :]
    return jnp.where(keep, 0.0, _NEG_INF).astype(jnp.float32)


# ----------------------------- parameter init -----------------------------

def _key_stream(seed):
    key = jax.random.PRNGKey(seed)
    while True:
        key, sub = jax.random.split(key)
        yield sub


def _w(ks, shape):
    return (0.02 * jax.random.normal(next(ks), shape, jnp.float32)).astype(jnp.bfloat16)


def init_self_attn_params(ks, d_model):
    return dict(
        w_qkv=_w(ks, (3, d_model, d_model)),
        b_qkv=jnp.zeros((3, d_model), jnp.float32),
        wo=_w(ks, (d_model, d_model)),
        bo=jnp.zeros((d_model,), jnp.float32),
    )


def init_cross_attn_params(ks, d_model):
    return dict(
        wq=_w(ks, (1, d_model, d_model)),
        bq=jnp.zeros((1, d_model), jnp.float32),
        w_kv=_w(ks, (2, d_model, d_model)),
        b_kv=jnp.zeros((2, d_model), jnp.float32),
        wo=_w(ks, (d_model, d_model)),
        bo=jnp.zeros((d_model,), jnp.float32),
    )


def init_params(seed, enc_voc, dec_voc, d_model, ffn_hidden, n_layer, max_len):
    ks = _key_stream(seed)
    params = {
        "enc_emb": 0.02 * jax.random.normal(next(ks), (enc_voc, d_model), jnp.float32),
        "dec_emb": 0.02 * jax.random.normal(next(ks), (dec_voc, d_model), jnp.float32),
        "pos": sinusoidal_pos_encoding(max_len, d_model),
        "enc_layers": [],
        "dec_layers": [],
    }
    for _ in range(n_layer):
        params["enc_layers"].append(dict(
            attn=init_self_attn_params(ks, d_model),
            ln1_g=jnp.ones((d_model,), jnp.float32),
            ln1_b=jnp.zeros((d_model,), jnp.float32),
            w1=_w(ks, (d_model, ffn_hidden)),
            b1=jnp.zeros((ffn_hidden,), jnp.float32),
            w2=_w(ks, (ffn_hidden, d_model)),
            b2=jnp.zeros((d_model,), jnp.float32),
            ln2_g=jnp.ones((d_model,), jnp.float32),
            ln2_b=jnp.zeros((d_model,), jnp.float32),
        ))
    for _ in range(n_layer):
        params["dec_layers"].append(dict(
            self_attn=init_self_attn_params(ks, d_model),
            cross_attn=init_cross_attn_params(ks, d_model),
            ln1_g=jnp.ones((d_model,), jnp.float32),
            ln1_b=jnp.zeros((d_model,), jnp.float32),
            ln2_g=jnp.ones((d_model,), jnp.float32),
            ln2_b=jnp.zeros((d_model,), jnp.float32),
            w1=_w(ks, (d_model, ffn_hidden)),
            b1=jnp.zeros((ffn_hidden,), jnp.float32),
            w2=_w(ks, (ffn_hidden, d_model)),
            b2=jnp.zeros((d_model,), jnp.float32),
            ln3_g=jnp.ones((d_model,), jnp.float32),
            ln3_b=jnp.zeros((d_model,), jnp.float32),
        ))
    params["out_w"] = _w(ks, (d_model, dec_voc))
    params["out_b"] = jnp.zeros((dec_voc,), jnp.float32)
    return params


# ----------------------------- full forward -----------------------------

def transformer_forward(params, src, trg, src_pad_idx, trg_pad_idx, n_head):
    B, Ls = src.shape
    Lt = trg.shape[1]
    D = params["enc_emb"].shape[1]
    Vd = params["out_w"].shape[1]

    src_pad_add = additive_pad_mask(src, src_pad_idx)   # enc self-attn & cross-attn keys
    trg_pad_add = additive_pad_mask(trg, trg_pad_idx)   # dec self-attn keys (+causal in-kernel)

    # encoder (embedding gather + positional encoding stay in plain JAX)
    x = (jnp.take(params["enc_emb"], src, axis=0)
         + params["pos"][:Ls][None]).astype(jnp.bfloat16)
    for lp in params["enc_layers"]:
        x = encoder_layer(x, src_pad_add, lp, n_head)
    enc = x

    # decoder
    y = (jnp.take(params["dec_emb"], trg, axis=0)
         + params["pos"][:Lt][None]).astype(jnp.bfloat16)
    for lp in params["dec_layers"]:
        y = decoder_layer(y, enc, trg_pad_add, src_pad_add, lp, n_head)

    # final projection to vocab logits (N-tiled, f32 output)
    logits = linear(y.reshape(B * Lt, D), params["out_w"], params["out_b"],
                    out_dtype=jnp.float32)
    return logits.reshape(B, Lt, Vd)


# ----------------------------- main -----------------------------

if __name__ == "__main__":
    src_pad_idx = 0
    trg_pad_idx = 0
    enc_voc_size = 32
    dec_voc_size = 32
    d_model = 32
    max_len = 16
    n_head = 4
    ffn_hidden = 64
    n_layer = 2

    B, Ls, Lt = 2, 8, 8

    key = jax.random.PRNGKey(0)
    k_src, k_trg = jax.random.split(key)
    src = jax.random.randint(k_src, (B, Ls), 1, enc_voc_size, dtype=jnp.int32)
    trg = jax.random.randint(k_trg, (B, Lt), 1, dec_voc_size, dtype=jnp.int32)
    # introduce some padding to exercise the pad masks
    src = src.at[0, -2:].set(src_pad_idx)
    trg = trg.at[1, -3:].set(trg_pad_idx)

    params = init_params(0, enc_voc_size, dec_voc_size, d_model, ffn_hidden,
                         n_layer, max_len)

    fwd = jax.jit(transformer_forward,
                  static_argnames=("src_pad_idx", "trg_pad_idx", "n_head"))
    out = fwd(params, src, trg, src_pad_idx=src_pad_idx,
              trg_pad_idx=trg_pad_idx, n_head=n_head)
    out = jax.block_until_ready(out)
    assert out.shape == (B, Lt, dec_voc_size)
    assert bool(jnp.all(jnp.isfinite(out)))
    print("KERNEL_OK")
</pallas_src>

<mosaic_0001>
module attributes {stable_mosaic.version = 11 : i64} {
  func.func @_multi_proj_kernel(%arg0: i32, %arg1: memref<16x32xbf16, #tpu.memory_space<vmem>>, %arg2: memref<3x32x32xbf16, #tpu.memory_space<vmem>>, %arg3: memref<3x1x32xf32, #tpu.memory_space<vmem>>, %arg4: memref<3x16x32xbf16, #tpu.memory_space<vmem>>) attributes {dimension_semantics = [#tpu.dimension_semantics<parallel>], iteration_bounds = array<i64: 1>, scalar_prefetch = 0 : i64, scratch_operands = 0 : i64, tpu.core_type = #tpu.core_type<tc>, window_params = [{transform_indices = @transform_0, window_bounds = array<i64: 16, 32>}, {pipeline_mode = #tpu.pipeline_mode<synchronous>, transform_indices = @transform_1, window_bounds = array<i64: 3, 32, 32>}, {pipeline_mode = #tpu.pipeline_mode<synchronous>, transform_indices = @transform_2, window_bounds = array<i64: 3, 1, 32>}, {transform_indices = @transform_3, window_bounds = array<i64: 3, 16, 32>}]} {
    %c0 = arith.constant 0 : index
    %c0_0 = arith.constant 0 : index
    %0 = vector.load %arg1[%c0, %c0_0] : memref<16x32xbf16, #tpu.memory_space<vmem>>, vector<16x32xbf16>
    %c0_1 = arith.constant 0 : index
    %c0_2 = arith.constant 0 : index
    %c0_3 = arith.constant 0 : index
    %1 = vector.load %arg2[%c0_1, %c0_2, %c0_3] : memref<3x32x32xbf16, #tpu.memory_space<vmem>>, vector<1x32x32xbf16>
    %2 = vector.shape_cast %1 : vector<1x32x32xbf16> to vector<32x32xbf16>
    %cst = arith.constant dense<0.000000e+00> : vector<16x32xf32>
    %3 = tpu.matmul %0, %2, %cst {dimension_numbers = #tpu.dot_dimension_numbers<[1], [0], [0], [1], [0, 0, 1, 1], [], []>} : vector<16x32xbf16>, vector<32x32xbf16>, vector<16x32xf32> -> vector<16x32xf32>
    %c0_4 = arith.constant 0 : index
    %c0_5 = arith.constant 0 : index
    %c0_6 = arith.constant 0 : index
    %4 = vector.load %arg3[%c0_4, %c0_5, %c0_6] : memref<3x1x32xf32, #tpu.memory_space<vmem>>, vector<1x1x32xf32>
    %5 = vector.shape_cast %4 : vector<1x1x32xf32> to vector<1x32xf32>
    %6 = vector.broadcast %5 : vector<1x32xf32> to vector<16x32xf32>
    %7 = arith.addf %3, %6 : vector<16x32xf32>
    %8 = arith.truncf %7 : vector<16x32xf32> to vector<16x32xbf16>
    %c0_7 = arith.constant 0 : index
    %c0_8 = arith.constant 0 : index
    %c0_9 = arith.constant 0 : index
    %9 = vector.load %arg4[%c0_7, %c0_8, %c0_9] : memref<3x16x32xbf16, #tpu.memory_space<vmem>>, vector<1x16x32xbf16>
    %10 = vector.shape_cast %9 : vector<1x16x32xbf16> to vector<16x32xbf16>
    %11 = vector.shape_cast %8 : vector<16x32xbf16> to vector<1x16x32xbf16>
    tpu.vector_store %arg4[%c0_7, %c0_8, %c0_9], %11 {strides = array<i32>} : memref<3x16x32xbf16, #tpu.memory_space<vmem>>, vector<1x16x32xbf16>,
    %c1 = arith.constant 1 : index
    %c0_10 = arith.constant 0 : index
    %c0_11 = arith.constant 0 : index
    %12 = vector.load %arg2[%c1, %c0_10, %c0_11] : memref<3x32x32xbf16, #tpu.memory_space<vmem>>, vector<1x32x32xbf16>
    %13 = vector.shape_cast %12 : vector<1x32x32xbf16> to vector<32x32xbf16>
    %cst_12 = arith.constant dense<0.000000e+00> : vector<16x32xf32>
    %14 = tpu.matmul %0, %13, %cst_12 {dimension_numbers = #tpu.dot_dimension_numbers<[1], [0], [0], [1], [0, 0, 1, 1], [], []>} : vector<16x32xbf16>, vector<32x32xbf16>, vector<16x32xf32> -> vector<16x32xf32>
    %c1_13 = arith.constant 1 : index
    %c0_14 = arith.constant 0 : index
    %c0_15 = arith.constant 0 : index
    %15 = vector.load %arg3[%c1_13, %c0_14, %c0_15] : memref<3x1x32xf32, #tpu.memory_space<vmem>>, vector<1x1x32xf32>
    %16 = vector.shape_cast %15 : vector<1x1x32xf32> to vector<1x32xf32>
    %17 = vector.broadcast %16 : vector<1x32xf32> to vector<16x32xf32>
    %18 = arith.addf %14, %17 : vector<16x32xf32>
    %19 = arith.truncf %18 : vector<16x32xf32> to vector<16x32xbf16>
    %c1_16 = arith.constant 1 : index
    %c0_17 = arith.constant 0 : index
    %c0_18 = arith.constant 0 : index
    %20 = vector.load %arg4[%c1_16, %c0_17, %c0_18] : memref<3x16x32xbf16, #tpu.memory_space<vmem>>, vector<1x16x32xbf16>
    %21 = vector.shape_cast %20 : vector<1x16x32xbf16> to vector<16x32xbf16>
    %22 = vector.shape_cast %19 : vector<16x32xbf16> to vector<1x16x32xbf16>
    tpu.vector_store %arg4[%c1_16, %c0_17, %c0_18], %22 {strides = array<i32>} : memref<3x16x32xbf16, #tpu.memory_space<vmem>>, vector<1x16x32xbf16>,
    %c2 = arith.constant 2 : index
    %c0_19 = arith.constant 0 : index
    %c0_20 = arith.constant 0 : index
    %23 = vector.load %arg2[%c2, %c0_19, %c0_20] : memref<3x32x32xbf16, #tpu.memory_space<vmem>>, vector<1x32x32xbf16>
    %24 = vector.shape_cast %23 : vector<1x32x32xbf16> to vector<32x32xbf16>
    %cst_21 = arith.constant dense<0.000000e+00> : vector<16x32xf32>
    %25 = tpu.matmul %0, %24, %cst_21 {dimension_numbers = #tpu.dot_dimension_numbers<[1], [0], [0], [1], [0, 0, 1, 1], [], []>} : vector<16x32xbf16>, vector<32x32xbf16>, vector<16x32xf32> -> vector<16x32xf32>
    %c2_22 = arith.constant 2 : index
    %c0_23 = arith.constant 0 : index
    %c0_24 = arith.constant 0 : index
    %26 = vector.load %arg3[%c2_22, %c0_23, %c0_24] : memref<3x1x32xf32, #tpu.memory_space<vmem>>, vector<1x1x32xf32>
    %27 = vector.shape_cast %26 : vector<1x1x32xf32> to vector<1x32xf32>
    %28 = vector.broadcast %27 : vector<1x32xf32> to vector<16x32xf32>
    %29 = arith.addf %25, %28 : vector<16x32xf32>
    %30 = arith.truncf %29 : vector<16x32xf32> to vector<16x32xbf16>
    %c2_25 = arith.constant 2 : index
    %c0_26 = arith.constant 0 : index
    %c0_27 = arith.constant 0 : index
    %31 = vector.load %arg4[%c2_25, %c0_26, %c0_27] : memref<3x16x32xbf16, #tpu.memory_space<vmem>>, vector<1x16x32xbf16>
    %32 = vector.shape_cast %31 : vector<1x16x32xbf16> to vector<16x32xbf16>
    %33 = vector.shape_cast %30 : vector<16x32xbf16> to vector<1x16x32xbf16>
    tpu.vector_store %arg4[%c2_25, %c0_26, %c0_27], %33 {strides = array<i32>} : memref<3x16x32xbf16, #tpu.memory_space<vmem>>, vector<1x16x32xbf16>,
    return
  }
  func.func @transform_0(%arg0: i32) -> (i32, i32) {
    %c0_i32 = arith.constant 0 : i32
    %c0_i32_0 = arith.constant 0 : i32
    return %arg0, %c0_i32 : i32, i32
  }
  func.func @transform_1(%arg0: i32) -> (i32, i32, i32) {
    %c0_i32 = arith.constant 0 : i32
    %c0_i32_0 = arith.constant 0 : i32
    %c0_i32_1 = arith.constant 0 : i32
    %c0_i32_2 = arith.constant 0 : i32
    return %c0_i32, %c0_i32_0, %c0_i32_1 : i32, i32, i32
  }
  func.func @transform_2(%arg0: i32) -> (i32, i32, i32) {
    %c0_i32 = arith.constant 0 : i32
    %c0_i32_0 = arith.constant 0 : i32
    %c0_i32_1 = arith.constant 0 : i32
    %c0_i32_2 = arith.constant 0 : i32
    return %c0_i32, %c0_i32_0, %c0_i32_1 : i32, i32, i32
  }
  func.func @transform_3(%arg0: i32) -> (i32, i32, i32) {
    %c0_i32 = arith.constant 0 : i32
    %c0_i32_0 = arith.constant 0 : i32
    %c0_i32_1 = arith.constant 0 : i32
    return %c0_i32, %arg0, %c0_i32_0 : i32, i32, i32
  }
}

module attributes {stable_mosaic.version = 11 : i64} {
  func.func @_ffn_ln_kernel(%arg0: i32, %arg1: i32, %arg2: memref<16x32xbf16, #tpu.memory_space<vmem>>, %arg3: memref<32x64xbf16, #tpu.memory_space<vmem>>, %arg4: memref<1x64xf32, #tpu.memory_space<vmem>>, %arg5: memref<64x32xbf16, #tpu.memory_space<vmem>>, %arg6: memref<1x32xf32, #tpu.memory_space<vmem>>, %arg7: memref<1x32xf32, #tpu.memory_space<vmem>>, %arg8: memref<1x32xf32, #tpu.memory_space<vmem>>, %arg9: memref<16x32xbf16, #tpu.memory_space<vmem>>, %arg10: memref<16x32xf32, #tpu.memory_space<vmem>>) attributes {dimension_semantics = [#tpu.dimension_semantics<parallel>, #tpu.dimension_semantics<arbitrary>], iteration_bounds = array<i64: 1, 1>, scalar_prefetch = 0 : i64, scratch_operands = 1 : i64, tpu.core_type = #tpu.core_type<tc>, window_params = [{transform_indices = @transform_0, window_bounds = array<i64: 16, 32>}, {transform_indices = @transform_1, window_bounds = array<i64: 32, 64>}, {transform_indices = @transform_2, window_bounds = array<i64: 1, 64>}, {transform_indices = @transform_3, window_bounds = array<i64: 64, 32>}, {pipeline_mode = #tpu.pipeline_mode<synchronous>, transform_indices = @transform_4, window_bounds = array<i64: 1, 32>}, {pipeline_mode = #tpu.pipeline_mode<synchronous>, transform_indices = @transform_5, window_bounds = array<i64: 1, 32>}, {pipeline_mode = #tpu.pipeline_mode<synchronous>, transform_indices = @transform_6, window_bounds = array<i64: 1, 32>}, {transform_indices = @transform_7, window_bounds = array<i64: 16, 32>}]} {
    %c0_i32 = arith.constant 0 : i32
    %0 = arith.cmpi eq, %arg1, %c0_i32 : i32
    %1 = arith.extui %0 : i1 to i32
    %c0_i32_0 = arith.constant 0 : i32
    %2 = arith.cmpi ne, %1, %c0_i32_0 : i32
    scf.if %2 {
      %cst_16 = arith.constant 0.000000e+00 : f32
      %20 = vector.broadcast %cst_16 : f32 to vector<16x32xf32>
      %c0_17 = arith.constant 0 : index
      %c0_18 = arith.constant 0 : index
      %21 = vector.load %arg10[%c0_17, %c0_18] : memref<16x32xf32, #tpu.memory_space<vmem>>, vector<16x32xf32>
      tpu.vector_store %arg10[%c0_17, %c0_18], %20 {strides = array<i32>} : memref<16x32xf32, #tpu.memory_space<vmem>>, vector<16x32xf32>,
    } else {
    }
    %c0 = arith.constant 0 : index
    %c0_1 = arith.constant 0 : index
    %3 = vector.load %arg2[%c0, %c0_1] : memref<16x32xbf16, #tpu.memory_space<vmem>>, vector<16x32xbf16>
    %c0_2 = arith.constant 0 : index
    %c0_3 = arith.constant 0 : index
    %4 = vector.load %arg3[%c0_2, %c0_3] : memref<32x64xbf16, #tpu.memory_space<vmem>>, vector<32x64xbf16>
    %cst = arith.constant dense<0.000000e+00> : vector<16x64xf32>
    %5 = tpu.matmul %3, %4, %cst {dimension_numbers = #tpu.dot_dimension_numbers<[1], [0], [0], [1], [0, 0, 1, 1], [], []>} : vector<16x32xbf16>, vector<32x64xbf16>, vector<16x64xf32> -> vector<16x64xf32>
    %c0_4 = arith.constant 0 : index
    %c0_5 = arith.constant 0 : index
    %6 = vector.load %arg4[%c0_4, %c0_5] : memref<1x64xf32, #tpu.memory_space<vmem>>, vector<1x64xf32>
    %7 = vector.broadcast %6 : vector<1x64xf32> to vector<16x64xf32>
    %8 = arith.addf %5, %7 : vector<16x64xf32>
    %cst_6 = arith.constant 0.000000e+00 : f32
    %9 = vector.broadcast %cst_6 : f32 to vector<16x64xf32>
    %10 = arith.maximumf %8, %9 : vector<16x64xf32>
    %11 = arith.truncf %10 : vector<16x64xf32> to vector<16x64xbf16>
    %c0_7 = arith.constant 0 : index
    %c0_8 = arith.constant 0 : index
    %12 = vector.load %arg10[%c0_7, %c0_8] : memref<16x32xf32, #tpu.memory_space<vmem>>, vector<16x32xf32>
    %c0_9 = arith.constant 0 : index
    %c0_10 = arith.constant 0 : index
    %13 = vector.load %arg5[%c0_9, %c0_10] : memref<64x32xbf16, #tpu.memory_space<vmem>>, vector<64x32xbf16>
    %cst_11 = arith.constant dense<0.000000e+00> : vector<16x32xf32>
    %14 = tpu.matmul %11, %13, %cst_11 {dimension_numbers = #tpu.dot_dimension_numbers<[1], [0], [0], [1], [0, 0, 1, 1], [], []>} : vector<16x64xbf16>, vector<64x32xbf16>, vector<16x32xf32> -> vector<16x32xf32>
    %15 = arith.addf %12, %14 : vector<16x32xf32>
    %c0_12 = arith.constant 0 : index
    %c0_13 = arith.constant 0 : index
    %16 = vector.load %arg10[%c0_12, %c0_13] : memref<16x32xf32, #tpu.memory_space<vmem>>, vector<16x32xf32>
    tpu.vector_store %arg10[%c0_12, %c0_13], %15 {strides = array<i32>} : memref<16x32xf32, #tpu.memory_space<vmem>>, vector<16x32xf32>,
    %c0_i32_14 = arith.constant 0 : i32
    %17 = arith.cmpi eq, %arg1, %c0_i32_14 : i32
    %18 = arith.extui %17 : i1 to i32
    %c0_i32_15 = arith.constant 0 : i32
    %19 = arith.cmpi ne, %18, %c0_i32_15 : i32
    scf.if %19 {
      %20 = arith.extf %3 : vector<16x32xbf16> to vector<16x32xf32>
      %c0_16 = arith.constant 0 : index
      %c0_17 = arith.constant 0 : index
      %21 = vector.load %arg10[%c0_16, %c0_17] : memref<16x32xf32, #tpu.memory_space<vmem>>, vector<16x32xf32>
      %22 = arith.addf %20, %21 : vector<16x32xf32>
      %c0_18 = arith.constant 0 : index
      %c0_19 = arith.constant 0 : index
      %23 = vector.load %arg6[%c0_18, %c0_19] : memref<1x32xf32, #tpu.memory_space<vmem>>, vector<1x32xf32>
      %24 = vector.broadcast %23 : vector<1x32xf32> to vector<16x32xf32>
      %25 = arith.addf %22, %24 : vector<16x32xf32>
      %cst_20 = arith.constant dense<0.000000e+00> : vector<16xf32>
      %26 = vector.multi_reduction <add>, %25, %cst_20 [1] : vector<16x32xf32> to vector<16xf32>
      %27 = vector.shape_cast %26 : vector<16xf32> to vector<16x1xf32>
      %cst_21 = arith.constant 3.200000e+01 : f32
      %28 = vector.broadcast %cst_21 : f32 to vector<16x1xf32>
      %29 = arith.divf %27, %28 : vector<16x1xf32>
      %30 = vector.broadcast %29 : vector<16x1xf32> to vector<16x32xf32>
      %31 = arith.subf %25, %30 : vector<16x32xf32>
      %32 = arith.mulf %31, %31 : vector<16x32xf32>
      %cst_22 = arith.constant dense<0.000000e+00> : vector<16xf32>
      %33 = vector.multi_reduction <add>, %32, %cst_22 [1] : vector<16x32xf32> to vector<16xf32>
      %34 = vector.shape_cast %33 : vector<16xf32> to vector<16x1xf32>
      %cst_23 = arith.constant 3.200000e+01 : f32
      %35 = vector.broadcast %cst_23 : f32 to vector<16x1xf32>
      %36 = arith.divf %34, %35 : vector<16x1xf32>
      %37 = vector.broadcast %29 : vector<16x1xf32> to vector<16x32xf32>
      %38 = arith.subf %25, %37 : vector<16x32xf32>
      %cst_24 = arith.constant 9.99999974E-6 : f32
      %39 = vector.broadcast %cst_24 : f32 to vector<16x1xf32>
      %40 = arith.addf %36, %39 : vector<16x1xf32>
      %41 = math.rsqrt %40 : vector<16x1xf32>
      %42 = vector.broadcast %41 : vector<16x1xf32> to vector<16x32xf32>
      %43 = arith.mulf %38, %42 : vector<16x32xf32>
      %c0_25 = arith.constant 0 : index
      %c0_26 = arith.constant 0 : index
      %44 = vector.load %arg7[%c0_25, %c0_26] : memref<1x32xf32, #tpu.memory_space<vmem>>, vector<1x32xf32>
      %45 = vector.broadcast %44 : vector<1x32xf32> to vector<16x32xf32>
      %46 = arith.mulf %43, %45 : vector<16x32xf32>
      %c0_27 = arith.constant 0 : index
      %c0_28 = arith.constant 0 : index
      %47 = vector.load %arg8[%c0_27, %c0_28] : memref<1x32xf32, #tpu.memory_space<vmem>>, vector<1x32xf32>
      %48 = vector.broadcast %47 : vector<1x32xf32> to vector<16x32xf32>
      %49 = arith.addf %46, %48 : vector<16x32xf32>
      %50 = arith.truncf %49 : vector<16x32xf32> to vector<16x32xbf16>
      %c0_29 = arith.constant 0 : index
      %c0_30 = arith.constant 0 : index
      %51 = vector.load %arg9[%c0_29, %c0_30] : memref<16x32xbf16, #tpu.memory_space<vmem>>, vector<16x32xbf16>
      tpu.vector_store %arg9[%c0_29, %c0_30], %50 {strides = array<i32>} : memref<16x32xbf16, #tpu.memory_space<vmem>>, vector<16x32xbf16>,
    } else {
    }
    return
  }
  func.func @transform_0(%arg0: i32, %arg1: i32) -> (i32, i32) {
    %c0_i32 = arith.constant 0 : i32
    %c0_i32_0 = arith.constant 0 : i32
    return %arg0, %c0_i32 : i32, i32
  }
  func.func @transform_1(%arg0: i32, %arg1: i32) -> (i32, i32) {
    %c0_i32 = arith.constant 0 : i32
    %c0_i32_0 = arith.constant 0 : i32
    return %c0_i32, %arg1 : i32, i32
  }
  func.func @transform_2(%arg0: i32, %arg1: i32) -> (i32, i32) {
    %c0_i32 = arith.constant 0 : i32
    %c0_i32_0 = arith.constant 0 : i32
    return %c0_i32, %arg1 : i32, i32
  }
  func.func @transform_3(%arg0: i32, %arg1: i32) -> (i32, i32) {
    %c0_i32 = arith.constant 0 : i32
    %c0_i32_0 = arith.constant 0 : i32
    return %arg1, %c0_i32 : i32, i32
  }
  func.func @transform_4(%arg0: i32, %arg1: i32) -> (i32, i32) {
    %c0_i32 = arith.constant 0 : i32
    %c0_i32_0 = arith.constant 0 : i32
    %c0_i32_1 = arith.constant 0 : i32
    return %c0_i32, %c0_i32_0 : i32, i32
  }
  func.func @transform_5(%arg0: i32, %arg1: i32) -> (i32, i32) {
    %c0_i32 = arith.constant 0 : i32
    %c0_i32_0 = arith.constant 0 : i32
    %c0_i32_1 = arith.constant 0 : i32
    return %c0_i32, %c0_i32_0 : i32, i32
  }
  func.func @transform_6(%arg0: i32, %arg1: i32) -> (i32, i32) {
    %c0_i32 = arith.constant 0 : i32
    %c0_i32_0 = arith.constant 0 : i32
    %c0_i32_1 = arith.constant 0 : i32
    return %c0_i32, %c0_i32_0 : i32, i32
  }
  func.func @transform_7(%arg0: i32, %arg1: i32) -> (i32, i32) {
    %c0_i32 = arith.constant 0 : i32
    %c0_i32_0 = arith.constant 0 : i32
    return %arg0, %c0_i32 : i32, i32
  }
}

module attributes {stable_mosaic.version = 11 : i64} {
  func.func @_flash_mha_ln_kernel(%arg0: i32, %arg1: i32, %arg2: i32, %arg3: memref<1x1x8x32xbf16, #tpu.memory_space<vmem>>, %arg4: memref<1x1x8x32xbf16, #tpu.memory_space<vmem>>, %arg5: memref<1x1x8x32xbf16, #tpu.memory_space<vmem>>, %arg6: memref<1x1x8xf32, #tpu.memory_space<vmem>>, %arg7: memref<1x8x32xbf16, #tpu.memory_space<vmem>>, %arg8: memref<32x32xbf16, #tpu.memory_space<vmem>>, %arg9: memref<1x32xf32, #tpu.memory_space<vmem>>, %arg10: memref<1x32xf32, #tpu.memory_space<vmem>>, %arg11: memref<1x32xf32, #tpu.memory_space<vmem>>, %arg12: memref<1x8x32xbf16, #tpu.memory_space<vmem>>, %arg13: memref<4x8x1xf32, #tpu.memory_space<vmem>>, %arg14: memref<4x8x1xf32, #tpu.memory_space<vmem>>, %arg15: memref<4x8x8xf32, #tpu.memory_space<vmem>>) attributes {dimension_semantics = [#tpu.dimension_semantics<parallel>, #tpu.dimension_semantics<parallel>, #tpu.dimension_semantics<arbitrary>], iteration_bounds = array<i64: 2, 1, 1>, scalar_prefetch = 0 : i64, scratch_operands = 3 : i64, tpu.core_type = #tpu.core_type<tc>, window_params = [{transform_indices = @transform_0, window_bounds = array<i64: 1, 1, 8, 32>}, {transform_indices = @transform_1, window_bounds = array<i64: 1, 1, 8, 32>}, {transform_indices = @transform_2, window_bounds = array<i64: 1, 1, 8, 32>}, {transform_indices = @transform_3, window_bounds = array<i64: 1, 1, 8>}, {transform_indices = @transform_4, window_bounds = array<i64: 1, 8, 32>}, {pipeline_mode = #tpu.pipeline_mode<synchronous>, transform_indices = @transform_5, window_bounds = array<i64: 32, 32>}, {pipeline_mode = #tpu.pipeline_mode<synchronous>, transform_indices = @transform_6, window_bounds = array<i64: 1, 32>}, {pipeline_mode = #tpu.pipeline_mode<synchronous>, transform_indices = @transform_7, window_bounds = array<i64: 1, 32>}, {pipeline_mode = #tpu.pipeline_mode<synchronous>, transform_indices = @transform_8, window_bounds = array<i64: 1, 32>}, {transform_indices = @transform_9, window_bounds = array<i64: 1, 8, 32>}]} {
    %c0_i32 = arith.constant 0 : i32
    %0 = arith.cmpi eq, %arg2, %c0_i32 : i32
    %1 = arith.extui %0 : i1 to i32
    %c0_i32_0 = arith.constant 0 : i32
    %2 = arith.cmpi ne, %1, %c0_i32_0 : i32
    scf.if %2 {
      %cst_105 = arith.constant -1.000000e+30 : f32
      %174 = vector.broadcast %cst_105 : f32 to vector<4x8x1xf32>
      %c0_106 = arith.constant 0 : index
      %c0_107 = arith.constant 0 : index
      %c0_108 = arith.constant 0 : index
      %175 = vector.load %arg13[%c0_106, %c0_107, %c0_108] : memref<4x8x1xf32, #tpu.memory_space<vmem>>, vector<4x8x1xf32>
      tpu.vector_store %arg13[%c0_106, %c0_107, %c0_108], %174 {strides = array<i32>} : memref<4x8x1xf32, #tpu.memory_space<vmem>>, vector<4x8x1xf32>,
      %cst_109 = arith.constant 0.000000e+00 : f32
      %176 = vector.broadcast %cst_109 : f32 to vector<4x8x1xf32>
      %c0_110 = arith.constant 0 : index
      %c0_111 = arith.constant 0 : index
      %c0_112 = arith.constant 0 : index
      %177 = vector.load %arg14[%c0_110, %c0_111, %c0_112] : memref<4x8x1xf32, #tpu.memory_space<vmem>>, vector<4x8x1xf32>
      tpu.vector_store %arg14[%c0_110, %c0_111, %c0_112], %176 {strides = array<i32>} : memref<4x8x1xf32, #tpu.memory_space<vmem>>, vector<4x8x1xf32>,
      %cst_113 = arith.constant 0.000000e+00 : f32
      %178 = vector.broadcast %cst_113 : f32 to vector<4x8x8xf32>
      %c0_114 = arith.constant 0 : index
      %c0_115 = arith.constant 0 : index
      %c0_116 = arith.constant 0 : index
      %179 = vector.load %arg15[%c0_114, %c0_115, %c0_116] : memref<4x8x8xf32, #tpu.memory_space<vmem>>, vector<4x8x8xf32>
      tpu.vector_store %arg15[%c0_114, %c0_115, %c0_116], %178 {strides = array<i32>} : memref<4x8x8xf32, #tpu.memory_space<vmem>>, vector<4x8x8xf32>,
    } else {
    }
    %c0 = arith.constant 0 : index
    %c0_1 = arith.constant 0 : index
    %c0_2 = arith.constant 0 : index
    %c0_3 = arith.constant 0 : index
    %3 = vector.load %arg3[%c0, %c0_1, %c0_2, %c0_3] : memref<1x1x8x32xbf16, #tpu.memory_space<vmem>>, vector<1x1x8x32xbf16>
    %4 = vector.shape_cast %3 : vector<1x1x8x32xbf16> to vector<8x32xbf16>
    %c0_4 = arith.constant 0 : index
    %c0_5 = arith.constant 0 : index
    %c0_6 = arith.constant 0 : index
    %c0_7 = arith.constant 0 : index
    %5 = vector.load %arg4[%c0_4, %c0_5, %c0_6, %c0_7] : memref<1x1x8x32xbf16, #tpu.memory_space<vmem>>, vector<1x1x8x32xbf16>
    %6 = vector.shape_cast %5 : vector<1x1x8x32xbf16> to vector<8x32xbf16>
    %c0_8 = arith.constant 0 : index
    %c0_9 = arith.constant 0 : index
    %c0_10 = arith.constant 0 : index
    %c0_11 = arith.constant 0 : index
    %7 = vector.load %arg5[%c0_8, %c0_9, %c0_10, %c0_11] : memref<1x1x8x32xbf16, #tpu.memory_space<vmem>>, vector<1x1x8x32xbf16>
    %8 = vector.shape_cast %7 : vector<1x1x8x32xbf16> to vector<8x32xbf16>
    %c0_12 = arith.constant 0 : index
    %c0_13 = arith.constant 0 : index
    %c0_14 = arith.constant 0 : index
    %9 = vector.load %arg6[%c0_12, %c0_13, %c0_14] : memref<1x1x8xf32, #tpu.memory_space<vmem>>, vector<1x1x8xf32>
    %10 = vector.shape_cast %9 : vector<1x1x8xf32> to vector<1x8xf32>
    %11 = vector.extract_strided_slice %4 {offsets = [0, 0], sizes = [8, 8], strides = [1, 1]} : vector<8x32xbf16> to vector<8x8xbf16>
    %12 = vector.extract_strided_slice %6 {offsets = [0, 0], sizes = [8, 8], strides = [1, 1]} : vector<8x32xbf16> to vector<8x8xbf16>
    %13 = vector.extract_strided_slice %8 {offsets = [0, 0], sizes = [8, 8], strides = [1, 1]} : vector<8x32xbf16> to vector<8x8xbf16>
    %cst = arith.constant dense<0.000000e+00> : vector<8x8xf32>
    %14 = tpu.matmul %11, %12, %cst {dimension_numbers = #tpu.dot_dimension_numbers<[1], [1], [0], [0], [0, 0, 1, 0], [], []>} : vector<8x8xbf16>, vector<8x8xbf16>, vector<8x8xf32> -> vector<8x8xf32>
    %cst_15 = arith.constant 0.353553385 : f32
    %15 = vector.broadcast %cst_15 : f32 to vector<8x8xf32>
    %16 = arith.mulf %14, %15 : vector<8x8xf32>
    %17 = vector.broadcast %10 : vector<1x8xf32> to vector<8x8xf32>
    %18 = arith.addf %16, %17 : vector<8x8xf32>
    %c0_16 = arith.constant 0 : index
    %c0_17 = arith.constant 0 : index
    %c0_18 = arith.constant 0 : index
    %19 = vector.load %arg13[%c0_16, %c0_17, %c0_18] : memref<4x8x1xf32, #tpu.memory_space<vmem>>, vector<1x8x1xf32>
    %20 = vector.shape_cast %19 : vector<1x8x1xf32> to vector<8x1xf32>
    %cst_19 = arith.constant dense<0xFF800000> : vector<8xf32>
    %21 = vector.multi_reduction <maximumf>, %18, %cst_19 [1] : vector<8x8xf32> to vector<8xf32>
    %22 = vector.shape_cast %21 : vector<8xf32> to vector<8x1xf32>
    %23 = arith.maximumf %20, %22 : vector<8x1xf32>
    %24 = arith.subf %20, %23 : vector<8x1xf32>
    %25 = math.exp %24 : vector<8x1xf32>
    %26 = vector.broadcast %23 : vector<8x1xf32> to vector<8x8xf32>
    %27 = arith.subf %18, %26 : vector<8x8xf32>
    %28 = math.exp %27 : vector<8x8xf32>
    %c0_20 = arith.constant 0 : index
    %c0_21 = arith.constant 0 : index
    %c0_22 = arith.constant 0 : index
    %29 = vector.load %arg14[%c0_20, %c0_21, %c0_22] : memref<4x8x1xf32, #tpu.memory_space<vmem>>, vector<1x8x1xf32>
    %30 = vector.shape_cast %29 : vector<1x8x1xf32> to vector<8x1xf32>
    %31 = arith.mulf %25, %30 : vector<8x1xf32>
    %cst_23 = arith.constant dense<0.000000e+00> : vector<8xf32>
    %32 = vector.multi_reduction <add>, %28, %cst_23 [1] : vector<8x8xf32> to vector<8xf32>
    %33 = vector.shape_cast %32 : vector<8xf32> to vector<8x1xf32>
    %34 = arith.addf %31, %33 : vector<8x1xf32>
    %c0_24 = arith.constant 0 : index
    %c0_25 = arith.constant 0 : index
    %c0_26 = arith.constant 0 : index
    %35 = vector.load %arg14[%c0_24, %c0_25, %c0_26] : memref<4x8x1xf32, #tpu.memory_space<vmem>>, vector<1x8x1xf32>
    %36 = vector.shape_cast %35 : vector<1x8x1xf32> to vector<8x1xf32>
    %37 = vector.shape_cast %34 : vector<8x1xf32> to vector<1x8x1xf32>
    tpu.vector_store %arg14[%c0_24, %c0_25, %c0_26], %37 {strides = array<i32>} : memref<4x8x1xf32, #tpu.memory_space<vmem>>, vector<1x8x1xf32>,
    %c0_27 = arith.constant 0 : index
    %c0_28 = arith.constant 0 : index
    %c0_29 = arith.constant 0 : index
    %38 = vector.load %arg15[%c0_27, %c0_28, %c0_29] : memref<4x8x8xf32, #tpu.memory_space<vmem>>, vector<1x8x8xf32>
    %39 = vector.shape_cast %38 : vector<1x8x8xf32> to vector<8x8xf32>
    %40 = vector.broadcast %25 : vector<8x1xf32> to vector<8x8xf32>
    %41 = arith.mulf %40, %39 : vector<8x8xf32>
    %42 = arith.truncf %28 : vector<8x8xf32> to vector<8x8xbf16>
    %cst_30 = arith.constant dense<0.000000e+00> : vector<8x8xf32>
    %43 = tpu.matmul %42, %13, %cst_30 {dimension_numbers = #tpu.dot_dimension_numbers<[1], [0], [0], [1], [0, 0, 1, 1], [], []>} : vector<8x8xbf16>, vector<8x8xbf16>, vector<8x8xf32> -> vector<8x8xf32>
    %44 = arith.addf %41, %43 : vector<8x8xf32>
    %c0_31 = arith.constant 0 : index
    %c0_32 = arith.constant 0 : index
    %c0_33 = arith.constant 0 : index
    %45 = vector.load %arg15[%c0_31, %c0_32, %c0_33] : memref<4x8x8xf32, #tpu.memory_space<vmem>>, vector<1x8x8xf32>
    %46 = vector.shape_cast %45 : vector<1x8x8xf32> to vector<8x8xf32>
    %47 = vector.shape_cast %44 : vector<8x8xf32> to vector<1x8x8xf32>
    tpu.vector_store %arg15[%c0_31, %c0_32, %c0_33], %47 {strides = array<i32>} : memref<4x8x8xf32, #tpu.memory_space<vmem>>, vector<1x8x8xf32>,
    %c0_34 = arith.constant 0 : index
    %c0_35 = arith.constant 0 : index
    %c0_36 = arith.constant 0 : index
    %48 = vector.load %arg13[%c0_34, %c0_35, %c0_36] : memref<4x8x1xf32, #tpu.memory_space<vmem>>, vector<1x8x1xf32>
    %49 = vector.shape_cast %48 : vector<1x8x1xf32> to vector<8x1xf32>
    %50 = vector.shape_cast %23 : vector<8x1xf32> to vector<1x8x1xf32>
    tpu.vector_store %arg13[%c0_34, %c0_35, %c0_36], %50 {strides = array<i32>} : memref<4x8x1xf32, #tpu.memory_space<vmem>>, vector<1x8x1xf32>,
    %51 = vector.extract_strided_slice %4 {offsets = [0, 8], sizes = [8, 8], strides = [1, 1]} : vector<8x32xbf16> to vector<8x8xbf16>
    %52 = vector.extract_strided_slice %6 {offsets = [0, 8], sizes = [8, 8], strides = [1, 1]} : vector<8x32xbf16> to vector<8x8xbf16>
    %53 = vector.extract_strided_slice %8 {offsets = [0, 8], sizes = [8, 8], strides = [1, 1]} : vector<8x32xbf16> to vector<8x8xbf16>
    %cst_37 = arith.constant dense<0.000000e+00> : vector<8x8xf32>
    %54 = tpu.matmul %51, %52, %cst_37 {dimension_numbers = #tpu.dot_dimension_numbers<[1], [1], [0], [0], [0, 0, 1, 0], [], []>} : vector<8x8xbf16>, vector<8x8xbf16>, vector<8x8xf32> -> vector<8x8xf32>
    %cst_38 = arith.constant 0.353553385 : f32
    %55 = vector.broadcast %cst_38 : f32 to vector<8x8xf32>
    %56 = arith.mulf %54, %55 : vector<8x8xf32>
    %57 = vector.broadcast %10 : vector<1x8xf32> to vector<8x8xf32>
    %58 = arith.addf %56, %57 : vector<8x8xf32>
    %c1 = arith.constant 1 : index
    %c0_39 = arith.constant 0 : index
    %c0_40 = arith.constant 0 : index
    %59 = vector.load %arg13[%c1, %c0_39, %c0_40] : memref<4x8x1xf32, #tpu.memory_space<vmem>>, vector<1x8x1xf32>
    %60 = vector.shape_cast %59 : vector<1x8x1xf32> to vector<8x1xf32>
    %cst_41 = arith.constant dense<0xFF800000> : vector<8xf32>
    %61 = vector.multi_reduction <maximumf>, %58, %cst_41 [1] : vector<8x8xf32> to vector<8xf32>
    %62 = vector.shape_cast %61 : vector<8xf32> to vector<8x1xf32>
    %63 = arith.maximumf %60, %62 : vector<8x1xf32>
    %64 = arith.subf %60, %63 : vector<8x1xf32>
    %65 = math.exp %64 : vector<8x1xf32>
    %66 = vector.broadcast %63 : vector<8x1xf32> to vector<8x8xf32>
    %67 = arith.subf %58, %66 : vector<8x8xf32>
    %68 = math.exp %67 : vector<8x8xf32>
    %c1_42 = arith.constant 1 : index
    %c0_43 = arith.constant 0 : index
    %c0_44 = arith.constant 0 : index
    %69 = vector.load %arg14[%c1_42, %c0_43, %c0_44] : memref<4x8x1xf32, #tpu.memory_space<vmem>>, vector<1x8x1xf32>
    %70 = vector.shape_cast %69 : vector<1x8x1xf32> to vector<8x1xf32>
    %71 = arith.mulf %65, %70 : vector<8x1xf32>
    %cst_45 = arith.constant dense<0.000000e+00> : vector<8xf32>
    %72 = vector.multi_reduction <add>, %68, %cst_45 [1] : vector<8x8xf32> to vector<8xf32>
    %73 = vector.shape_cast %72 : vector<8xf32> to vector<8x1xf32>
    %74 = arith.addf %71, %73 : vector<8x1xf32>
    %c1_46 = arith.constant 1 : index
    %c0_47 = arith.constant 0 : index
    %c0_48 = arith.constant 0 : index
    %75 = vector.load %arg14[%c1_46, %c0_47, %c0_48] : memref<4x8x1xf32, #tpu.memory_space<vmem>>, vector<1x8x1xf32>
    %76 = vector.shape_cast %75 : vector<1x8x1xf32> to vector<8x1xf32>
    %77 = vector.shape_cast %74 : vector<8x1xf32> to vector<1x8x1xf32>
    tpu.vector_store %arg14[%c1_46, %c0_47, %c0_48], %77 {strides = array<i32>} : memref<4x8x1xf32, #tpu.memory_space<vmem>>, vector<1x8x1xf32>,
    %c1_49 = arith.constant 1 : index
    %c0_50 = arith.constant 0 : index
    %c0_51 = arith.constant 0 : index
    %78 = vector.load %arg15[%c1_49, %c0_50, %c0_51] : memref<4x8x8xf32, #tpu.memory_space<vmem>>, vector<1x8x8xf32>
    %79 = vector.shape_cast %78 : vector<1x8x8xf32> to vector<8x8xf32>
    %80 = vector.broadcast %65 : vector<8x1xf32> to vector<8x8xf32>
    %81 = arith.mulf %80, %79 : vector<8x8xf32>
    %82 = arith.truncf %68 : vector<8x8xf32> to vector<8x8xbf16>
    %cst_52 = arith.constant dense<0.000000e+00> : vector<8x8xf32>
    %83 = tpu.matmul %82, %53, %cst_52 {dimension_numbers = #tpu.dot_dimension_numbers<[1], [0], [0], [1], [0, 0, 1, 1], [], []>} : vector<8x8xbf16>, vector<8x8xbf16>, vector<8x8xf32> -> vector<8x8xf32>
    %84 = arith.addf %81, %83 : vector<8x8xf32>
    %c1_53 = arith.constant 1 : index
    %c0_54 = arith.constant 0 : index
    %c0_55 = arith.constant 0 : index
    %85 = vector.load %arg15[%c1_53, %c0_54, %c0_55] : memref<4x8x8xf32, #tpu.memory_space<vmem>>, vector<1x8x8xf32>
    %86 = vector.shape_cast %85 : vector<1x8x8xf32> to vector<8x8xf32>
    %87 = vector.shape_cast %84 : vector<8x8xf32> to vector<1x8x8xf32>
    tpu.vector_store %arg15[%c1_53, %c0_54, %c0_55], %87 {strides = array<i32>} : memref<4x8x8xf32, #tpu.memory_space<vmem>>, vector<1x8x8xf32>,
    %c1_56 = arith.constant 1 : index
    %c0_57 = arith.constant 0 : index
    %c0_58 = arith.constant 0 : index
    %88 = vector.load %arg13[%c1_56, %c0_57, %c0_58] : memref<4x8x1xf32, #tpu.memory_space<vmem>>, vector<1x8x1xf32>
    %89 = vector.shape_cast %88 : vector<1x8x1xf32> to vector<8x1xf32>
    %90 = vector.shape_cast %63 : vector<8x1xf32> to vector<1x8x1xf32>
    tpu.vector_store %arg13[%c1_56, %c0_57, %c0_58], %90 {strides = array<i32>} : memref<4x8x1xf32, #tpu.memory_space<vmem>>, vector<1x8x1xf32>,
    %91 = vector.extract_strided_slice %4 {offsets = [0, 16], sizes = [8, 8], strides = [1, 1]} : vector<8x32xbf16> to vector<8x8xbf16>
    %92 = vector.extract_strided_slice %6 {offsets = [0, 16], sizes = [8, 8], strides = [1, 1]} : vector<8x32xbf16> to vector<8x8xbf16>
    %93 = vector.extract_strided_slice %8 {offsets = [0, 16], sizes = [8, 8], strides = [1, 1]} : vector<8x32xbf16> to vector<8x8xbf16>
    %cst_59 = arith.constant dense<0.000000e+00> : vector<8x8xf32>
    %94 = tpu.matmul %91, %92, %cst_59 {dimension_numbers = #tpu.dot_dimension_numbers<[1], [1], [0], [0], [0, 0, 1, 0], [], []>} : vector<8x8xbf16>, vector<8x8xbf16>, vector<8x8xf32> -> vector<8x8xf32>
    %cst_60 = arith.constant 0.353553385 : f32
    %95 = vector.broadcast %cst_60 : f32 to vector<8x8xf32>
    %96 = arith.mulf %94, %95 : vector<8x8xf32>
    %97 = vector.broadcast %10 : vector<1x8xf32> to vector<8x8xf32>
    %98 = arith.addf %96, %97 : vector<8x8xf32>
    %c2 = arith.constant 2 : index
    %c0_61 = arith.constant 0 : index
    %c0_62 = arith.constant 0 : index
    %99 = vector.load %arg13[%c2, %c0_61, %c0_62] : memref<4x8x1xf32, #tpu.memory_space<vmem>>, vector<1x8x1xf32>
    %100 = vector.shape_cast %99 : vector<1x8x1xf32> to vector<8x1xf32>
    %cst_63 = arith.constant dense<0xFF800000> : vector<8xf32>
    %101 = vector.multi_reduction <maximumf>, %98, %cst_63 [1] : vector<8x8xf32> to vector<8xf32>
    %102 = vector.shape_cast %101 : vector<8xf32> to vector<8x1xf32>
    %103 = arith.maximumf %100, %102 : vector<8x1xf32>
    %104 = arith.subf %100, %103 : vector<8x1xf32>
    %105 = math.exp %104 : vector<8x1xf32>
    %106 = vector.broadcast %103 : vector<8x1xf32> to vector<8x8xf32>
    %107 = arith.subf %98, %106 : vector<8x8xf32>
    %108 = math.exp %107 : vector<8x8xf32>
    %c2_64 = arith.constant 2 : index
    %c0_65 = arith.constant 0 : index
    %c0_66 = arith.constant 0 : index
    %109 = vector.load %arg14[%c2_64, %c0_65, %c0_66] : memref<4x8x1xf32, #tpu.memory_space<vmem>>, vector<1x8x1xf32>
    %110 = vector.shape_cast %109 : vector<1x8x1xf32> to vector<8x1xf32>
    %111 = arith.mulf %105, %110 : vector<8x1xf32>
    %cst_67 = arith.constant dense<0.000000e+00> : vector<8xf32>
    %112 = vector.multi_reduction <add>, %108, %cst_67 [1] : vector<8x8xf32> to vector<8xf32>
    %113 = vector.shape_cast %112 : vector<8xf32> to vector<8x1xf32>
    %114 = arith.addf %111, %113 : vector<8x1xf32>
    %c2_68 = arith.constant 2 : index
    %c0_69 = arith.constant 0 : index
    %c0_70 = arith.constant 0 : index
    %115 = vector.load %arg14[%c2_68, %c0_69, %c0_70] : memref<4x8x1xf32, #tpu.memory_space<vmem>>, vector<1x8x1xf32>
    %116 = vector.shape_cast %115 : vector<1x8x1xf32> to vector<8x1xf32>
    %117 = vector.shape_cast %114 : vector<8x1xf32> to vector<1x8x1xf32>
    tpu.vector_store %arg14[%c2_68, %c0_69, %c0_70], %117 {strides = array<i32>} : memref<4x8x1xf32, #tpu.memory_space<vmem>>, vector<1x8x1xf32>,
    %c2_71 = arith.constant 2 : index
    %c0_72 = arith.constant 0 : index
    %c0_73 = arith.constant 0 : index
    %118 = vector.load %arg15[%c2_71, %c0_72, %c0_73] : memref<4x8x8xf32, #tpu.memory_space<vmem>>, vector<1x8x8xf32>
    %119 = vector.shape_cast %118 : vector<1x8x8xf32> to vector<8x8xf32>
    %120 = vector.broadcast %105 : vector<8x1xf32> to vector<8x8xf32>
    %121 = arith.mulf %120, %119 : vector<8x8xf32>
    %122 = arith.truncf %108 : vector<8x8xf32> to vector<8x8xbf16>
    %cst_74 = arith.constant dense<0.000000e+00> : vector<8x8xf32>
    %123 = tpu.matmul %122, %93, %cst_74 {dimension_numbers = #tpu.dot_dimension_numbers<[1], [0], [0], [1], [0, 0, 1, 1], [], []>} : vector<8x8xbf16>, vector<8x8xbf16>, vector<8x8xf32> -> vector<8x8xf32>
    %124 = arith.addf %121, %123 : vector<8x8xf32>
    %c2_75 = arith.constant 2 : index
    %c0_76 = arith.constant 0 : index
    %c0_77 = arith.constant 0 : index
    %125 = vector.load %arg15[%c2_75, %c0_76, %c0_77] : memref<4x8x8xf32, #tpu.memory_space<vmem>>, vector<1x8x8xf32>
    %126 = vector.shape_cast %125 : vector<1x8x8xf32> to vector<8x8xf32>
    %127 = vector.shape_cast %124 : vector<8x8xf32> to vector<1x8x8xf32>
    tpu.vector_store %arg15[%c2_75, %c0_76, %c0_77], %127 {strides = array<i32>} : memref<4x8x8xf32, #tpu.memory_space<vmem>>, vector<1x8x8xf32>,
    %c2_78 = arith.constant 2 : index
    %c0_79 = arith.constant 0 : index
    %c0_80 = arith.constant 0 : index
    %128 = vector.load %arg13[%c2_78, %c0_79, %c0_80] : memref<4x8x1xf32, #tpu.memory_space<vmem>>, vector<1x8x1xf32>
    %129 = vector.shape_cast %128 : vector<1x8x1xf32> to vector<8x1xf32>
    %130 = vector.shape_cast %103 : vector<8x1xf32> to vector<1x8x1xf32>
    tpu.vector_store %arg13[%c2_78, %c0_79, %c0_80], %130 {strides = array<i32>} : memref<4x8x1xf32, #tpu.memory_space<vmem>>, vector<1x8x1xf32>,
    %131 = vector.extract_strided_slice %4 {offsets = [0, 24], sizes = [8, 8], strides = [1, 1]} : vector<8x32xbf16> to vector<8x8xbf16>
    %132 = vector.extract_strided_slice %6 {offsets = [0, 24], sizes = [8, 8], strides = [1, 1]} : vector<8x32xbf16> to vector<8x8xbf16>
    %133 = vector.extract_strided_slice %8 {offsets = [0, 24], sizes = [8, 8], strides = [1, 1]} : vector<8x32xbf16> to vector<8x8xbf16>
    %cst_81 = arith.constant dense<0.000000e+00> : vector<8x8xf32>
    %134 = tpu.matmul %131, %132, %cst_81 {dimension_numbers = #tpu.dot_dimension_numbers<[1], [1], [0], [0], [0, 0, 1, 0], [], []>} : vector<8x8xbf16>, vector<8x8xbf16>, vector<8x8xf32> -> vector<8x8xf32>
    %cst_82 = arith.constant 0.353553385 : f32
    %135 = vector.broadcast %cst_82 : f32 to vector<8x8xf32>
    %136 = arith.mulf %134, %135 : vector<8x8xf32>
    %137 = vector.broadcast %10 : vector<1x8xf32> to vector<8x8xf32>
    %138 = arith.addf %136, %137 : vector<8x8xf32>
    %c3 = arith.constant 3 : index
    %c0_83 = arith.constant 0 : index
    %c0_84 = arith.constant 0 : index
    %139 = vector.load %arg13[%c3, %c0_83, %c0_84] : memref<4x8x1xf32, #tpu.memory_space<vmem>>, vector<1x8x1xf32>
    %140 = vector.shape_cast %139 : vector<1x8x1xf32> to vector<8x1xf32>
    %cst_85 = arith.constant dense<0xFF800000> : vector<8xf32>
    %141 = vector.multi_reduction <maximumf>, %138, %cst_85 [1] : vector<8x8xf32> to vector<8xf32>
    %142 = vector.shape_cast %141 : vector<8xf32> to vector<8x1xf32>
    %143 = arith.maximumf %140, %142 : vector<8x1xf32>
    %144 = arith.subf %140, %143 : vector<8x1xf32>
    %145 = math.exp %144 : vector<8x1xf32>
    %146 = vector.broadcast %143 : vector<8x1xf32> to vector<8x8xf32>
    %147 = arith.subf %138, %146 : vector<8x8xf32>
    %148 = math.exp %147 : vector<8x8xf32>
    %c3_86 = arith.constant 3 : index
    %c0_87 = arith.constant 0 : index
    %c0_88 = arith.constant 0 : index
    %149 = vector.load %arg14[%c3_86, %c0_87, %c0_88] : memref<4x8x1xf32, #tpu.memory_space<vmem>>, vector<1x8x1xf32>
    %150 = vector.shape_cast %149 : vector<1x8x1xf32> to vector<8x1xf32>
    %151 = arith.mulf %145, %150 : vector<8x1xf32>
    %cst_89 = arith.constant dense<0.000000e+00> : vector<8xf32>
    %152 = vector.multi_reduction <add>, %148, %cst_89 [1] : vector<8x8xf32> to vector<8xf32>
    %153 = vector.shape_cast %152 : vector<8xf32> to vector<8x1xf32>
    %154 = arith.addf %151, %153 : vector<8x1xf32>
    %c3_90 = arith.constant 3 : index
    %c0_91 = arith.constant 0 : index
    %c0_92 = arith.constant 0 : index
    %155 = vector.load %arg14[%c3_90, %c0_91, %c0_92] : memref<4x8x1xf32, #tpu.memory_space<vmem>>, vector<1x8x1xf32>
    %156 = vector.shape_cast %155 : vector<1x8x1xf32> to vector<8x1xf32>
    %157 = vector.shape_cast %154 : vector<8x1xf32> to vector<1x8x1xf32>
    tpu.vector_store %arg14[%c3_90, %c0_91, %c0_92], %157 {strides = array<i32>} : memref<4x8x1xf32, #tpu.memory_space<vmem>>, vector<1x8x1xf32>,
    %c3_93 = arith.constant 3 : index
    %c0_94 = arith.constant 0 : index
    %c0_95 = arith.constant 0 : index
    %158 = vector.load %arg15[%c3_93, %c0_94, %c0_95] : memref<4x8x8xf32, #tpu.memory_space<vmem>>, vector<1x8x8xf32>
    %159 = vector.shape_cast %158 : vector<1x8x8xf32> to vector<8x8xf32>
    %160 = vector.broadcast %145 : vector<8x1xf32> to vector<8x8xf32>
    %161 = arith.mulf %160, %159 : vector<8x8xf32>
    %162 = arith.truncf %148 : vector<8x8xf32> to vector<8x8xbf16>
    %cst_96 = arith.constant dense<0.000000e+00> : vector<8x8xf32>
    %163 = tpu.matmul %162, %133, %cst_96 {dimension_numbers = #tpu.dot_dimension_numbers<[1], [0], [0], [1], [0, 0, 1, 1], [], []>} : vector<8x8xbf16>, vector<8x8xbf16>, vector<8x8xf32> -> vector<8x8xf32>
    %164 = arith.addf %161, %163 : vector<8x8xf32>
    %c3_97 = arith.constant 3 : index
    %c0_98 = arith.constant 0 : index
    %c0_99 = arith.constant 0 : index
    %165 = vector.load %arg15[%c3_97, %c0_98, %c0_99] : memref<4x8x8xf32, #tpu.memory_space<vmem>>, vector<1x8x8xf32>
    %166 = vector.shape_cast %165 : vector<1x8x8xf32> to vector<8x8xf32>
    %167 = vector.shape_cast %164 : vector<8x8xf32> to vector<1x8x8xf32>
    tpu.vector_store %arg15[%c3_97, %c0_98, %c0_99], %167 {strides = array<i32>} : memref<4x8x8xf32, #tpu.memory_space<vmem>>, vector<1x8x8xf32>,
    %c3_100 = arith.constant 3 : index
    %c0_101 = arith.constant 0 : index
    %c0_102 = arith.constant 0 : index
    %168 = vector.load %arg13[%c3_100, %c0_101, %c0_102] : memref<4x8x1xf32, #tpu.memory_space<vmem>>, vector<1x8x1xf32>
    %169 = vector.shape_cast %168 : vector<1x8x1xf32> to vector<8x1xf32>
    %170 = vector.shape_cast %143 : vector<8x1xf32> to vector<1x8x1xf32>
    tpu.vector_store %arg13[%c3_100, %c0_101, %c0_102], %170 {strides = array<i32>} : memref<4x8x1xf32, #tpu.memory_space<vmem>>, vector<1x8x1xf32>,
    %c0_i32_103 = arith.constant 0 : i32
    %171 = arith.cmpi eq, %arg2, %c0_i32_103 : i32
    %172 = arith.extui %171 : i1 to i32
    %c0_i32_104 = arith.constant 0 : i32
    %173 = arith.cmpi ne, %172, %c0_i32_104 : i32
    scf.if %173 {
      %cst_105 = arith.constant 0.000000e+00 : f32
      %174 = vector.broadcast %cst_105 : f32 to vector<8x32xf32>
      %c0_106 = arith.constant 0 : index
      %c0_107 = arith.constant 0 : index
      %c0_108 = arith.constant 0 : index
      %175 = vector.load %arg14[%c0_106, %c0_107, %c0_108] : memref<4x8x1xf32, #tpu.memory_space<vmem>>, vector<1x8x1xf32>
      %176 = vector.shape_cast %175 : vector<1x8x1xf32> to vector<8x1xf32>
      %177 = tpu.reciprocal %176 {approx = true} : vector<8x1xf32> -> vector<8x1xf32>
      %c0_109 = arith.constant 0 : index
      %c0_110 = arith.constant 0 : index
      %c0_111 = arith.constant 0 : index
      %178 = vector.load %arg15[%c0_109, %c0_110, %c0_111] : memref<4x8x8xf32, #tpu.memory_space<vmem>>, vector<1x8x8xf32>
      %179 = vector.shape_cast %178 : vector<1x8x8xf32> to vector<8x8xf32>
      %180 = vector.broadcast %177 : vector<8x1xf32> to vector<8x8xf32>
      %181 = arith.mulf %179, %180 : vector<8x8xf32>
      %182 = arith.truncf %181 : vector<8x8xf32> to vector<8x8xbf16>
      %c0_112 = arith.constant 0 : index
      %c0_113 = arith.constant 0 : index
      %183 = vector.load %arg8[%c0_112, %c0_113] : memref<32x32xbf16, #tpu.memory_space<vmem>>, vector<8x32xbf16>
      %cst_114 = arith.constant dense<0.000000e+00> : vector<8x32xf32>
      %184 = tpu.matmul %182, %183, %cst_114 {dimension_numbers = #tpu.dot_dimension_numbers<[1], [0], [0], [1], [0, 0, 1, 1], [], []>} : vector<8x8xbf16>, vector<8x32xbf16>, vector<8x32xf32> -> vector<8x32xf32>
      %185 = arith.addf %174, %184 : vector<8x32xf32>
      %c1_115 = arith.constant 1 : index
      %c0_116 = arith.constant 0 : index
      %c0_117 = arith.constant 0 : index
      %186 = vector.load %arg14[%c1_115, %c0_116, %c0_117] : memref<4x8x1xf32, #tpu.memory_space<vmem>>, vector<1x8x1xf32>
      %187 = vector.shape_cast %186 : vector<1x8x1xf32> to vector<8x1xf32>
      %188 = tpu.reciprocal %187 {approx = true} : vector<8x1xf32> -> vector<8x1xf32>
      %c1_118 = arith.constant 1 : index
      %c0_119 = arith.constant 0 : index
      %c0_120 = arith.constant 0 : index
      %189 = vector.load %arg15[%c1_118, %c0_119, %c0_120] : memref<4x8x8xf32, #tpu.memory_space<vmem>>, vector<1x8x8xf32>
      %190 = vector.shape_cast %189 : vector<1x8x8xf32> to vector<8x8xf32>
      %191 = vector.broadcast %188 : vector<8x1xf32> to vector<8x8xf32>
      %192 = arith.mulf %190, %191 : vector<8x8xf32>
      %193 = arith.truncf %192 : vector<8x8xf32> to vector<8x8xbf16>
      %c8 = arith.constant 8 : index
      %c0_121 = arith.constant 0 : index
      %194 = vector.load %arg8[%c8, %c0_121] : memref<32x32xbf16, #tpu.memory_space<vmem>>, vector<8x32xbf16>
      %cst_122 = arith.constant dense<0.000000e+00> : vector<8x32xf32>
      %195 = tpu.matmul %193, %194, %cst_122 {dimension_numbers = #tpu.dot_dimension_numbers<[1], [0], [0], [1], [0, 0, 1, 1], [], []>} : vector<8x8xbf16>, vector<8x32xbf16>, vector<8x32xf32> -> vector<8x32xf32>
      %196 = arith.addf %185, %195 : vector<8x32xf32>
      %c2_123 = arith.constant 2 : index
      %c0_124 = arith.constant 0 : index
      %c0_125 = arith.constant 0 : index
      %197 = vector.load %arg14[%c2_123, %c0_124, %c0_125] : memref<4x8x1xf32, #tpu.memory_space<vmem>>, vector<1x8x1xf32>
      %198 = vector.shape_cast %197 : vector<1x8x1xf32> to vector<8x1xf32>
      %199 = tpu.reciprocal %198 {approx = true} : vector<8x1xf32> -> vector<8x1xf32>
      %c2_126 = arith.constant 2 : index
      %c0_127 = arith.constant 0 : index
      %c0_128 = arith.constant 0 : index
      %200 = vector.load %arg15[%c2_126, %c0_127, %c0_128] : memref<4x8x8xf32, #tpu.memory_space<vmem>>, vector<1x8x8xf32>
      %201 = vector.shape_cast %200 : vector<1x8x8xf32> to vector<8x8xf32>
      %202 = vector.broadcast %199 : vector<8x1xf32> to vector<8x8xf32>
      %203 = arith.mulf %201, %202 : vector<8x8xf32>
      %204 = arith.truncf %203 : vector<8x8xf32> to vector<8x8xbf16>
      %c16 = arith.constant 16 : index
      %c0_129 = arith.constant 0 : index
      %205 = vector.load %arg8[%c16, %c0_129] : memref<32x32xbf16, #tpu.memory_space<vmem>>, vector<8x32xbf16>
      %cst_130 = arith.constant dense<0.000000e+00> : vector<8x32xf32>
      %206 = tpu.matmul %204, %205, %cst_130 {dimension_numbers = #tpu.dot_dimension_numbers<[1], [0], [0], [1], [0, 0, 1, 1], [], []>} : vector<8x8xbf16>, vector<8x32xbf16>, vector<8x32xf32> -> vector<8x32xf32>
      %207 = arith.addf %196, %206 : vector<8x32xf32>
      %c3_131 = arith.constant 3 : index
      %c0_132 = arith.constant 0 : index
      %c0_133 = arith.constant 0 : index
      %208 = vector.load %arg14[%c3_131, %c0_132, %c0_133] : memref<4x8x1xf32, #tpu.memory_space<vmem>>, vector<1x8x1xf32>
      %209 = vector.shape_cast %208 : vector<1x8x1xf32> to vector<8x1xf32>
      %210 = tpu.reciprocal %209 {approx = true} : vector<8x1xf32> -> vector<8x1xf32>
      %c3_134 = arith.constant 3 : index
      %c0_135 = arith.constant 0 : index
      %c0_136 = arith.constant 0 : index
      %211 = vector.load %arg15[%c3_134, %c0_135, %c0_136] : memref<4x8x8xf32, #tpu.memory_space<vmem>>, vector<1x8x8xf32>
      %212 = vector.shape_cast %211 : vector<1x8x8xf32> to vector<8x8xf32>
      %213 = vector.broadcast %210 : vector<8x1xf32> to vector<8x8xf32>
      %214 = arith.mulf %212, %213 : vector<8x8xf32>
      %215 = arith.truncf %214 : vector<8x8xf32> to vector<8x8xbf16>
      %c24 = arith.constant 24 : index
      %c0_137 = arith.constant 0 : index
      %216 = vector.load %arg8[%c24, %c0_137] : memref<32x32xbf16, #tpu.memory_space<vmem>>, vector<8x32xbf16>
      %cst_138 = arith.constant dense<0.000000e+00> : vector<8x32xf32>
      %217 = tpu.matmul %215, %216, %cst_138 {dimension_numbers = #tpu.dot_dimension_numbers<[1], [0], [0], [1], [0, 0, 1, 1], [], []>} : vector<8x8xbf16>, vector<8x32xbf16>, vector<8x32xf32> -> vector<8x32xf32>
      %218 = arith.addf %207, %217 : vector<8x32xf32>
      %c0_139 = arith.constant 0 : index
      %c0_140 = arith.constant 0 : index
      %c0_141 = arith.constant 0 : index
      %219 = vector.load %arg7[%c0_139, %c0_140, %c0_141] : memref<1x8x32xbf16, #tpu.memory_space<vmem>>, vector<1x8x32xbf16>
      %220 = vector.shape_cast %219 : vector<1x8x32xbf16> to vector<8x32xbf16>
      %221 = arith.extf %220 : vector<8x32xbf16> to vector<8x32xf32>
      %222 = arith.addf %221, %218 : vector<8x32xf32>
      %c0_142 = arith.constant 0 : index
      %c0_143 = arith.constant 0 : index
      %223 = vector.load %arg9[%c0_142, %c0_143] : memref<1x32xf32, #tpu.memory_space<vmem>>, vector<1x32xf32>
      %224 = vector.broadcast %223 : vector<1x32xf32> to vector<8x32xf32>
      %225 = arith.addf %222, %224 : vector<8x32xf32>
      %cst_144 = arith.constant dense<0.000000e+00> : vector<8xf32>
      %226 = vector.multi_reduction <add>, %225, %cst_144 [1] : vector<8x32xf32> to vector<8xf32>
      %227 = vector.shape_cast %226 : vector<8xf32> to vector<8x1xf32>
      %cst_145 = arith.constant 3.200000e+01 : f32
      %228 = vector.broadcast %cst_145 : f32 to vector<8x1xf32>
      %229 = arith.divf %227, %228 : vector<8x1xf32>
      %230 = vector.broadcast %229 : vector<8x1xf32> to vector<8x32xf32>
      %231 = arith.subf %225, %230 : vector<8x32xf32>
      %232 = arith.mulf %231, %231 : vector<8x32xf32>
      %cst_146 = arith.constant dense<0.000000e+00> : vector<8xf32>
      %233 = vector.multi_reduction <add>, %232, %cst_146 [1] : vector<8x32xf32> to vector<8xf32>
      %234 = vector.shape_cast %233 : vector<8xf32> to vector<8x1xf32>
      %cst_147 = arith.constant 3.200000e+01 : f32
      %235 = vector.broadcast %cst_147 : f32 to vector<8x1xf32>
      %236 = arith.divf %234, %235 : vector<8x1xf32>
      %237 = vector.broadcast %229 : vector<8x1xf32> to vector<8x32xf32>
      %238 = arith.subf %225, %237 : vector<8x32xf32>
      %cst_148 = arith.constant 9.99999974E-6 : f32
      %239 = vector.broadcast %cst_148 : f32 to vector<8x1xf32>
      %240 = arith.addf %236, %239 : vector<8x1xf32>
      %241 = math.rsqrt %240 : vector<8x1xf32>
      %242 = vector.broadcast %241 : vector<8x1xf32> to vector<8x32xf32>
      %243 = arith.mulf %238, %242 : vector<8x32xf32>
      %c0_149 = arith.constant 0 : index
      %c0_150 = arith.constant 0 : index
      %244 = vector.load %arg10[%c0_149, %c0_150] : memref<1x32xf32, #tpu.memory_space<vmem>>, vector<1x32xf32>
      %245 = vector.broadcast %244 : vector<1x32xf32> to vector<8x32xf32>
      %246 = arith.mulf %243, %245 : vector<8x32xf32>
      %c0_151 = arith.constant 0 : index
      %c0_152 = arith.constant 0 : index
      %247 = vector.load %arg11[%c0_151, %c0_152] : memref<1x32xf32, #tpu.memory_space<vmem>>, vector<1x32xf32>
      %248 = vector.broadcast %247 : vector<1x32xf32> to vector<8x32xf32>
      %249 = arith.addf %246, %248 : vector<8x32xf32>
      %250 = arith.truncf %249 : vector<8x32xf32> to vector<8x32xbf16>
      %c0_153 = arith.constant 0 : index
      %c0_154 = arith.constant 0 : index
      %c0_155 = arith.constant 0 : index
      %251 = vector.load %arg12[%c0_153, %c0_154, %c0_155] : memref<1x8x32xbf16, #tpu.memory_space<vmem>>, vector<1x8x32xbf16>
      %252 = vector.shape_cast %251 : vector<1x8x32xbf16> to vector<8x32xbf16>
      %253 = vector.shape_cast %250 : vector<8x32xbf16> to vector<1x8x32xbf16>
      tpu.vector_store %arg12[%c0_153, %c0_154, %c0_155], %253 {strides = array<i32>} : memref<1x8x32xbf16, #tpu.memory_space<vmem>>, vector<1x8x32xbf16>,
    } else {
    }
    return
  }
  func.func @transform_0(%arg0: i32, %arg1: i32, %arg2: i32) -> (i32, i32, i32, i32) {
    %c0_i32 = arith.constant 0 : i32
    %c0_i32_0 = arith.constant 0 : i32
    %c0_i32_1 = arith.constant 0 : i32
    return %c0_i32, %arg0, %arg1, %c0_i32_0 : i32, i32, i32, i32
  }
  func.func @transform_1(%arg0: i32, %arg1: i32, %arg2: i32) -> (i32, i32, i32, i32) {
    %c1_i32 = arith.constant 1 : i32
    %c0_i32 = arith.constant 0 : i32
    %c0_i32_0 = arith.constant 0 : i32
    return %c1_i32, %arg0, %arg2, %c0_i32 : i32, i32, i32, i32
  }
  func.func @transform_2(%arg0: i32, %arg1: i32, %arg2: i32) -> (i32, i32, i32, i32) {
    %c2_i32 = arith.constant 2 : i32
    %c0_i32 = arith.constant 0 : i32
    %c0_i32_0 = arith.constant 0 : i32
    return %c2_i32, %arg0, %arg2, %c0_i32 : i32, i32, i32, i32
  }
  func.func @transform_3(%arg0: i32, %arg1: i32, %arg2: i32) -> (i32, i32, i32) {
    %c0_i32 = arith.constant 0 : i32
    %c0_i32_0 = arith.constant 0 : i32
    return %arg0, %c0_i32, %arg2 : i32, i32, i32
  }
  func.func @transform_4(%arg0: i32, %arg1: i32, %arg2: i32) -> (i32, i32, i32) {
    %c0_i32 = arith.constant 0 : i32
    %c0_i32_0 = arith.constant 0 : i32
    return %arg0, %arg1, %c0_i32 : i32, i32, i32
  }
  func.func @transform_5(%arg0: i32, %arg1: i32, %arg2: i32) -> (i32, i32) {
    %c0_i32 = arith.constant 0 : i32
    %c0_i32_0 = arith.constant 0 : i32
    %c0_i32_1 = arith.constant 0 : i32
    return %c0_i32, %c0_i32_0 : i32, i32
  }
  func.func @transform_6(%arg0: i32, %arg1: i32, %arg2: i32) -> (i32, i32) {
    %c0_i32 = arith.constant 0 : i32
    %c0_i32_0 = arith.constant 0 : i32
    %c0_i32_1 = arith.constant 0 : i32
    return %c0_i32, %c0_i32_0 : i32, i32
  }
  func.func @transform_7(%arg0: i32, %arg1: i32, %arg2: i32) -> (i32, i32) {
    %c0_i32 = arith.constant 0 : i32
    %c0_i32_0 = arith.constant 0 : i32
    %c0_i32_1 = arith.constant 0 : i32
    return %c0_i32, %c0_i32_0 : i32, i32
  }
  func.func @transform_8(%arg0: i32, %arg1: i32, %arg2: i32) -> (i32, i32) {
    %c0_i32 = arith.constant 0 : i32
    %c0_i32_0 = arith.constant 0 : i32
    %c0_i32_1 = arith.constant 0 : i32
    return %c0_i32, %c0_i32_0 : i32, i32
  }
  func.func @transform_9(%arg0: i32, %arg1: i32, %arg2: i32) -> (i32, i32, i32) {
    %c0_i32 = arith.constant 0 : i32
    %c0_i32_0 = arith.constant 0 : i32
    return %arg0, %arg1, %c0_i32 : i32, i32, i32
  }
}

module attributes {stable_mosaic.version = 11 : i64} {
  func.func @_multi_proj_kernel(%arg0: i32, %arg1: memref<16x32xbf16, #tpu.memory_space<vmem>>, %arg2: memref<2x32x32xbf16, #tpu.memory_space<vmem>>, %arg3: memref<2x1x32xf32, #tpu.memory_space<vmem>>, %arg4: memref<2x16x32xbf16, #tpu.memory_space<vmem>>) attributes {dimension_semantics = [#tpu.dimension_semantics<parallel>], iteration_bounds = array<i64: 1>, scalar_prefetch = 0 : i64, scratch_operands = 0 : i64, tpu.core_type = #tpu.core_type<tc>, window_params = [{transform_indices = @transform_0, window_bounds = array<i64: 16, 32>}, {pipeline_mode = #tpu.pipeline_mode<synchronous>, transform_indices = @transform_1, window_bounds = array<i64: 2, 32, 32>}, {pipeline_mode = #tpu.pipeline_mode<synchronous>, transform_indices = @transform_2, window_bounds = array<i64: 2, 1, 32>}, {transform_indices = @transform_3, window_bounds = array<i64: 2, 16, 32>}]} {
    %c0 = arith.constant 0 : index
    %c0_0 = arith.constant 0 : index
    %0 = vector.load %arg1[%c0, %c0_0] : memref<16x32xbf16, #tpu.memory_space<vmem>>, vector<16x32xbf16>
    %c0_1 = arith.constant 0 : index
    %c0_2 = arith.constant 0 : index
    %c0_3 = arith.constant 0 : index
    %1 = vector.load %arg2[%c0_1, %c0_2, %c0_3] : memref<2x32x32xbf16, #tpu.memory_space<vmem>>, vector<1x32x32xbf16>
    %2 = vector.shape_cast %1 : vector<1x32x32xbf16> to vector<32x32xbf16>
    %cst = arith.constant dense<0.000000e+00> : vector<16x32xf32>
    %3 = tpu.matmul %0, %2, %cst {dimension_numbers = #tpu.dot_dimension_numbers<[1], [0], [0], [1], [0, 0, 1, 1], [], []>} : vector<16x32xbf16>, vector<32x32xbf16>, vector<16x32xf32> -> vector<16x32xf32>
    %c0_4 = arith.constant 0 : index
    %c0_5 = arith.constant 0 : index
    %c0_6 = arith.constant 0 : index
    %4 = vector.load %arg3[%c0_4, %c0_5, %c0_6] : memref<2x1x32xf32, #tpu.memory_space<vmem>>, vector<1x1x32xf32>
    %5 = vector.shape_cast %4 : vector<1x1x32xf32> to vector<1x32xf32>
    %6 = vector.broadcast %5 : vector<1x32xf32> to vector<16x32xf32>
    %7 = arith.addf %3, %6 : vector<16x32xf32>
    %8 = arith.truncf %7 : vector<16x32xf32> to vector<16x32xbf16>
    %c0_7 = arith.constant 0 : index
    %c0_8 = arith.constant 0 : index
    %c0_9 = arith.constant 0 : index
    %9 = vector.load %arg4[%c0_7, %c0_8, %c0_9] : memref<2x16x32xbf16, #tpu.memory_space<vmem>>, vector<1x16x32xbf16>
    %10 = vector.shape_cast %9 : vector<1x16x32xbf16> to vector<16x32xbf16>
    %11 = vector.shape_cast %8 : vector<16x32xbf16> to vector<1x16x32xbf16>
    tpu.vector_store %arg4[%c0_7, %c0_8, %c0_9], %11 {strides = array<i32>} : memref<2x16x32xbf16, #tpu.memory_space<vmem>>, vector<1x16x32xbf16>,
    %c1 = arith.constant 1 : index
    %c0_10 = arith.constant 0 : index
    %c0_11 = arith.constant 0 : index
    %12 = vector.load %arg2[%c1, %c0_10, %c0_11] : memref<2x32x32xbf16, #tpu.memory_space<vmem>>, vector<1x32x32xbf16>
    %13 = vector.shape_cast %12 : vector<1x32x32xbf16> to vector<32x32xbf16>
    %cst_12 = arith.constant dense<0.000000e+00> : vector<16x32xf32>
    %14 = tpu.matmul %0, %13, %cst_12 {dimension_numbers = #tpu.dot_dimension_numbers<[1], [0], [0], [1], [0, 0, 1, 1], [], []>} : vector<16x32xbf16>, vector<32x32xbf16>, vector<16x32xf32> -> vector<16x32xf32>
    %c1_13 = arith.constant 1 : index
    %c0_14 = arith.constant 0 : index
    %c0_15 = arith.constant 0 : index
    %15 = vector.load %arg3[%c1_13, %c0_14, %c0_15] : memref<2x1x32xf32, #tpu.memory_space<vmem>>, vector<1x1x32xf32>
    %16 = vector.shape_cast %15 : vector<1x1x32xf32> to vector<1x32xf32>
    %17 = vector.broadcast %16 : vector<1x32xf32> to vector<16x32xf32>
    %18 = arith.addf %14, %17 : vector<16x32xf32>
    %19 = arith.truncf %18 : vector<16x32xf32> to vector<16x32xbf16>
    %c1_16 = arith.constant 1 : index
    %c0_17 = arith.constant 0 : index
    %c0_18 = arith.constant 0 : index
    %20 = vector.load %arg4[%c1_16, %c0_17, %c0_18] : memref<2x16x32xbf16, #tpu.memory_space<vmem>>, vector<1x16x32xbf16>
    %21 = vector.shape_cast %20 : vector<1x16x32xbf16> to vector<16x32xbf16>
    %22 = vector.shape_cast %19 : vector<16x32xbf16> to vector<1x16x32xbf16>
    tpu.vector_store %arg4[%c1_16, %c0_17, %c0_18], %22 {strides = array<i32>} : memref<2x16x32xbf16, #tpu.memory_space<vmem>>, vector<1x16x32xbf16>,
    return
  }
  func.func @transform_0(%arg0: i32) -> (i32, i32) {
    %c0_i32 = arith.constant 0 : i32
    %c0_i32_0 = arith.constant 0 : i32
    return %arg0, %c0_i32 : i32, i32
  }
  func.func @transform_1(%arg0: i32) -> (i32, i32, i32) {
    %c0_i32 = arith.constant 0 : i32
    %c0_i32_0 = arith.constant 0 : i32
    %c0_i32_1 = arith.constant 0 : i32
    %c0_i32_2 = arith.constant 0 : i32
    return %c0_i32, %c0_i32_0, %c0_i32_1 : i32, i32, i32
  }
  func.func @transform_2(%arg0: i32) -> (i32, i32, i32) {
    %c0_i32 = arith.constant 0 : i32
    %c0_i32_0 = arith.constant 0 : i32
    %c0_i32_1 = arith.constant 0 : i32
    %c0_i32_2 = arith.constant 0 : i32
    return %c0_i32, %c0_i32_0, %c0_i32_1 : i32, i32, i32
  }
  func.func @transform_3(%arg0: i32) -> (i32, i32, i32) {
    %c0_i32 = arith.constant 0 : i32
    %c0_i32_0 = arith.constant 0 : i32
    %c0_i32_1 = arith.constant 0 : i32
    return %c0_i32, %arg0, %c0_i32_0 : i32, i32, i32
  }
}

module attributes {stable_mosaic.version = 11 : i64} {
  func.func @_multi_proj_kernel(%arg0: i32, %arg1: memref<16x32xbf16, #tpu.memory_space<vmem>>, %arg2: memref<1x32x32xbf16, #tpu.memory_space<vmem>>, %arg3: memref<1x1x32xf32, #tpu.memory_space<vmem>>, %arg4: memref<1x16x32xbf16, #tpu.memory_space<vmem>>) attributes {dimension_semantics = [#tpu.dimension_semantics<parallel>], iteration_bounds = array<i64: 1>, scalar_prefetch = 0 : i64, scratch_operands = 0 : i64, tpu.core_type = #tpu.core_type<tc>, window_params = [{transform_indices = @transform_0, window_bounds = array<i64: 16, 32>}, {pipeline_mode = #tpu.pipeline_mode<synchronous>, transform_indices = @transform_1, window_bounds = array<i64: 1, 32, 32>}, {pipeline_mode = #tpu.pipeline_mode<synchronous>, transform_indices = @transform_2, window_bounds = array<i64: 1, 1, 32>}, {transform_indices = @transform_3, window_bounds = array<i64: 1, 16, 32>}]} {
    %c0 = arith.constant 0 : index
    %c0_0 = arith.constant 0 : index
    %0 = vector.load %arg1[%c0, %c0_0] : memref<16x32xbf16, #tpu.memory_space<vmem>>, vector<16x32xbf16>
    %c0_1 = arith.constant 0 : index
    %c0_2 = arith.constant 0 : index
    %c0_3 = arith.constant 0 : index
    %1 = vector.load %arg2[%c0_1, %c0_2, %c0_3] : memref<1x32x32xbf16, #tpu.memory_space<vmem>>, vector<1x32x32xbf16>
    %2 = vector.shape_cast %1 : vector<1x32x32xbf16> to vector<32x32xbf16>
    %cst = arith.constant dense<0.000000e+00> : vector<16x32xf32>
    %3 = tpu.matmul %0, %2, %cst {dimension_numbers = #tpu.dot_dimension_numbers<[1], [0], [0], [1], [0, 0, 1, 1], [], []>} : vector<16x32xbf16>, vector<32x32xbf16>, vector<16x32xf32> -> vector<16x32xf32>
    %c0_4 = arith.constant 0 : index
    %c0_5 = arith.constant 0 : index
    %c0_6 = arith.constant 0 : index
    %4 = vector.load %arg3[%c0_4, %c0_5, %c0_6] : memref<1x1x32xf32, #tpu.memory_space<vmem>>, vector<1x1x32xf32>
    %5 = vector.shape_cast %4 : vector<1x1x32xf32> to vector<1x32xf32>
    %6 = vector.broadcast %5 : vector<1x32xf32> to vector<16x32xf32>
    %7 = arith.addf %3, %6 : vector<16x32xf32>
    %8 = arith.truncf %7 : vector<16x32xf32> to vector<16x32xbf16>
    %c0_7 = arith.constant 0 : index
    %c0_8 = arith.constant 0 : index
    %c0_9 = arith.constant 0 : index
    %9 = vector.load %arg4[%c0_7, %c0_8, %c0_9] : memref<1x16x32xbf16, #tpu.memory_space<vmem>>, vector<1x16x32xbf16>
    %10 = vector.shape_cast %9 : vector<1x16x32xbf16> to vector<16x32xbf16>
    %11 = vector.shape_cast %8 : vector<16x32xbf16> to vector<1x16x32xbf16>
    tpu.vector_store %arg4[%c0_7, %c0_8, %c0_9], %11 {strides = array<i32>} : memref<1x16x32xbf16, #tpu.memory_space<vmem>>, vector<1x16x32xbf16>,
    return
  }
  func.func @transform_0(%arg0: i32) -> (i32, i32) {
    %c0_i32 = arith.constant 0 : i32
    %c0_i32_0 = arith.constant 0 : i32
    return %arg0, %c0_i32 : i32, i32
  }
  func.func @transform_1(%arg0: i32) -> (i32, i32, i32) {
    %c0_i32 = arith.constant 0 : i32
    %c0_i32_0 = arith.constant 0 : i32
    %c0_i32_1 = arith.constant 0 : i32
    %c0_i32_2 = arith.constant 0 : i32
    return %c0_i32, %c0_i32_0, %c0_i32_1 : i32, i32, i32
  }
  func.func @transform_2(%arg0: i32) -> (i32, i32, i32) {
    %c0_i32 = arith.constant 0 : i32
    %c0_i32_0 = arith.constant 0 : i32
    %c0_i32_1 = arith.constant 0 : i32
    %c0_i32_2 = arith.constant 0 : i32
    return %c0_i32, %c0_i32_0, %c0_i32_1 : i32, i32, i32
  }
  func.func @transform_3(%arg0: i32) -> (i32, i32, i32) {
    %c0_i32 = arith.constant 0 : i32
    %c0_i32_0 = arith.constant 0 : i32
    %c0_i32_1 = arith.constant 0 : i32
    return %c0_i32, %arg0, %c0_i32_0 : i32, i32, i32
  }
}

module attributes {stable_mosaic.version = 11 : i64} {
  func.func @_flash_mha_ln_kernel(%arg0: i32, %arg1: i32, %arg2: i32, %arg3: memref<1x1x8x32xbf16, #tpu.memory_space<vmem>>, %arg4: memref<1x1x8x32xbf16, #tpu.memory_space<vmem>>, %arg5: memref<1x1x8x32xbf16, #tpu.memory_space<vmem>>, %arg6: memref<1x1x8xf32, #tpu.memory_space<vmem>>, %arg7: memref<1x8x32xbf16, #tpu.memory_space<vmem>>, %arg8: memref<32x32xbf16, #tpu.memory_space<vmem>>, %arg9: memref<1x32xf32, #tpu.memory_space<vmem>>, %arg10: memref<1x32xf32, #tpu.memory_space<vmem>>, %arg11: memref<1x32xf32, #tpu.memory_space<vmem>>, %arg12: memref<1x8x32xbf16, #tpu.memory_space<vmem>>, %arg13: memref<4x8x1xf32, #tpu.memory_space<vmem>>, %arg14: memref<4x8x1xf32, #tpu.memory_space<vmem>>, %arg15: memref<4x8x8xf32, #tpu.memory_space<vmem>>) attributes {dimension_semantics = [#tpu.dimension_semantics<parallel>, #tpu.dimension_semantics<parallel>, #tpu.dimension_semantics<arbitrary>], iteration_bounds = array<i64: 2, 1, 1>, scalar_prefetch = 0 : i64, scratch_operands = 3 : i64, tpu.core_type = #tpu.core_type<tc>, window_params = [{transform_indices = @transform_0, window_bounds = array<i64: 1, 1, 8, 32>}, {transform_indices = @transform_1, window_bounds = array<i64: 1, 1, 8, 32>}, {transform_indices = @transform_2, window_bounds = array<i64: 1, 1, 8, 32>}, {transform_indices = @transform_3, window_bounds = array<i64: 1, 1, 8>}, {transform_indices = @transform_4, window_bounds = array<i64: 1, 8, 32>}, {pipeline_mode = #tpu.pipeline_mode<synchronous>, transform_indices = @transform_5, window_bounds = array<i64: 32, 32>}, {pipeline_mode = #tpu.pipeline_mode<synchronous>, transform_indices = @transform_6, window_bounds = array<i64: 1, 32>}, {pipeline_mode = #tpu.pipeline_mode<synchronous>, transform_indices = @transform_7, window_bounds = array<i64: 1, 32>}, {pipeline_mode = #tpu.pipeline_mode<synchronous>, transform_indices = @transform_8, window_bounds = array<i64: 1, 32>}, {transform_indices = @transform_9, window_bounds = array<i64: 1, 8, 32>}]} {
    %c0_i32 = arith.constant 0 : i32
    %0 = arith.cmpi eq, %arg2, %c0_i32 : i32
    %1 = arith.extui %0 : i1 to i32
    %c0_i32_0 = arith.constant 0 : i32
    %2 = arith.cmpi ne, %1, %c0_i32_0 : i32
    scf.if %2 {
      %cst_108 = arith.constant -1.000000e+30 : f32
      %184 = vector.broadcast %cst_108 : f32 to vector<4x8x1xf32>
      %c0_109 = arith.constant 0 : index
      %c0_110 = arith.constant 0 : index
      %c0_111 = arith.constant 0 : index
      %185 = vector.load %arg13[%c0_109, %c0_110, %c0_111] : memref<4x8x1xf32, #tpu.memory_space<vmem>>, vector<4x8x1xf32>
      tpu.vector_store %arg13[%c0_109, %c0_110, %c0_111], %184 {strides = array<i32>} : memref<4x8x1xf32, #tpu.memory_space<vmem>>, vector<4x8x1xf32>,
      %cst_112 = arith.constant 0.000000e+00 : f32
      %186 = vector.broadcast %cst_112 : f32 to vector<4x8x1xf32>
      %c0_113 = arith.constant 0 : index
      %c0_114 = arith.constant 0 : index
      %c0_115 = arith.constant 0 : index
      %187 = vector.load %arg14[%c0_113, %c0_114, %c0_115] : memref<4x8x1xf32, #tpu.memory_space<vmem>>, vector<4x8x1xf32>
      tpu.vector_store %arg14[%c0_113, %c0_114, %c0_115], %186 {strides = array<i32>} : memref<4x8x1xf32, #tpu.memory_space<vmem>>, vector<4x8x1xf32>,
      %cst_116 = arith.constant 0.000000e+00 : f32
      %188 = vector.broadcast %cst_116 : f32 to vector<4x8x8xf32>
      %c0_117 = arith.constant 0 : index
      %c0_118 = arith.constant 0 : index
      %c0_119 = arith.constant 0 : index
      %189 = vector.load %arg15[%c0_117, %c0_118, %c0_119] : memref<4x8x8xf32, #tpu.memory_space<vmem>>, vector<4x8x8xf32>
      tpu.vector_store %arg15[%c0_117, %c0_118, %c0_119], %188 {strides = array<i32>} : memref<4x8x8xf32, #tpu.memory_space<vmem>>, vector<4x8x8xf32>,
    } else {
    }
    %c0 = arith.constant 0 : index
    %c0_1 = arith.constant 0 : index
    %c0_2 = arith.constant 0 : index
    %c0_3 = arith.constant 0 : index
    %3 = vector.load %arg3[%c0, %c0_1, %c0_2, %c0_3] : memref<1x1x8x32xbf16, #tpu.memory_space<vmem>>, vector<1x1x8x32xbf16>
    %4 = vector.shape_cast %3 : vector<1x1x8x32xbf16> to vector<8x32xbf16>
    %c0_4 = arith.constant 0 : index
    %c0_5 = arith.constant 0 : index
    %c0_6 = arith.constant 0 : index
    %c0_7 = arith.constant 0 : index
    %5 = vector.load %arg4[%c0_4, %c0_5, %c0_6, %c0_7] : memref<1x1x8x32xbf16, #tpu.memory_space<vmem>>, vector<1x1x8x32xbf16>
    %6 = vector.shape_cast %5 : vector<1x1x8x32xbf16> to vector<8x32xbf16>
    %c0_8 = arith.constant 0 : index
    %c0_9 = arith.constant 0 : index
    %c0_10 = arith.constant 0 : index
    %c0_11 = arith.constant 0 : index
    %7 = vector.load %arg5[%c0_8, %c0_9, %c0_10, %c0_11] : memref<1x1x8x32xbf16, #tpu.memory_space<vmem>>, vector<1x1x8x32xbf16>
    %8 = vector.shape_cast %7 : vector<1x1x8x32xbf16> to vector<8x32xbf16>
    %c0_12 = arith.constant 0 : index
    %c0_13 = arith.constant 0 : index
    %c0_14 = arith.constant 0 : index
    %9 = vector.load %arg6[%c0_12, %c0_13, %c0_14] : memref<1x1x8xf32, #tpu.memory_space<vmem>>, vector<1x1x8xf32>
    %10 = vector.shape_cast %9 : vector<1x1x8xf32> to vector<1x8xf32>
    %11 = tpu.iota {dimensions = array<i32: 0>} : vector<8x8xi32>
    %c8_i32 = arith.constant 8 : i32
    %12 = arith.muli %arg1, %c8_i32 : i32
    %13 = vector.broadcast %12 : i32 to vector<8x8xi32>
    %14 = arith.addi %11, %13 : vector<8x8xi32>
    %15 = tpu.iota {dimensions = array<i32: 1>} : vector<8x8xi32>
    %c8_i32_15 = arith.constant 8 : i32
    %16 = arith.muli %arg2, %c8_i32_15 : i32
    %17 = vector.broadcast %16 : i32 to vector<8x8xi32>
    %18 = arith.addi %15, %17 : vector<8x8xi32>
    %19 = arith.cmpi sle, %18, %14 : vector<8x8xi32>
    %cst = arith.constant 0.000000e+00 : f32
    %cst_16 = arith.constant -1.000000e+09 : f32
    %20 = vector.broadcast %cst : f32 to vector<8x8xf32>
    %21 = vector.broadcast %cst_16 : f32 to vector<8x8xf32>
    %22 = arith.select %19, %20, %21 : vector<8x8xi1>, vector<8x8xf32>
    %23 = vector.broadcast %10 : vector<1x8xf32> to vector<8x8xf32>
    %24 = arith.addf %23, %22 : vector<8x8xf32>
    %25 = vector.extract_strided_slice %4 {offsets = [0, 0], sizes = [8, 8], strides = [1, 1]} : vector<8x32xbf16> to vector<8x8xbf16>
    %26 = vector.extract_strided_slice %6 {offsets = [0, 0], sizes = [8, 8], strides = [1, 1]} : vector<8x32xbf16> to vector<8x8xbf16>
    %27 = vector.extract_strided_slice %8 {offsets = [0, 0], sizes = [8, 8], strides = [1, 1]} : vector<8x32xbf16> to vector<8x8xbf16>
    %cst_17 = arith.constant dense<0.000000e+00> : vector<8x8xf32>
    %28 = tpu.matmul %25, %26, %cst_17 {dimension_numbers = #tpu.dot_dimension_numbers<[1], [1], [0], [0], [0, 0, 1, 0], [], []>} : vector<8x8xbf16>, vector<8x8xbf16>, vector<8x8xf32> -> vector<8x8xf32>
    %cst_18 = arith.constant 0.353553385 : f32
    %29 = vector.broadcast %cst_18 : f32 to vector<8x8xf32>
    %30 = arith.mulf %28, %29 : vector<8x8xf32>
    %31 = arith.addf %30, %24 : vector<8x8xf32>
    %c0_19 = arith.constant 0 : index
    %c0_20 = arith.constant 0 : index
    %c0_21 = arith.constant 0 : index
    %32 = vector.load %arg13[%c0_19, %c0_20, %c0_21] : memref<4x8x1xf32, #tpu.memory_space<vmem>>, vector<1x8x1xf32>
    %33 = vector.shape_cast %32 : vector<1x8x1xf32> to vector<8x1xf32>
    %cst_22 = arith.constant dense<0xFF800000> : vector<8xf32>
    %34 = vector.multi_reduction <maximumf>, %31, %cst_22 [1] : vector<8x8xf32> to vector<8xf32>
    %35 = vector.shape_cast %34 : vector<8xf32> to vector<8x1xf32>
    %36 = arith.maximumf %33, %35 : vector<8x1xf32>
    %37 = arith.subf %33, %36 : vector<8x1xf32>
    %38 = math.exp %37 : vector<8x1xf32>
    %39 = vector.broadcast %36 : vector<8x1xf32> to vector<8x8xf32>
    %40 = arith.subf %31, %39 : vector<8x8xf32>
    %41 = math.exp %40 : vector<8x8xf32>
    %c0_23 = arith.constant 0 : index
    %c0_24 = arith.constant 0 : index
    %c0_25 = arith.constant 0 : index
    %42 = vector.load %arg14[%c0_23, %c0_24, %c0_25] : memref<4x8x1xf32, #tpu.memory_space<vmem>>, vector<1x8x1xf32>
    %43 = vector.shape_cast %42 : vector<1x8x1xf32> to vector<8x1xf32>
    %44 = arith.mulf %38, %43 : vector<8x1xf32>
    %cst_26 = arith.constant dense<0.000000e+00> : vector<8xf32>
    %45 = vector.multi_reduction <add>, %41, %cst_26 [1] : vector<8x8xf32> to vector<8xf32>
    %46 = vector.shape_cast %45 : vector<8xf32> to vector<8x1xf32>
    %47 = arith.addf %44, %46 : vector<8x1xf32>
    %c0_27 = arith.constant 0 : index
    %c0_28 = arith.constant 0 : index
    %c0_29 = arith.constant 0 : index
    %48 = vector.load %arg14[%c0_27, %c0_28, %c0_29] : memref<4x8x1xf32, #tpu.memory_space<vmem>>, vector<1x8x1xf32>
    %49 = vector.shape_cast %48 : vector<1x8x1xf32> to vector<8x1xf32>
    %50 = vector.shape_cast %47 : vector<8x1xf32> to vector<1x8x1xf32>
    tpu.vector_store %arg14[%c0_27, %c0_28, %c0_29], %50 {strides = array<i32>} : memref<4x8x1xf32, #tpu.memory_space<vmem>>, vector<1x8x1xf32>,
    %c0_30 = arith.constant 0 : index
    %c0_31 = arith.constant 0 : index
    %c0_32 = arith.constant 0 : index
    %51 = vector.load %arg15[%c0_30, %c0_31, %c0_32] : memref<4x8x8xf32, #tpu.memory_space<vmem>>, vector<1x8x8xf32>
    %52 = vector.shape_cast %51 : vector<1x8x8xf32> to vector<8x8xf32>
    %53 = vector.broadcast %38 : vector<8x1xf32> to vector<8x8xf32>
    %54 = arith.mulf %53, %52 : vector<8x8xf32>
    %55 = arith.truncf %41 : vector<8x8xf32> to vector<8x8xbf16>
    %cst_33 = arith.constant dense<0.000000e+00> : vector<8x8xf32>
    %56 = tpu.matmul %55, %27, %cst_33 {dimension_numbers = #tpu.dot_dimension_numbers<[1], [0], [0], [1], [0, 0, 1, 1], [], []>} : vector<8x8xbf16>, vector<8x8xbf16>, vector<8x8xf32> -> vector<8x8xf32>
    %57 = arith.addf %54, %56 : vector<8x8xf32>
    %c0_34 = arith.constant 0 : index
    %c0_35 = arith.constant 0 : index
    %c0_36 = arith.constant 0 : index
    %58 = vector.load %arg15[%c0_34, %c0_35, %c0_36] : memref<4x8x8xf32, #tpu.memory_space<vmem>>, vector<1x8x8xf32>
    %59 = vector.shape_cast %58 : vector<1x8x8xf32> to vector<8x8xf32>
    %60 = vector.shape_cast %57 : vector<8x8xf32> to vector<1x8x8xf32>
    tpu.vector_store %arg15[%c0_34, %c0_35, %c0_36], %60 {strides = array<i32>} : memref<4x8x8xf32, #tpu.memory_space<vmem>>, vector<1x8x8xf32>,
    %c0_37 = arith.constant 0 : index
    %c0_38 = arith.constant 0 : index
    %c0_39 = arith.constant 0 : index
    %61 = vector.load %arg13[%c0_37, %c0_38, %c0_39] : memref<4x8x1xf32, #tpu.memory_space<vmem>>, vector<1x8x1xf32>
    %62 = vector.shape_cast %61 : vector<1x8x1xf32> to vector<8x1xf32>
    %63 = vector.shape_cast %36 : vector<8x1xf32> to vector<1x8x1xf32>
    tpu.vector_store %arg13[%c0_37, %c0_38, %c0_39], %63 {strides = array<i32>} : memref<4x8x1xf32, #tpu.memory_space<vmem>>, vector<1x8x1xf32>,
    %64 = vector.extract_strided_slice %4 {offsets = [0, 8], sizes = [8, 8], strides = [1, 1]} : vector<8x32xbf16> to vector<8x8xbf16>
    %65 = vector.extract_strided_slice %6 {offsets = [0, 8], sizes = [8, 8], strides = [1, 1]} : vector<8x32xbf16> to vector<8x8xbf16>
    %66 = vector.extract_strided_slice %8 {offsets = [0, 8], sizes = [8, 8], strides = [1, 1]} : vector<8x32xbf16> to vector<8x8xbf16>
    %cst_40 = arith.constant dense<0.000000e+00> : vector<8x8xf32>
    %67 = tpu.matmul %64, %65, %cst_40 {dimension_numbers = #tpu.dot_dimension_numbers<[1], [1], [0], [0], [0, 0, 1, 0], [], []>} : vector<8x8xbf16>, vector<8x8xbf16>, vector<8x8xf32> -> vector<8x8xf32>
    %cst_41 = arith.constant 0.353553385 : f32
    %68 = vector.broadcast %cst_41 : f32 to vector<8x8xf32>
    %69 = arith.mulf %67, %68 : vector<8x8xf32>
    %70 = arith.addf %69, %24 : vector<8x8xf32>
    %c1 = arith.constant 1 : index
    %c0_42 = arith.constant 0 : index
    %c0_43 = arith.constant 0 : index
    %71 = vector.load %arg13[%c1, %c0_42, %c0_43] : memref<4x8x1xf32, #tpu.memory_space<vmem>>, vector<1x8x1xf32>
    %72 = vector.shape_cast %71 : vector<1x8x1xf32> to vector<8x1xf32>
    %cst_44 = arith.constant dense<0xFF800000> : vector<8xf32>
    %73 = vector.multi_reduction <maximumf>, %70, %cst_44 [1] : vector<8x8xf32> to vector<8xf32>
    %74 = vector.shape_cast %73 : vector<8xf32> to vector<8x1xf32>
    %75 = arith.maximumf %72, %74 : vector<8x1xf32>
    %76 = arith.subf %72, %75 : vector<8x1xf32>
    %77 = math.exp %76 : vector<8x1xf32>
    %78 = vector.broadcast %75 : vector<8x1xf32> to vector<8x8xf32>
    %79 = arith.subf %70, %78 : vector<8x8xf32>
    %80 = math.exp %79 : vector<8x8xf32>
    %c1_45 = arith.constant 1 : index
    %c0_46 = arith.constant 0 : index
    %c0_47 = arith.constant 0 : index
    %81 = vector.load %arg14[%c1_45, %c0_46, %c0_47] : memref<4x8x1xf32, #tpu.memory_space<vmem>>, vector<1x8x1xf32>
    %82 = vector.shape_cast %81 : vector<1x8x1xf32> to vector<8x1xf32>
    %83 = arith.mulf %77, %82 : vector<8x1xf32>
    %cst_48 = arith.constant dense<0.000000e+00> : vector<8xf32>
    %84 = vector.multi_reduction <add>, %80, %cst_48 [1] : vector<8x8xf32> to vector<8xf32>
    %85 = vector.shape_cast %84 : vector<8xf32> to vector<8x1xf32>
    %86 = arith.addf %83, %85 : vector<8x1xf32>
    %c1_49 = arith.constant 1 : index
    %c0_50 = arith.constant 0 : index
    %c0_51 = arith.constant 0 : index
    %87 = vector.load %arg14[%c1_49, %c0_50, %c0_51] : memref<4x8x1xf32, #tpu.memory_space<vmem>>, vector<1x8x1xf32>
    %88 = vector.shape_cast %87 : vector<1x8x1xf32> to vector<8x1xf32>
    %89 = vector.shape_cast %86 : vector<8x1xf32> to vector<1x8x1xf32>
    tpu.vector_store %arg14[%c1_49, %c0_50, %c0_51], %89 {strides = array<i32>} : memref<4x8x1xf32, #tpu.memory_space<vmem>>, vector<1x8x1xf32>,
    %c1_52 = arith.constant 1 : index
    %c0_53 = arith.constant 0 : index
    %c0_54 = arith.constant 0 : index
    %90 = vector.load %arg15[%c1_52, %c0_53, %c0_54] : memref<4x8x8xf32, #tpu.memory_space<vmem>>, vector<1x8x8xf32>
    %91 = vector.shape_cast %90 : vector<1x8x8xf32> to vector<8x8xf32>
    %92 = vector.broadcast %77 : vector<8x1xf32> to vector<8x8xf32>
    %93 = arith.mulf %92, %91 : vector<8x8xf32>
    %94 = arith.truncf %80 : vector<8x8xf32> to vector<8x8xbf16>
    %cst_55 = arith.constant dense<0.000000e+00> : vector<8x8xf32>
    %95 = tpu.matmul %94, %66, %cst_55 {dimension_numbers = #tpu.dot_dimension_numbers<[1], [0], [0], [1], [0, 0, 1, 1], [], []>} : vector<8x8xbf16>, vector<8x8xbf16>, vector<8x8xf32> -> vector<8x8xf32>
    %96 = arith.addf %93, %95 : vector<8x8xf32>
    %c1_56 = arith.constant 1 : index
    %c0_57 = arith.constant 0 : index
    %c0_58 = arith.constant 0 : index
    %97 = vector.load %arg15[%c1_56, %c0_57, %c0_58] : memref<4x8x8xf32, #tpu.memory_space<vmem>>, vector<1x8x8xf32>
    %98 = vector.shape_cast %97 : vector<1x8x8xf32> to vector<8x8xf32>
    %99 = vector.shape_cast %96 : vector<8x8xf32> to vector<1x8x8xf32>
    tpu.vector_store %arg15[%c1_56, %c0_57, %c0_58], %99 {strides = array<i32>} : memref<4x8x8xf32, #tpu.memory_space<vmem>>, vector<1x8x8xf32>,
    %c1_59 = arith.constant 1 : index
    %c0_60 = arith.constant 0 : index
    %c0_61 = arith.constant 0 : index
    %100 = vector.load %arg13[%c1_59, %c0_60, %c0_61] : memref<4x8x1xf32, #tpu.memory_space<vmem>>, vector<1x8x1xf32>
    %101 = vector.shape_cast %100 : vector<1x8x1xf32> to vector<8x1xf32>
    %102 = vector.shape_cast %75 : vector<8x1xf32> to vector<1x8x1xf32>
    tpu.vector_store %arg13[%c1_59, %c0_60, %c0_61], %102 {strides = array<i32>} : memref<4x8x1xf32, #tpu.memory_space<vmem>>, vector<1x8x1xf32>,
    %103 = vector.extract_strided_slice %4 {offsets = [0, 16], sizes = [8, 8], strides = [1, 1]} : vector<8x32xbf16> to vector<8x8xbf16>
    %104 = vector.extract_strided_slice %6 {offsets = [0, 16], sizes = [8, 8], strides = [1, 1]} : vector<8x32xbf16> to vector<8x8xbf16>
    %105 = vector.extract_strided_slice %8 {offsets = [0, 16], sizes = [8, 8], strides = [1, 1]} : vector<8x32xbf16> to vector<8x8xbf16>
    %cst_62 = arith.constant dense<0.000000e+00> : vector<8x8xf32>
    %106 = tpu.matmul %103, %104, %cst_62 {dimension_numbers = #tpu.dot_dimension_numbers<[1], [1], [0], [0], [0, 0, 1, 0], [], []>} : vector<8x8xbf16>, vector<8x8xbf16>, vector<8x8xf32> -> vector<8x8xf32>
    %cst_63 = arith.constant 0.353553385 : f32
    %107 = vector.broadcast %cst_63 : f32 to vector<8x8xf32>
    %108 = arith.mulf %106, %107 : vector<8x8xf32>
    %109 = arith.addf %108, %24 : vector<8x8xf32>
    %c2 = arith.constant 2 : index
    %c0_64 = arith.constant 0 : index
    %c0_65 = arith.constant 0 : index
    %110 = vector.load %arg13[%c2, %c0_64, %c0_65] : memref<4x8x1xf32, #tpu.memory_space<vmem>>, vector<1x8x1xf32>
    %111 = vector.shape_cast %110 : vector<1x8x1xf32> to vector<8x1xf32>
    %cst_66 = arith.constant dense<0xFF800000> : vector<8xf32>
    %112 = vector.multi_reduction <maximumf>, %109, %cst_66 [1] : vector<8x8xf32> to vector<8xf32>
    %113 = vector.shape_cast %112 : vector<8xf32> to vector<8x1xf32>
    %114 = arith.maximumf %111, %113 : vector<8x1xf32>
    %115 = arith.subf %111, %114 : vector<8x1xf32>
    %116 = math.exp %115 : vector<8x1xf32>
    %117 = vector.broadcast %114 : vector<8x1xf32> to vector<8x8xf32>
    %118 = arith.subf %109, %117 : vector<8x8xf32>
    %119 = math.exp %118 : vector<8x8xf32>
    %c2_67 = arith.constant 2 : index
    %c0_68 = arith.constant 0 : index
    %c0_69 = arith.constant 0 : index
    %120 = vector.load %arg14[%c2_67, %c0_68, %c0_69] : memref<4x8x1xf32, #tpu.memory_space<vmem>>, vector<1x8x1xf32>
    %121 = vector.shape_cast %120 : vector<1x8x1xf32> to vector<8x1xf32>
    %122 = arith.mulf %116, %121 : vector<8x1xf32>
    %cst_70 = arith.constant dense<0.000000e+00> : vector<8xf32>
    %123 = vector.multi_reduction <add>, %119, %cst_70 [1] : vector<8x8xf32> to vector<8xf32>
    %124 = vector.shape_cast %123 : vector<8xf32> to vector<8x1xf32>
    %125 = arith.addf %122, %124 : vector<8x1xf32>
    %c2_71 = arith.constant 2 : index
    %c0_72 = arith.constant 0 : index
    %c0_73 = arith.constant 0 : index
    %126 = vector.load %arg14[%c2_71, %c0_72, %c0_73] : memref<4x8x1xf32, #tpu.memory_space<vmem>>, vector<1x8x1xf32>
    %127 = vector.shape_cast %126 : vector<1x8x1xf32> to vector<8x1xf32>
    %128 = vector.shape_cast %125 : vector<8x1xf32> to vector<1x8x1xf32>
    tpu.vector_store %arg14[%c2_71, %c0_72, %c0_73], %128 {strides = array<i32>} : memref<4x8x1xf32, #tpu.memory_space<vmem>>, vector<1x8x1xf32>,
    %c2_74 = arith.constant 2 : index
    %c0_75 = arith.constant 0 : index
    %c0_76 = arith.constant 0 : index
    %129 = vector.load %arg15[%c2_74, %c0_75, %c0_76] : memref<4x8x8xf32, #tpu.memory_space<vmem>>, vector<1x8x8xf32>
    %130 = vector.shape_cast %129 : vector<1x8x8xf32> to vector<8x8xf32>
    %131 = vector.broadcast %116 : vector<8x1xf32> to vector<8x8xf32>
    %132 = arith.mulf %131, %130 : vector<8x8xf32>
    %133 = arith.truncf %119 : vector<8x8xf32> to vector<8x8xbf16>
    %cst_77 = arith.constant dense<0.000000e+00> : vector<8x8xf32>
    %134 = tpu.matmul %133, %105, %cst_77 {dimension_numbers = #tpu.dot_dimension_numbers<[1], [0], [0], [1], [0, 0, 1, 1], [], []>} : vector<8x8xbf16>, vector<8x8xbf16>, vector<8x8xf32> -> vector<8x8xf32>
    %135 = arith.addf %132, %134 : vector<8x8xf32>
    %c2_78 = arith.constant 2 : index
    %c0_79 = arith.constant 0 : index
    %c0_80 = arith.constant 0 : index
    %136 = vector.load %arg15[%c2_78, %c0_79, %c0_80] : memref<4x8x8xf32, #tpu.memory_space<vmem>>, vector<1x8x8xf32>
    %137 = vector.shape_cast %136 : vector<1x8x8xf32> to vector<8x8xf32>
    %138 = vector.shape_cast %135 : vector<8x8xf32> to vector<1x8x8xf32>
    tpu.vector_store %arg15[%c2_78, %c0_79, %c0_80], %138 {strides = array<i32>} : memref<4x8x8xf32, #tpu.memory_space<vmem>>, vector<1x8x8xf32>,
    %c2_81 = arith.constant 2 : index
    %c0_82 = arith.constant 0 : index
    %c0_83 = arith.constant 0 : index
    %139 = vector.load %arg13[%c2_81, %c0_82, %c0_83] : memref<4x8x1xf32, #tpu.memory_space<vmem>>, vector<1x8x1xf32>
    %140 = vector.shape_cast %139 : vector<1x8x1xf32> to vector<8x1xf32>
    %141 = vector.shape_cast %114 : vector<8x1xf32> to vector<1x8x1xf32>
    tpu.vector_store %arg13[%c2_81, %c0_82, %c0_83], %141 {strides = array<i32>} : memref<4x8x1xf32, #tpu.memory_space<vmem>>, vector<1x8x1xf32>,
    %142 = vector.extract_strided_slice %4 {offsets = [0, 24], sizes = [8, 8], strides = [1, 1]} : vector<8x32xbf16> to vector<8x8xbf16>
    %143 = vector.extract_strided_slice %6 {offsets = [0, 24], sizes = [8, 8], strides = [1, 1]} : vector<8x32xbf16> to vector<8x8xbf16>
    %144 = vector.extract_strided_slice %8 {offsets = [0, 24], sizes = [8, 8], strides = [1, 1]} : vector<8x32xbf16> to vector<8x8xbf16>
    %cst_84 = arith.constant dense<0.000000e+00> : vector<8x8xf32>
    %145 = tpu.matmul %142, %143, %cst_84 {dimension_numbers = #tpu.dot_dimension_numbers<[1], [1], [0], [0], [0, 0, 1, 0], [], []>} : vector<8x8xbf16>, vector<8x8xbf16>, vector<8x8xf32> -> vector<8x8xf32>
    %cst_85 = arith.constant 0.353553385 : f32
    %146 = vector.broadcast %cst_85 : f32 to vector<8x8xf32>
    %147 = arith.mulf %145, %146 : vector<8x8xf32>
    %148 = arith.addf %147, %24 : vector<8x8xf32>
    %c3 = arith.constant 3 : index
    %c0_86 = arith.constant 0 : index
    %c0_87 = arith.constant 0 : index
    %149 = vector.load %arg13[%c3, %c0_86, %c0_87] : memref<4x8x1xf32, #tpu.memory_space<vmem>>, vector<1x8x1xf32>
    %150 = vector.shape_cast %149 : vector<1x8x1xf32> to vector<8x1xf32>
    %cst_88 = arith.constant dense<0xFF800000> : vector<8xf32>
    %151 = vector.multi_reduction <maximumf>, %148, %cst_88 [1] : vector<8x8xf32> to vector<8xf32>
    %152 = vector.shape_cast %151 : vector<8xf32> to vector<8x1xf32>
    %153 = arith.maximumf %150, %152 : vector<8x1xf32>
    %154 = arith.subf %150, %153 : vector<8x1xf32>
    %155 = math.exp %154 : vector<8x1xf32>
    %156 = vector.broadcast %153 : vector<8x1xf32> to vector<8x8xf32>
    %157 = arith.subf %148, %156 : vector<8x8xf32>
    %158 = math.exp %157 : vector<8x8xf32>
    %c3_89 = arith.constant 3 : index
    %c0_90 = arith.constant 0 : index
    %c0_91 = arith.constant 0 : index
    %159 = vector.load %arg14[%c3_89, %c0_90, %c0_91] : memref<4x8x1xf32, #tpu.memory_space<vmem>>, vector<1x8x1xf32>
    %160 = vector.shape_cast %159 : vector<1x8x1xf32> to vector<8x1xf32>
    %161 = arith.mulf %155, %160 : vector<8x1xf32>
    %cst_92 = arith.constant dense<0.000000e+00> : vector<8xf32>
    %162 = vector.multi_reduction <add>, %158, %cst_92 [1] : vector<8x8xf32> to vector<8xf32>
    %163 = vector.shape_cast %162 : vector<8xf32> to vector<8x1xf32>
    %164 = arith.addf %161, %163 : vector<8x1xf32>
    %c3_93 = arith.constant 3 : index
    %c0_94 = arith.constant 0 : index
    %c0_95 = arith.constant 0 : index
    %165 = vector.load %arg14[%c3_93, %c0_94, %c0_95] : memref<4x8x1xf32, #tpu.memory_space<vmem>>, vector<1x8x1xf32>
    %166 = vector.shape_cast %165 : vector<1x8x1xf32> to vector<8x1xf32>
    %167 = vector.shape_cast %164 : vector<8x1xf32> to vector<1x8x1xf32>
    tpu.vector_store %arg14[%c3_93, %c0_94, %c0_95], %167 {strides = array<i32>} : memref<4x8x1xf32, #tpu.memory_space<vmem>>, vector<1x8x1xf32>,
    %c3_96 = arith.constant 3 : index
    %c0_97 = arith.constant 0 : index
    %c0_98 = arith.constant 0 : index
    %168 = vector.load %arg15[%c3_96, %c0_97, %c0_98] : memref<4x8x8xf32, #tpu.memory_space<vmem>>, vector<1x8x8xf32>
    %169 = vector.shape_cast %168 : vector<1x8x8xf32> to vector<8x8xf32>
    %170 = vector.broadcast %155 : vector<8x1xf32> to vector<8x8xf32>
    %171 = arith.mulf %170, %169 : vector<8x8xf32>
    %172 = arith.truncf %158 : vector<8x8xf32> to vector<8x8xbf16>
    %cst_99 = arith.constant dense<0.000000e+00> : vector<8x8xf32>
    %173 = tpu.matmul %172, %144, %cst_99 {dimension_numbers = #tpu.dot_dimension_numbers<[1], [0], [0], [1], [0, 0, 1, 1], [], []>} : vector<8x8xbf16>, vector<8x8xbf16>, vector<8x8xf32> -> vector<8x8xf32>
    %174 = arith.addf %171, %173 : vector<8x8xf32>
    %c3_100 = arith.constant 3 : index
    %c0_101 = arith.constant 0 : index
    %c0_102 = arith.constant 0 : index
    %175 = vector.load %arg15[%c3_100, %c0_101, %c0_102] : memref<4x8x8xf32, #tpu.memory_space<vmem>>, vector<1x8x8xf32>
    %176 = vector.shape_cast %175 : vector<1x8x8xf32> to vector<8x8xf32>
    %177 = vector.shape_cast %174 : vector<8x8xf32> to vector<1x8x8xf32>
    tpu.vector_store %arg15[%c3_100, %c0_101, %c0_102], %177 {strides = array<i32>} : memref<4x8x8xf32, #tpu.memory_space<vmem>>, vector<1x8x8xf32>,
    %c3_103 = arith.constant 3 : index
    %c0_104 = arith.constant 0 : index
    %c0_105 = arith.constant 0 : index
    %178 = vector.load %arg13[%c3_103, %c0_104, %c0_105] : memref<4x8x1xf32, #tpu.memory_space<vmem>>, vector<1x8x1xf32>
    %179 = vector.shape_cast %178 : vector<1x8x1xf32> to vector<8x1xf32>
    %180 = vector.shape_cast %153 : vector<8x1xf32> to vector<1x8x1xf32>
    tpu.vector_store %arg13[%c3_103, %c0_104, %c0_105], %180 {strides = array<i32>} : memref<4x8x1xf32, #tpu.memory_space<vmem>>, vector<1x8x1xf32>,
    %c0_i32_106 = arith.constant 0 : i32
    %181 = arith.cmpi eq, %arg2, %c0_i32_106 : i32
    %182 = arith.extui %181 : i1 to i32
    %c0_i32_107 = arith.constant 0 : i32
    %183 = arith.cmpi ne, %182, %c0_i32_107 : i32
    scf.if %183 {
      %cst_108 = arith.constant 0.000000e+00 : f32
      %184 = vector.broadcast %cst_108 : f32 to vector<8x32xf32>
      %c0_109 = arith.constant 0 : index
      %c0_110 = arith.constant 0 : index
      %c0_111 = arith.constant 0 : index
      %185 = vector.load %arg14[%c0_109, %c0_110, %c0_111] : memref<4x8x1xf32, #tpu.memory_space<vmem>>, vector<1x8x1xf32>
      %186 = vector.shape_cast %185 : vector<1x8x1xf32> to vector<8x1xf32>
      %187 = tpu.reciprocal %186 {approx = true} : vector<8x1xf32> -> vector<8x1xf32>
      %c0_112 = arith.constant 0 : index
      %c0_113 = arith.constant 0 : index
      %c0_114 = arith.constant 0 : index
      %188 = vector.load %arg15[%c0_112, %c0_113, %c0_114] : memref<4x8x8xf32, #tpu.memory_space<vmem>>, vector<1x8x8xf32>
      %189 = vector.shape_cast %188 : vector<1x8x8xf32> to vector<8x8xf32>
      %190 = vector.broadcast %187 : vector<8x1xf32> to vector<8x8xf32>
      %191 = arith.mulf %189, %190 : vector<8x8xf32>
      %192 = arith.truncf %191 : vector<8x8xf32> to vector<8x8xbf16>
      %c0_115 = arith.constant 0 : index
      %c0_116 = arith.constant 0 : index
      %193 = vector.load %arg8[%c0_115, %c0_116] : memref<32x32xbf16, #tpu.memory_space<vmem>>, vector<8x32xbf16>
      %cst_117 = arith.constant dense<0.000000e+00> : vector<8x32xf32>
      %194 = tpu.matmul %192, %193, %cst_117 {dimension_numbers = #tpu.dot_dimension_numbers<[1], [0], [0], [1], [0, 0, 1, 1], [], []>} : vector<8x8xbf16>, vector<8x32xbf16>, vector<8x32xf32> -> vector<8x32xf32>
      %195 = arith.addf %184, %194 : vector<8x32xf32>
      %c1_118 = arith.constant 1 : index
      %c0_119 = arith.constant 0 : index
      %c0_120 = arith.constant 0 : index
      %196 = vector.load %arg14[%c1_118, %c0_119, %c0_120] : memref<4x8x1xf32, #tpu.memory_space<vmem>>, vector<1x8x1xf32>
      %197 = vector.shape_cast %196 : vector<1x8x1xf32> to vector<8x1xf32>
      %198 = tpu.reciprocal %197 {approx = true} : vector<8x1xf32> -> vector<8x1xf32>
      %c1_121 = arith.constant 1 : index
      %c0_122 = arith.constant 0 : index
      %c0_123 = arith.constant 0 : index
      %199 = vector.load %arg15[%c1_121, %c0_122, %c0_123] : memref<4x8x8xf32, #tpu.memory_space<vmem>>, vector<1x8x8xf32>
      %200 = vector.shape_cast %199 : vector<1x8x8xf32> to vector<8x8xf32>
      %201 = vector.broadcast %198 : vector<8x1xf32> to vector<8x8xf32>
      %202 = arith.mulf %200, %201 : vector<8x8xf32>
      %203 = arith.truncf %202 : vector<8x8xf32> to vector<8x8xbf16>
      %c8 = arith.constant 8 : index
      %c0_124 = arith.constant 0 : index
      %204 = vector.load %arg8[%c8, %c0_124] : memref<32x32xbf16, #tpu.memory_space<vmem>>, vector<8x32xbf16>
      %cst_125 = arith.constant dense<0.000000e+00> : vector<8x32xf32>
      %205 = tpu.matmul %203, %204, %cst_125 {dimension_numbers = #tpu.dot_dimension_numbers<[1], [0], [0], [1], [0, 0, 1, 1], [], []>} : vector<8x8xbf16>, vector<8x32xbf16>, vector<8x32xf32> -> vector<8x32xf32>
      %206 = arith.addf %195, %205 : vector<8x32xf32>
      %c2_126 = arith.constant 2 : index
      %c0_127 = arith.constant 0 : index
      %c0_128 = arith.constant 0 : index
      %207 = vector.load %arg14[%c2_126, %c0_127, %c0_128] : memref<4x8x1xf32, #tpu.memory_space<vmem>>, vector<1x8x1xf32>
      %208 = vector.shape_cast %207 : vector<1x8x1xf32> to vector<8x1xf32>
      %209 = tpu.reciprocal %208 {approx = true} : vector<8x1xf32> -> vector<8x1xf32>
      %c2_129 = arith.constant 2 : index
      %c0_130 = arith.constant 0 : index
      %c0_131 = arith.constant 0 : index
      %210 = vector.load %arg15[%c2_129, %c0_130, %c0_131] : memref<4x8x8xf32, #tpu.memory_space<vmem>>, vector<1x8x8xf32>
      %211 = vector.shape_cast %210 : vector<1x8x8xf32> to vector<8x8xf32>
      %212 = vector.broadcast %209 : vector<8x1xf32> to vector<8x8xf32>
      %213 = arith.mulf %211, %212 : vector<8x8xf32>
      %214 = arith.truncf %213 : vector<8x8xf32> to vector<8x8xbf16>
      %c16 = arith.constant 16 : index
      %c0_132 = arith.constant 0 : index
      %215 = vector.load %arg8[%c16, %c0_132] : memref<32x32xbf16, #tpu.memory_space<vmem>>, vector<8x32xbf16>
      %cst_133 = arith.constant dense<0.000000e+00> : vector<8x32xf32>
      %216 = tpu.matmul %214, %215, %cst_133 {dimension_numbers = #tpu.dot_dimension_numbers<[1], [0], [0], [1], [0, 0, 1, 1], [], []>} : vector<8x8xbf16>, vector<8x32xbf16>, vector<8x32xf32> -> vector<8x32xf32>
      %217 = arith.addf %206, %216 : vector<8x32xf32>
      %c3_134 = arith.constant 3 : index
      %c0_135 = arith.constant 0 : index
      %c0_136 = arith.constant 0 : index
      %218 = vector.load %arg14[%c3_134, %c0_135, %c0_136] : memref<4x8x1xf32, #tpu.memory_space<vmem>>, vector<1x8x1xf32>
      %219 = vector.shape_cast %218 : vector<1x8x1xf32> to vector<8x1xf32>
      %220 = tpu.reciprocal %219 {approx = true} : vector<8x1xf32> -> vector<8x1xf32>
      %c3_137 = arith.constant 3 : index
      %c0_138 = arith.constant 0 : index
      %c0_139 = arith.constant 0 : index
      %221 = vector.load %arg15[%c3_137, %c0_138, %c0_139] : memref<4x8x8xf32, #tpu.memory_space<vmem>>, vector<1x8x8xf32>
      %222 = vector.shape_cast %221 : vector<1x8x8xf32> to vector<8x8xf32>
      %223 = vector.broadcast %220 : vector<8x1xf32> to vector<8x8xf32>
      %224 = arith.mulf %222, %223 : vector<8x8xf32>
      %225 = arith.truncf %224 : vector<8x8xf32> to vector<8x8xbf16>
      %c24 = arith.constant 24 : index
      %c0_140 = arith.constant 0 : index
      %226 = vector.load %arg8[%c24, %c0_140] : memref<32x32xbf16, #tpu.memory_space<vmem>>, vector<8x32xbf16>
      %cst_141 = arith.constant dense<0.000000e+00> : vector<8x32xf32>
      %227 = tpu.matmul %225, %226, %cst_141 {dimension_numbers = #tpu.dot_dimension_numbers<[1], [0], [0], [1], [0, 0, 1, 1], [], []>} : vector<8x8xbf16>, vector<8x32xbf16>, vector<8x32xf32> -> vector<8x32xf32>
      %228 = arith.addf %217, %227 : vector<8x32xf32>
      %c0_142 = arith.constant 0 : index
      %c0_143 = arith.constant 0 : index
      %c0_144 = arith.constant 0 : index
      %229 = vector.load %arg7[%c0_142, %c0_143, %c0_144] : memref<1x8x32xbf16, #tpu.memory_space<vmem>>, vector<1x8x32xbf16>
      %230 = vector.shape_cast %229 : vector<1x8x32xbf16> to vector<8x32xbf16>
      %231 = arith.extf %230 : vector<8x32xbf16> to vector<8x32xf32>
      %232 = arith.addf %231, %228 : vector<8x32xf32>
      %c0_145 = arith.constant 0 : index
      %c0_146 = arith.constant 0 : index
      %233 = vector.load %arg9[%c0_145, %c0_146] : memref<1x32xf32, #tpu.memory_space<vmem>>, vector<1x32xf32>
      %234 = vector.broadcast %233 : vector<1x32xf32> to vector<8x32xf32>
      %235 = arith.addf %232, %234 : vector<8x32xf32>
      %cst_147 = arith.constant dense<0.000000e+00> : vector<8xf32>
      %236 = vector.multi_reduction <add>, %235, %cst_147 [1] : vector<8x32xf32> to vector<8xf32>
      %237 = vector.shape_cast %236 : vector<8xf32> to vector<8x1xf32>
      %cst_148 = arith.constant 3.200000e+01 : f32
      %238 = vector.broadcast %cst_148 : f32 to vector<8x1xf32>
      %239 = arith.divf %237, %238 : vector<8x1xf32>
      %240 = vector.broadcast %239 : vector<8x1xf32> to vector<8x32xf32>
      %241 = arith.subf %235, %240 : vector<8x32xf32>
      %242 = arith.mulf %241, %241 : vector<8x32xf32>
      %cst_149 = arith.constant dense<0.000000e+00> : vector<8xf32>
      %243 = vector.multi_reduction <add>, %242, %cst_149 [1] : vector<8x32xf32> to vector<8xf32>
      %244 = vector.shape_cast %243 : vector<8xf32> to vector<8x1xf32>
      %cst_150 = arith.constant 3.200000e+01 : f32
      %245 = vector.broadcast %cst_150 : f32 to vector<8x1xf32>
      %246 = arith.divf %244, %245 : vector<8x1xf32>
      %247 = vector.broadcast %239 : vector<8x1xf32> to vector<8x32xf32>
      %248 = arith.subf %235, %247 : vector<8x32xf32>
      %cst_151 = arith.constant 9.99999974E-6 : f32
      %249 = vector.broadcast %cst_151 : f32 to vector<8x1xf32>
      %250 = arith.addf %246, %249 : vector<8x1xf32>
      %251 = math.rsqrt %250 : vector<8x1xf32>
      %252 = vector.broadcast %251 : vector<8x1xf32> to vector<8x32xf32>
      %253 = arith.mulf %248, %252 : vector<8x32xf32>
      %c0_152 = arith.constant 0 : index
      %c0_153 = arith.constant 0 : index
      %254 = vector.load %arg10[%c0_152, %c0_153] : memref<1x32xf32, #tpu.memory_space<vmem>>, vector<1x32xf32>
      %255 = vector.broadcast %254 : vector<1x32xf32> to vector<8x32xf32>
      %256 = arith.mulf %253, %255 : vector<8x32xf32>
      %c0_154 = arith.constant 0 : index
      %c0_155 = arith.constant 0 : index
      %257 = vector.load %arg11[%c0_154, %c0_155] : memref<1x32xf32, #tpu.memory_space<vmem>>, vector<1x32xf32>
      %258 = vector.broadcast %257 : vector<1x32xf32> to vector<8x32xf32>
      %259 = arith.addf %256, %258 : vector<8x32xf32>
      %260 = arith.truncf %259 : vector<8x32xf32> to vector<8x32xbf16>
      %c0_156 = arith.constant 0 : index
      %c0_157 = arith.constant 0 : index
      %c0_158 = arith.constant 0 : index
      %261 = vector.load %arg12[%c0_156, %c0_157, %c0_158] : memref<1x8x32xbf16, #tpu.memory_space<vmem>>, vector<1x8x32xbf16>
      %262 = vector.shape_cast %261 : vector<1x8x32xbf16> to vector<8x32xbf16>
      %263 = vector.shape_cast %260 : vector<8x32xbf16> to vector<1x8x32xbf16>
      tpu.vector_store %arg12[%c0_156, %c0_157, %c0_158], %263 {strides = array<i32>} : memref<1x8x32xbf16, #tpu.memory_space<vmem>>, vector<1x8x32xbf16>,
    } else {
    }
    return
  }
  func.func @transform_0(%arg0: i32, %arg1: i32, %arg2: i32) -> (i32, i32, i32, i32) {
    %c0_i32 = arith.constant 0 : i32
    %c0_i32_0 = arith.constant 0 : i32
    %c0_i32_1 = arith.constant 0 : i32
    return %c0_i32, %arg0, %arg1, %c0_i32_0 : i32, i32, i32, i32
  }
  func.func @transform_1(%arg0: i32, %arg1: i32, %arg2: i32) -> (i32, i32, i32, i32) {
    %c1_i32 = arith.constant 1 : i32
    %c0_i32 = arith.constant 0 : i32
    %c0_i32_0 = arith.constant 0 : i32
    return %c1_i32, %arg0, %arg2, %c0_i32 : i32, i32, i32, i32
  }
  func.func @transform_2(%arg0: i32, %arg1: i32, %arg2: i32) -> (i32, i32, i32, i32) {
    %c2_i32 = arith.constant 2 : i32
    %c0_i32 = arith.constant 0 : i32
    %c0_i32_0 = arith.constant 0 : i32
    return %c2_i32, %arg0, %arg2, %c0_i32 : i32, i32, i32, i32
  }
  func.func @transform_3(%arg0: i32, %arg1: i32, %arg2: i32) -> (i32, i32, i32) {
    %c0_i32 = arith.constant 0 : i32
    %c0_i32_0 = arith.constant 0 : i32
    return %arg0, %c0_i32, %arg2 : i32, i32, i32
  }
  func.func @transform_4(%arg0: i32, %arg1: i32, %arg2: i32) -> (i32, i32, i32) {
    %c0_i32 = arith.constant 0 : i32
    %c0_i32_0 = arith.constant 0 : i32
    return %arg0, %arg1, %c0_i32 : i32, i32, i32
  }
  func.func @transform_5(%arg0: i32, %arg1: i32, %arg2: i32) -> (i32, i32) {
    %c0_i32 = arith.constant 0 : i32
    %c0_i32_0 = arith.constant 0 : i32
    %c0_i32_1 = arith.constant 0 : i32
    return %c0_i32, %c0_i32_0 : i32, i32
  }
  func.func @transform_6(%arg0: i32, %arg1: i32, %arg2: i32) -> (i32, i32) {
    %c0_i32 = arith.constant 0 : i32
    %c0_i32_0 = arith.constant 0 : i32
    %c0_i32_1 = arith.constant 0 : i32
    return %c0_i32, %c0_i32_0 : i32, i32
  }
  func.func @transform_7(%arg0: i32, %arg1: i32, %arg2: i32) -> (i32, i32) {
    %c0_i32 = arith.constant 0 : i32
    %c0_i32_0 = arith.constant 0 : i32
    %c0_i32_1 = arith.constant 0 : i32
    return %c0_i32, %c0_i32_0 : i32, i32
  }
  func.func @transform_8(%arg0: i32, %arg1: i32, %arg2: i32) -> (i32, i32) {
    %c0_i32 = arith.constant 0 : i32
    %c0_i32_0 = arith.constant 0 : i32
    %c0_i32_1 = arith.constant 0 : i32
    return %c0_i32, %c0_i32_0 : i32, i32
  }
  func.func @transform_9(%arg0: i32, %arg1: i32, %arg2: i32) -> (i32, i32, i32) {
    %c0_i32 = arith.constant 0 : i32
    %c0_i32_0 = arith.constant 0 : i32
    return %arg0, %arg1, %c0_i32 : i32, i32, i32
  }
}

module attributes {stable_mosaic.version = 11 : i64} {
  func.func @_linear_kernel(%arg0: i32, %arg1: i32, %arg2: memref<16x32xbf16, #tpu.memory_space<vmem>>, %arg3: memref<32x32xbf16, #tpu.memory_space<vmem>>, %arg4: memref<1x32xf32, #tpu.memory_space<vmem>>, %arg5: memref<16x32xf32, #tpu.memory_space<vmem>>) attributes {dimension_semantics = [#tpu.dimension_semantics<parallel>, #tpu.dimension_semantics<parallel>], iteration_bounds = array<i64: 1, 1>, scalar_prefetch = 0 : i64, scratch_operands = 0 : i64, tpu.core_type = #tpu.core_type<tc>, window_params = [{transform_indices = @transform_0, window_bounds = array<i64: 16, 32>}, {transform_indices = @transform_1, window_bounds = array<i64: 32, 32>}, {transform_indices = @transform_2, window_bounds = array<i64: 1, 32>}, {transform_indices = @transform_3, window_bounds = array<i64: 16, 32>}]} {
    %c0 = arith.constant 0 : index
    %c0_0 = arith.constant 0 : index
    %0 = vector.load %arg2[%c0, %c0_0] : memref<16x32xbf16, #tpu.memory_space<vmem>>, vector<16x32xbf16>
    %c0_1 = arith.constant 0 : index
    %c0_2 = arith.constant 0 : index
    %1 = vector.load %arg3[%c0_1, %c0_2] : memref<32x32xbf16, #tpu.memory_space<vmem>>, vector<32x32xbf16>
    %cst = arith.constant dense<0.000000e+00> : vector<16x32xf32>
    %2 = tpu.matmul %0, %1, %cst {dimension_numbers = #tpu.dot_dimension_numbers<[1], [0], [0], [1], [0, 0, 1, 1], [], []>} : vector<16x32xbf16>, vector<32x32xbf16>, vector<16x32xf32> -> vector<16x32xf32>
    %c0_3 = arith.constant 0 : index
    %c0_4 = arith.constant 0 : index
    %3 = vector.load %arg4[%c0_3, %c0_4] : memref<1x32xf32, #tpu.memory_space<vmem>>, vector<1x32xf32>
    %4 = vector.broadcast %3 : vector<1x32xf32> to vector<16x32xf32>
    %5 = arith.addf %2, %4 : vector<16x32xf32>
    %c0_5 = arith.constant 0 : index
    %c0_6 = arith.constant 0 : index
    %6 = vector.load %arg5[%c0_5, %c0_6] : memref<16x32xf32, #tpu.memory_space<vmem>>, vector<16x32xf32>
    tpu.vector_store %arg5[%c0_5, %c0_6], %5 {strides = array<i32>} : memref<16x32xf32, #tpu.memory_space<vmem>>, vector<16x32xf32>,
    return
  }
  func.func @transform_0(%arg0: i32, %arg1: i32) -> (i32, i32) {
    %c0_i32 = arith.constant 0 : i32
    %c0_i32_0 = arith.constant 0 : i32
    return %arg0, %c0_i32 : i32, i32
  }
  func.func @transform_1(%arg0: i32, %arg1: i32) -> (i32, i32) {
    %c0_i32 = arith.constant 0 : i32
    %c0_i32_0 = arith.constant 0 : i32
    return %c0_i32, %arg1 : i32, i32
  }
  func.func @transform_2(%arg0: i32, %arg1: i32) -> (i32, i32) {
    %c0_i32 = arith.constant 0 : i32
    %c0_i32_0 = arith.constant 0 : i32
    return %c0_i32, %arg1 : i32, i32
  }
  func.func @transform_3(%arg0: i32, %arg1: i32) -> (i32, i32) {
    %c0_i32 = arith.constant 0 : i32
    return %arg0, %arg1 : i32, i32
  }
}

module attributes {stable_mosaic.version = 11 : i64} {
  func.func @_flash_mha_ln_kernel(%arg0: i32, %arg1: i32, %arg2: i32, %arg3: memref<1x1x8x32xbf16, #tpu.memory_space<vmem>>, %arg4: memref<1x1x8x32xbf16, #tpu.memory_space<vmem>>, %arg5: memref<1x1x8x32xbf16, #tpu.memory_space<vmem>>, %arg6: memref<1x1x8xf32, #tpu.memory_space<vmem>>, %arg7: memref<1x8x32xbf16, #tpu.memory_space<vmem>>, %arg8: memref<32x32xbf16, #tpu.memory_space<vmem>>, %arg9: memref<1x32xf32, #tpu.memory_space<vmem>>, %arg10: memref<1x32xf32, #tpu.memory_space<vmem>>, %arg11: memref<1x32xf32, #tpu.memory_space<vmem>>, %arg12: memref<1x8x32xbf16, #tpu.memory_space<vmem>>, %arg13: memref<4x8x1xf32, #tpu.memory_space<vmem>>, %arg14: memref<4x8x1xf32, #tpu.memory_space<vmem>>, %arg15: memref<4x8x8xf32, #tpu.memory_space<vmem>>) attributes {dimension_semantics = [#tpu.dimension_semantics<parallel>, #tpu.dimension_semantics<parallel>, #tpu.dimension_semantics<arbitrary>], iteration_bounds = array<i64: 2, 1, 1>, scalar_prefetch = 0 : i64, scratch_operands = 3 : i64, tpu.core_type = #tpu.core_type<tc>, window_params = [{transform_indices = @transform_0, window_bounds = array<i64: 1, 1, 8, 32>}, {transform_indices = @transform_1, window_bounds = array<i64: 1, 1, 8, 32>}, {transform_indices = @transform_2, window_bounds = array<i64: 1, 1, 8, 32>}, {transform_indices = @transform_3, window_bounds = array<i64: 1, 1, 8>}, {transform_indices = @transform_4, window_bounds = array<i64: 1, 8, 32>}, {pipeline_mode = #tpu.pipeline_mode<synchronous>, transform_indices = @transform_5, window_bounds = array<i64: 32, 32>}, {pipeline_mode = #tpu.pipeline_mode<synchronous>, transform_indices = @transform_6, window_bounds = array<i64: 1, 32>}, {pipeline_mode = #tpu.pipeline_mode<synchronous>, transform_indices = @transform_7, window_bounds = array<i64: 1, 32>}, {pipeline_mode = #tpu.pipeline_mode<synchronous>, transform_indices = @transform_8, window_bounds = array<i64: 1, 32>}, {transform_indices = @transform_9, window_bounds = array<i64: 1, 8, 32>}]} {
    %c0_i32 = arith.constant 0 : i32
    %0 = arith.cmpi eq, %arg2, %c0_i32 : i32
    %1 = arith.extui %0 : i1 to i32
    %c0_i32_0 = arith.constant 0 : i32
    %2 = arith.cmpi ne, %1, %c0_i32_0 : i32
    scf.if %2 {
      %cst_105 = arith.constant -1.000000e+30 : f32
      %174 = vector.broadcast %cst_105 : f32 to vector<4x8x1xf32>
      %c0_106 = arith.constant 0 : index
      %c0_107 = arith.constant 0 : index
      %c0_108 = arith.constant 0 : index
      %175 = vector.load %arg13[%c0_106, %c0_107, %c0_108] : memref<4x8x1xf32, #tpu.memory_space<vmem>>, vector<4x8x1xf32>
      tpu.vector_store %arg13[%c0_106, %c0_107, %c0_108], %174 {strides = array<i32>} : memref<4x8x1xf32, #tpu.memory_space<vmem>>, vector<4x8x1xf32>,
      %cst_109 = arith.constant 0.000000e+00 : f32
      %176 = vector.broadcast %cst_109 : f32 to vector<4x8x1xf32>
      %c0_110 = arith.constant 0 : index
      %c0_111 = arith.constant 0 : index
      %c0_112 = arith.constant 0 : index
      %177 = vector.load %arg14[%c0_110, %c0_111, %c0_112] : memref<4x8x1xf32, #tpu.memory_space<vmem>>, vector<4x8x1xf32>
      tpu.vector_store %arg14[%c0_110, %c0_111, %c0_112], %176 {strides = array<i32>} : memref<4x8x1xf32, #tpu.memory_space<vmem>>, vector<4x8x1xf32>,
      %cst_113 = arith.constant 0.000000e+00 : f32
      %178 = vector.broadcast %cst_113 : f32 to vector<4x8x8xf32>
      %c0_114 = arith.constant 0 : index
      %c0_115 = arith.constant 0 : index
      %c0_116 = arith.constant 0 : index
      %179 = vector.load %arg15[%c0_114, %c0_115, %c0_116] : memref<4x8x8xf32, #tpu.memory_space<vmem>>, vector<4x8x8xf32>
      tpu.vector_store %arg15[%c0_114, %c0_115, %c0_116], %178 {strides = array<i32>} : memref<4x8x8xf32, #tpu.memory_space<vmem>>, vector<4x8x8xf32>,
    } else {
    }
    %c0 = arith.constant 0 : index
    %c0_1 = arith.constant 0 : index
    %c0_2 = arith.constant 0 : index
    %c0_3 = arith.constant 0 : index
    %3 = vector.load %arg3[%c0, %c0_1, %c0_2, %c0_3] : memref<1x1x8x32xbf16, #tpu.memory_space<vmem>>, vector<1x1x8x32xbf16>
    %4 = vector.shape_cast %3 : vector<1x1x8x32xbf16> to vector<8x32xbf16>
    %c0_4 = arith.constant 0 : index
    %c0_5 = arith.constant 0 : index
    %c0_6 = arith.constant 0 : index
    %c0_7 = arith.constant 0 : index
    %5 = vector.load %arg4[%c0_4, %c0_5, %c0_6, %c0_7] : memref<1x1x8x32xbf16, #tpu.memory_space<vmem>>, vector<1x1x8x32xbf16>
    %6 = vector.shape_cast %5 : vector<1x1x8x32xbf16> to vector<8x32xbf16>
    %c0_8 = arith.constant 0 : index
    %c0_9 = arith.constant 0 : index
    %c0_10 = arith.constant 0 : index
    %c0_11 = arith.constant 0 : index
    %7 = vector.load %arg5[%c0_8, %c0_9, %c0_10, %c0_11] : memref<1x1x8x32xbf16, #tpu.memory_space<vmem>>, vector<1x1x8x32xbf16>
    %8 = vector.shape_cast %7 : vector<1x1x8x32xbf16> to vector<8x32xbf16>
    %c0_12 = arith.constant 0 : index
    %c0_13 = arith.constant 0 : index
    %c0_14 = arith.constant 0 : index
    %9 = vector.load %arg6[%c0_12, %c0_13, %c0_14] : memref<1x1x8xf32, #tpu.memory_space<vmem>>, vector<1x1x8xf32>
    %10 = vector.shape_cast %9 : vector<1x1x8xf32> to vector<1x8xf32>
    %11 = vector.extract_strided_slice %4 {offsets = [0, 0], sizes = [8, 8], strides = [1, 1]} : vector<8x32xbf16> to vector<8x8xbf16>
    %12 = vector.extract_strided_slice %6 {offsets = [0, 0], sizes = [8, 8], strides = [1, 1]} : vector<8x32xbf16> to vector<8x8xbf16>
    %13 = vector.extract_strided_slice %8 {offsets = [0, 0], sizes = [8, 8], strides = [1, 1]} : vector<8x32xbf16> to vector<8x8xbf16>
    %cst = arith.constant dense<0.000000e+00> : vector<8x8xf32>
    %14 = tpu.matmul %11, %12, %cst {dimension_numbers = #tpu.dot_dimension_numbers<[1], [1], [0], [0], [0, 0, 1, 0], [], []>} : vector<8x8xbf16>, vector<8x8xbf16>, vector<8x8xf32> -> vector<8x8xf32>
    %cst_15 = arith.constant 0.353553385 : f32
    %15 = vector.broadcast %cst_15 : f32 to vector<8x8xf32>
    %16 = arith.mulf %14, %15 : vector<8x8xf32>
    %17 = vector.broadcast %10 : vector<1x8xf32> to vector<8x8xf32>
    %18 = arith.addf %16, %17 : vector<8x8xf32>
    %c0_16 = arith.constant 0 : index
    %c0_17 = arith.constant 0 : index
    %c0_18 = arith.constant 0 : index
    %19 = vector.load %arg13[%c0_16, %c0_17, %c0_18] : memref<4x8x1xf32, #tpu.memory_space<vmem>>, vector<1x8x1xf32>
    %20 = vector.shape_cast %19 : vector<1x8x1xf32> to vector<8x1xf32>
    %cst_19 = arith.constant dense<0xFF800000> : vector<8xf32>
    %21 = vector.multi_reduction <maximumf>, %18, %cst_19 [1] : vector<8x8xf32> to vector<8xf32>
    %22 = vector.shape_cast %21 : vector<8xf32> to vector<8x1xf32>
    %23 = arith.maximumf %20, %22 : vector<8x1xf32>
    %24 = arith.subf %20, %23 : vector<8x1xf32>
    %25 = math.exp %24 : vector<8x1xf32>
    %26 = vector.broadcast %23 : vector<8x1xf32> to vector<8x8xf32>
    %27 = arith.subf %18, %26 : vector<8x8xf32>
    %28 = math.exp %27 : vector<8x8xf32>
    %c0_20 = arith.constant 0 : index
    %c0_21 = arith.constant 0 : index
    %c0_22 = arith.constant 0 : index
    %29 = vector.load %arg14[%c0_20, %c0_21, %c0_22] : memref<4x8x1xf32, #tpu.memory_space<vmem>>, vector<1x8x1xf32>
    %30 = vector.shape_cast %29 : vector<1x8x1xf32> to vector<8x1xf32>
    %31 = arith.mulf %25, %30 : vector<8x1xf32>
    %cst_23 = arith.constant dense<0.000000e+00> : vector<8xf32>
    %32 = vector.multi_reduction <add>, %28, %cst_23 [1] : vector<8x8xf32> to vector<8xf32>
    %33 = vector.shape_cast %32 : vector<8xf32> to vector<8x1xf32>
    %34 = arith.addf %31, %33 : vector<8x1xf32>
    %c0_24 = arith.constant 0 : index
    %c0_25 = arith.constant 0 : index
    %c0_26 = arith.constant 0 : index
    %35 = vector.load %arg14[%c0_24, %c0_25, %c0_26] : memref<4x8x1xf32, #tpu.memory_space<vmem>>, vector<1x8x1xf32>
    %36 = vector.shape_cast %35 : vector<1x8x1xf32> to vector<8x1xf32>
    %37 = vector.shape_cast %34 : vector<8x1xf32> to vector<1x8x1xf32>
    tpu.vector_store %arg14[%c0_24, %c0_25, %c0_26], %37 {strides = array<i32>} : memref<4x8x1xf32, #tpu.memory_space<vmem>>, vector<1x8x1xf32>,
    %c0_27 = arith.constant 0 : index
    %c0_28 = arith.constant 0 : index
    %c0_29 = arith.constant 0 : index
    %38 = vector.load %arg15[%c0_27, %c0_28, %c0_29] : memref<4x8x8xf32, #tpu.memory_space<vmem>>, vector<1x8x8xf32>
    %39 = vector.shape_cast %38 : vector<1x8x8xf32> to vector<8x8xf32>
    %40 = vector.broadcast %25 : vector<8x1xf32> to vector<8x8xf32>
    %41 = arith.mulf %40, %39 : vector<8x8xf32>
    %42 = arith.truncf %28 : vector<8x8xf32> to vector<8x8xbf16>
    %cst_30 = arith.constant dense<0.000000e+00> : vector<8x8xf32>
    %43 = tpu.matmul %42, %13, %cst_30 {dimension_numbers = #tpu.dot_dimension_numbers<[1], [0], [0], [1], [0, 0, 1, 1], [], []>} : vector<8x8xbf16>, vector<8x8xbf16>, vector<8x8xf32> -> vector<8x8xf32>
    %44 = arith.addf %41, %43 : vector<8x8xf32>
    %c0_31 = arith.constant 0 : index
    %c0_32 = arith.constant 0 : index
    %c0_33 = arith.constant 0 : index
    %45 = vector.load %arg15[%c0_31, %c0_32, %c0_33] : memref<4x8x8xf32, #tpu.memory_space<vmem>>, vector<1x8x8xf32>
    %46 = vector.shape_cast %45 : vector<1x8x8xf32> to vector<8x8xf32>
    %47 = vector.shape_cast %44 : vector<8x8xf32> to vector<1x8x8xf32>
    tpu.vector_store %arg15[%c0_31, %c0_32, %c0_33], %47 {strides = array<i32>} : memref<4x8x8xf32, #tpu.memory_space<vmem>>, vector<1x8x8xf32>,
    %c0_34 = arith.constant 0 : index
    %c0_35 = arith.constant 0 : index
    %c0_36 = arith.constant 0 : index
    %48 = vector.load %arg13[%c0_34, %c0_35, %c0_36] : memref<4x8x1xf32, #tpu.memory_space<vmem>>, vector<1x8x1xf32>
    %49 = vector.shape_cast %48 : vector<1x8x1xf32> to vector<8x1xf32>
    %50 = vector.shape_cast %23 : vector<8x1xf32> to vector<1x8x1xf32>
    tpu.vector_store %arg13[%c0_34, %c0_35, %c0_36], %50 {strides = array<i32>} : memref<4x8x1xf32, #tpu.memory_space<vmem>>, vector<1x8x1xf32>,
    %51 = vector.extract_strided_slice %4 {offsets = [0, 8], sizes = [8, 8], strides = [1, 1]} : vector<8x32xbf16> to vector<8x8xbf16>
    %52 = vector.extract_strided_slice %6 {offsets = [0, 8], sizes = [8, 8], strides = [1, 1]} : vector<8x32xbf16> to vector<8x8xbf16>
    %53 = vector.extract_strided_slice %8 {offsets = [0, 8], sizes = [8, 8], strides = [1, 1]} : vector<8x32xbf16> to vector<8x8xbf16>
    %cst_37 = arith.constant dense<0.000000e+00> : vector<8x8xf32>
    %54 = tpu.matmul %51, %52, %cst_37 {dimension_numbers = #tpu.dot_dimension_numbers<[1], [1], [0], [0], [0, 0, 1, 0], [], []>} : vector<8x8xbf16>, vector<8x8xbf16>, vector<8x8xf32> -> vector<8x8xf32>
    %cst_38 = arith.constant 0.353553385 : f32
    %55 = vector.broadcast %cst_38 : f32 to vector<8x8xf32>
    %56 = arith.mulf %54, %55 : vector<8x8xf32>
    %57 = vector.broadcast %10 : vector<1x8xf32> to vector<8x8xf32>
    %58 = arith.addf %56, %57 : vector<8x8xf32>
    %c1 = arith.constant 1 : index
    %c0_39 = arith.constant 0 : index
    %c0_40 = arith.constant 0 : index
    %59 = vector.load %arg13[%c1, %c0_39, %c0_40] : memref<4x8x1xf32, #tpu.memory_space<vmem>>, vector<1x8x1xf32>
    %60 = vector.shape_cast %59 : vector<1x8x1xf32> to vector<8x1xf32>
    %cst_41 = arith.constant dense<0xFF800000> : vector<8xf32>
    %61 = vector.multi_reduction <maximumf>, %58, %cst_41 [1] : vector<8x8xf32> to vector<8xf32>
    %62 = vector.shape_cast %61 : vector<8xf32> to vector<8x1xf32>
    %63 = arith.maximumf %60, %62 : vector<8x1xf32>
    %64 = arith.subf %60, %63 : vector<8x1xf32>
    %65 = math.exp %64 : vector<8x1xf32>
    %66 = vector.broadcast %63 : vector<8x1xf32> to vector<8x8xf32>
    %67 = arith.subf %58, %66 : vector<8x8xf32>
    %68 = math.exp %67 : vector<8x8xf32>
    %c1_42 = arith.constant 1 : index
    %c0_43 = arith.constant 0 : index
    %c0_44 = arith.constant 0 : index
    %69 = vector.load %arg14[%c1_42, %c0_43, %c0_44] : memref<4x8x1xf32, #tpu.memory_space<vmem>>, vector<1x8x1xf32>
    %70 = vector.shape_cast %69 : vector<1x8x1xf32> to vector<8x1xf32>
    %71 = arith.mulf %65, %70 : vector<8x1xf32>
    %cst_45 = arith.constant dense<0.000000e+00> : vector<8xf32>
    %72 = vector.multi_reduction <add>, %68, %cst_45 [1] : vector<8x8xf32> to vector<8xf32>
    %73 = vector.shape_cast %72 : vector<8xf32> to vector<8x1xf32>
    %74 = arith.addf %71, %73 : vector<8x1xf32>
    %c1_46 = arith.constant 1 : index
    %c0_47 = arith.constant 0 : index
    %c0_48 = arith.constant 0 : index
    %75 = vector.load %arg14[%c1_46, %c0_47, %c0_48] : memref<4x8x1xf32, #tpu.memory_space<vmem>>, vector<1x8x1xf32>
    %76 = vector.shape_cast %75 : vector<1x8x1xf32> to vector<8x1xf32>
    %77 = vector.shape_cast %74 : vector<8x1xf32> to vector<1x8x1xf32>
    tpu.vector_store %arg14[%c1_46, %c0_47, %c0_48], %77 {strides = array<i32>} : memref<4x8x1xf32, #tpu.memory_space<vmem>>, vector<1x8x1xf32>,
    %c1_49 = arith.constant 1 : index
    %c0_50 = arith.constant 0 : index
    %c0_51 = arith.constant 0 : index
    %78 = vector.load %arg15[%c1_49, %c0_50, %c0_51] : memref<4x8x8xf32, #tpu.memory_space<vmem>>, vector<1x8x8xf32>
    %79 = vector.shape_cast %78 : vector<1x8x8xf32> to vector<8x8xf32>
    %80 = vector.broadcast %65 : vector<8x1xf32> to vector<8x8xf32>
    %81 = arith.mulf %80, %79 : vector<8x8xf32>
    %82 = arith.truncf %68 : vector<8x8xf32> to vector<8x8xbf16>
    %cst_52 = arith.constant dense<0.000000e+00> : vector<8x8xf32>
    %83 = tpu.matmul %82, %53, %cst_52 {dimension_numbers = #tpu.dot_dimension_numbers<[1], [0], [0], [1], [0, 0, 1, 1], [], []>} : vector<8x8xbf16>, vector<8x8xbf16>, vector<8x8xf32> -> vector<8x8xf32>
    %84 = arith.addf %81, %83 : vector<8x8xf32>
    %c1_53 = arith.constant 1 : index
    %c0_54 = arith.constant 0 : index
    %c0_55 = arith.constant 0 : index
    %85 = vector.load %arg15[%c1_53, %c0_54, %c0_55] : memref<4x8x8xf32, #tpu.memory_space<vmem>>, vector<1x8x8xf32>
    %86 = vector.shape_cast %85 : vector<1x8x8xf32> to vector<8x8xf32>
    %87 = vector.shape_cast %84 : vector<8x8xf32> to vector<1x8x8xf32>
    tpu.vector_store %arg15[%c1_53, %c0_54, %c0_55], %87 {strides = array<i32>} : memref<4x8x8xf32, #tpu.memory_space<vmem>>, vector<1x8x8xf32>,
    %c1_56 = arith.constant 1 : index
    %c0_57 = arith.constant 0 : index
    %c0_58 = arith.constant 0 : index
    %88 = vector.load %arg13[%c1_56, %c0_57, %c0_58] : memref<4x8x1xf32, #tpu.memory_space<vmem>>, vector<1x8x1xf32>
    %89 = vector.shape_cast %88 : vector<1x8x1xf32> to vector<8x1xf32>
    %90 = vector.shape_cast %63 : vector<8x1xf32> to vector<1x8x1xf32>
    tpu.vector_store %arg13[%c1_56, %c0_57, %c0_58], %90 {strides = array<i32>} : memref<4x8x1xf32, #tpu.memory_space<vmem>>, vector<1x8x1xf32>,
    %91 = vector.extract_strided_slice %4 {offsets = [0, 16], sizes = [8, 8], strides = [1, 1]} : vector<8x32xbf16> to vector<8x8xbf16>
    %92 = vector.extract_strided_slice %6 {offsets = [0, 16], sizes = [8, 8], strides = [1, 1]} : vector<8x32xbf16> to vector<8x8xbf16>
    %93 = vector.extract_strided_slice %8 {offsets = [0, 16], sizes = [8, 8], strides = [1, 1]} : vector<8x32xbf16> to vector<8x8xbf16>
    %cst_59 = arith.constant dense<0.000000e+00> : vector<8x8xf32>
    %94 = tpu.matmul %91, %92, %cst_59 {dimension_numbers = #tpu.dot_dimension_numbers<[1], [1], [0], [0], [0, 0, 1, 0], [], []>} : vector<8x8xbf16>, vector<8x8xbf16>, vector<8x8xf32> -> vector<8x8xf32>
    %cst_60 = arith.constant 0.353553385 : f32
    %95 = vector.broadcast %cst_60 : f32 to vector<8x8xf32>
    %96 = arith.mulf %94, %95 : vector<8x8xf32>
    %97 = vector.broadcast %10 : vector<1x8xf32> to vector<8x8xf32>
    %98 = arith.addf %96, %97 : vector<8x8xf32>
    %c2 = arith.constant 2 : index
    %c0_61 = arith.constant 0 : index
    %c0_62 = arith.constant 0 : index
    %99 = vector.load %arg13[%c2, %c0_61, %c0_62] : memref<4x8x1xf32, #tpu.memory_space<vmem>>, vector<1x8x1xf32>
    %100 = vector.shape_cast %99 : vector<1x8x1xf32> to vector<8x1xf32>
    %cst_63 = arith.constant dense<0xFF800000> : vector<8xf32>
    %101 = vector.multi_reduction <maximumf>, %98, %cst_63 [1] : vector<8x8xf32> to vector<8xf32>
    %102 = vector.shape_cast %101 : vector<8xf32> to vector<8x1xf32>
    %103 = arith.maximumf %100, %102 : vector<8x1xf32>
    %104 = arith.subf %100, %103 : vector<8x1xf32>
    %105 = math.exp %104 : vector<8x1xf32>
    %106 = vector.broadcast %103 : vector<8x1xf32> to vector<8x8xf32>
    %107 = arith.subf %98, %106 : vector<8x8xf32>
    %108 = math.exp %107 : vector<8x8xf32>
    %c2_64 = arith.constant 2 : index
    %c0_65 = arith.constant 0 : index
    %c0_66 = arith.constant 0 : index
    %109 = vector.load %arg14[%c2_64, %c0_65, %c0_66] : memref<4x8x1xf32, #tpu.memory_space<vmem>>, vector<1x8x1xf32>
    %110 = vector.shape_cast %109 : vector<1x8x1xf32> to vector<8x1xf32>
    %111 = arith.mulf %105, %110 : vector<8x1xf32>
    %cst_67 = arith.constant dense<0.000000e+00> : vector<8xf32>
    %112 = vector.multi_reduction <add>, %108, %cst_67 [1] : vector<8x8xf32> to vector<8xf32>
    %113 = vector.shape_cast %112 : vector<8xf32> to vector<8x1xf32>
    %114 = arith.addf %111, %113 : vector<8x1xf32>
    %c2_68 = arith.constant 2 : index
    %c0_69 = arith.constant 0 : index
    %c0_70 = arith.constant 0 : index
    %115 = vector.load %arg14[%c2_68, %c0_69, %c0_70] : memref<4x8x1xf32, #tpu.memory_space<vmem>>, vector<1x8x1xf32>
    %116 = vector.shape_cast %115 : vector<1x8x1xf32> to vector<8x1xf32>
    %117 = vector.shape_cast %114 : vector<8x1xf32> to vector<1x8x1xf32>
    tpu.vector_store %arg14[%c2_68, %c0_69, %c0_70], %117 {strides = array<i32>} : memref<4x8x1xf32, #tpu.memory_space<vmem>>, vector<1x8x1xf32>,
    %c2_71 = arith.constant 2 : index
    %c0_72 = arith.constant 0 : index
    %c0_73 = arith.constant 0 : index
    %118 = vector.load %arg15[%c2_71, %c0_72, %c0_73] : memref<4x8x8xf32, #tpu.memory_space<vmem>>, vector<1x8x8xf32>
    %119 = vector.shape_cast %118 : vector<1x8x8xf32> to vector<8x8xf32>
    %120 = vector.broadcast %105 : vector<8x1xf32> to vector<8x8xf32>
    %121 = arith.mulf %120, %119 : vector<8x8xf32>
    %122 = arith.truncf %108 : vector<8x8xf32> to vector<8x8xbf16>
    %cst_74 = arith.constant dense<0.000000e+00> : vector<8x8xf32>
    %123 = tpu.matmul %122, %93, %cst_74 {dimension_numbers = #tpu.dot_dimension_numbers<[1], [0], [0], [1], [0, 0, 1, 1], [], []>} : vector<8x8xbf16>, vector<8x8xbf16>, vector<8x8xf32> -> vector<8x8xf32>
    %124 = arith.addf %121, %123 : vector<8x8xf32>
    %c2_75 = arith.constant 2 : index
    %c0_76 = arith.constant 0 : index
    %c0_77 = arith.constant 0 : index
    %125 = vector.load %arg15[%c2_75, %c0_76, %c0_77] : memref<4x8x8xf32, #tpu.memory_space<vmem>>, vector<1x8x8xf32>
    %126 = vector.shape_cast %125 : vector<1x8x8xf32> to vector<8x8xf32>
    %127 = vector.shape_cast %124 : vector<8x8xf32> to vector<1x8x8xf32>
    tpu.vector_store %arg15[%c2_75, %c0_76, %c0_77], %127 {strides = array<i32>} : memref<4x8x8xf32, #tpu.memory_space<vmem>>, vector<1x8x8xf32>,
    %c2_78 = arith.constant 2 : index
    %c0_79 = arith.constant 0 : index
    %c0_80 = arith.constant 0 : index
    %128 = vector.load %arg13[%c2_78, %c0_79, %c0_80] : memref<4x8x1xf32, #tpu.memory_space<vmem>>, vector<1x8x1xf32>
    %129 = vector.shape_cast %128 : vector<1x8x1xf32> to vector<8x1xf32>
    %130 = vector.shape_cast %103 : vector<8x1xf32> to vector<1x8x1xf32>
    tpu.vector_store %arg13[%c2_78, %c0_79, %c0_80], %130 {strides = array<i32>} : memref<4x8x1xf32, #tpu.memory_space<vmem>>, vector<1x8x1xf32>,
    %131 = vector.extract_strided_slice %4 {offsets = [0, 24], sizes = [8, 8], strides = [1, 1]} : vector<8x32xbf16> to vector<8x8xbf16>
    %132 = vector.extract_strided_slice %6 {offsets = [0, 24], sizes = [8, 8], strides = [1, 1]} : vector<8x32xbf16> to vector<8x8xbf16>
    %133 = vector.extract_strided_slice %8 {offsets = [0, 24], sizes = [8, 8], strides = [1, 1]} : vector<8x32xbf16> to vector<8x8xbf16>
    %cst_81 = arith.constant dense<0.000000e+00> : vector<8x8xf32>
    %134 = tpu.matmul %131, %132, %cst_81 {dimension_numbers = #tpu.dot_dimension_numbers<[1], [1], [0], [0], [0, 0, 1, 0], [], []>} : vector<8x8xbf16>, vector<8x8xbf16>, vector<8x8xf32> -> vector<8x8xf32>
    %cst_82 = arith.constant 0.353553385 : f32
    %135 = vector.broadcast %cst_82 : f32 to vector<8x8xf32>
    %136 = arith.mulf %134, %135 : vector<8x8xf32>
    %137 = vector.broadcast %10 : vector<1x8xf32> to vector<8x8xf32>
    %138 = arith.addf %136, %137 : vector<8x8xf32>
    %c3 = arith.constant 3 : index
    %c0_83 = arith.constant 0 : index
    %c0_84 = arith.constant 0 : index
    %139 = vector.load %arg13[%c3, %c0_83, %c0_84] : memref<4x8x1xf32, #tpu.memory_space<vmem>>, vector<1x8x1xf32>
    %140 = vector.shape_cast %139 : vector<1x8x1xf32> to vector<8x1xf32>
    %cst_85 = arith.constant dense<0xFF800000> : vector<8xf32>
    %141 = vector.multi_reduction <maximumf>, %138, %cst_85 [1] : vector<8x8xf32> to vector<8xf32>
    %142 = vector.shape_cast %141 : vector<8xf32> to vector<8x1xf32>
    %143 = arith.maximumf %140, %142 : vector<8x1xf32>
    %144 = arith.subf %140, %143 : vector<8x1xf32>
    %145 = math.exp %144 : vector<8x1xf32>
    %146 = vector.broadcast %143 : vector<8x1xf32> to vector<8x8xf32>
    %147 = arith.subf %138, %146 : vector<8x8xf32>
    %148 = math.exp %147 : vector<8x8xf32>
    %c3_86 = arith.constant 3 : index
    %c0_87 = arith.constant 0 : index
    %c0_88 = arith.constant 0 : index
    %149 = vector.load %arg14[%c3_86, %c0_87, %c0_88] : memref<4x8x1xf32, #tpu.memory_space<vmem>>, vector<1x8x1xf32>
    %150 = vector.shape_cast %149 : vector<1x8x1xf32> to vector<8x1xf32>
    %151 = arith.mulf %145, %150 : vector<8x1xf32>
    %cst_89 = arith.constant dense<0.000000e+00> : vector<8xf32>
    %152 = vector.multi_reduction <add>, %148, %cst_89 [1] : vector<8x8xf32> to vector<8xf32>
    %153 = vector.shape_cast %152 : vector<8xf32> to vector<8x1xf32>
    %154 = arith.addf %151, %153 : vector<8x1xf32>
    %c3_90 = arith.constant 3 : index
    %c0_91 = arith.constant 0 : index
    %c0_92 = arith.constant 0 : index
    %155 = vector.load %arg14[%c3_90, %c0_91, %c0_92] : memref<4x8x1xf32, #tpu.memory_space<vmem>>, vector<1x8x1xf32>
    %156 = vector.shape_cast %155 : vector<1x8x1xf32> to vector<8x1xf32>
    %157 = vector.shape_cast %154 : vector<8x1xf32> to vector<1x8x1xf32>
    tpu.vector_store %arg14[%c3_90, %c0_91, %c0_92], %157 {strides = array<i32>} : memref<4x8x1xf32, #tpu.memory_space<vmem>>, vector<1x8x1xf32>,
    %c3_93 = arith.constant 3 : index
    %c0_94 = arith.constant 0 : index
    %c0_95 = arith.constant 0 : index
    %158 = vector.load %arg15[%c3_93, %c0_94, %c0_95] : memref<4x8x8xf32, #tpu.memory_space<vmem>>, vector<1x8x8xf32>
    %159 = vector.shape_cast %158 : vector<1x8x8xf32> to vector<8x8xf32>
    %160 = vector.broadcast %145 : vector<8x1xf32> to vector<8x8xf32>
    %161 = arith.mulf %160, %159 : vector<8x8xf32>
    %162 = arith.truncf %148 : vector<8x8xf32> to vector<8x8xbf16>
    %cst_96 = arith.constant dense<0.000000e+00> : vector<8x8xf32>
    %163 = tpu.matmul %162, %133, %cst_96 {dimension_numbers = #tpu.dot_dimension_numbers<[1], [0], [0], [1], [0, 0, 1, 1], [], []>} : vector<8x8xbf16>, vector<8x8xbf16>, vector<8x8xf32> -> vector<8x8xf32>
    %164 = arith.addf %161, %163 : vector<8x8xf32>
    %c3_97 = arith.constant 3 : index
    %c0_98 = arith.constant 0 : index
    %c0_99 = arith.constant 0 : index
    %165 = vector.load %arg15[%c3_97, %c0_98, %c0_99] : memref<4x8x8xf32, #tpu.memory_space<vmem>>, vector<1x8x8xf32>
    %166 = vector.shape_cast %165 : vector<1x8x8xf32> to vector<8x8xf32>
    %167 = vector.shape_cast %164 : vector<8x8xf32> to vector<1x8x8xf32>
    tpu.vector_store %arg15[%c3_97, %c0_98, %c0_99], %167 {strides = array<i32>} : memref<4x8x8xf32, #tpu.memory_space<vmem>>, vector<1x8x8xf32>,
    %c3_100 = arith.constant 3 : index
    %c0_101 = arith.constant 0 : index
    %c0_102 = arith.constant 0 : index
    %168 = vector.load %arg13[%c3_100, %c0_101, %c0_102] : memref<4x8x1xf32, #tpu.memory_space<vmem>>, vector<1x8x1xf32>
    %169 = vector.shape_cast %168 : vector<1x8x1xf32> to vector<8x1xf32>
    %170 = vector.shape_cast %143 : vector<8x1xf32> to vector<1x8x1xf32>
    tpu.vector_store %arg13[%c3_100, %c0_101, %c0_102], %170 {strides = array<i32>} : memref<4x8x1xf32, #tpu.memory_space<vmem>>, vector<1x8x1xf32>,
    %c0_i32_103 = arith.constant 0 : i32
    %171 = arith.cmpi eq, %arg2, %c0_i32_103 : i32
    %172 = arith.extui %171 : i1 to i32
    %c0_i32_104 = arith.constant 0 : i32
    %173 = arith.cmpi ne, %172, %c0_i32_104 : i32
    scf.if %173 {
      %cst_105 = arith.constant 0.000000e+00 : f32
      %174 = vector.broadcast %cst_105 : f32 to vector<8x32xf32>
      %c0_106 = arith.constant 0 : index
      %c0_107 = arith.constant 0 : index
      %c0_108 = arith.constant 0 : index
      %175 = vector.load %arg14[%c0_106, %c0_107, %c0_108] : memref<4x8x1xf32, #tpu.memory_space<vmem>>, vector<1x8x1xf32>
      %176 = vector.shape_cast %175 : vector<1x8x1xf32> to vector<8x1xf32>
      %177 = tpu.reciprocal %176 {approx = true} : vector<8x1xf32> -> vector<8x1xf32>
      %c0_109 = arith.constant 0 : index
      %c0_110 = arith.constant 0 : index
      %c0_111 = arith.constant 0 : index
      %178 = vector.load %arg15[%c0_109, %c0_110, %c0_111] : memref<4x8x8xf32, #tpu.memory_space<vmem>>, vector<1x8x8xf32>
      %179 = vector.shape_cast %178 : vector<1x8x8xf32> to vector<8x8xf32>
      %180 = vector.broadcast %177 : vector<8x1xf32> to vector<8x8xf32>
      %181 = arith.mulf %179, %180 : vector<8x8xf32>
      %182 = arith.truncf %181 : vector<8x8xf32> to vector<8x8xbf16>
      %c0_112 = arith.constant 0 : index
      %c0_113 = arith.constant 0 : index
      %183 = vector.load %arg8[%c0_112, %c0_113] : memref<32x32xbf16, #tpu.memory_space<vmem>>, vector<8x32xbf16>
      %cst_114 = arith.constant dense<0.000000e+00> : vector<8x32xf32>
      %184 = tpu.matmul %182, %183, %cst_114 {dimension_numbers = #tpu.dot_dimension_numbers<[1], [0], [0], [1], [0, 0, 1, 1], [], []>} : vector<8x8xbf16>, vector<8x32xbf16>, vector<8x32xf32> -> vector<8x32xf32>
      %185 = arith.addf %174, %184 : vector<8x32xf32>
      %c1_115 = arith.constant 1 : index
      %c0_116 = arith.constant 0 : index
      %c0_117 = arith.constant 0 : index
      %186 = vector.load %arg14[%c1_115, %c0_116, %c0_117] : memref<4x8x1xf32, #tpu.memory_space<vmem>>, vector<1x8x1xf32>
      %187 = vector.shape_cast %186 : vector<1x8x1xf32> to vector<8x1xf32>
      %188 = tpu.reciprocal %187 {approx = true} : vector<8x1xf32> -> vector<8x1xf32>
      %c1_118 = arith.constant 1 : index
      %c0_119 = arith.constant 0 : index
      %c0_120 = arith.constant 0 : index
      %189 = vector.load %arg15[%c1_118, %c0_119, %c0_120] : memref<4x8x8xf32, #tpu.memory_space<vmem>>, vector<1x8x8xf32>
      %190 = vector.shape_cast %189 : vector<1x8x8xf32> to vector<8x8xf32>
      %191 = vector.broadcast %188 : vector<8x1xf32> to vector<8x8xf32>
      %192 = arith.mulf %190, %191 : vector<8x8xf32>
      %193 = arith.truncf %192 : vector<8x8xf32> to vector<8x8xbf16>
      %c8 = arith.constant 8 : index
      %c0_121 = arith.constant 0 : index
      %194 = vector.load %arg8[%c8, %c0_121] : memref<32x32xbf16, #tpu.memory_space<vmem>>, vector<8x32xbf16>
      %cst_122 = arith.constant dense<0.000000e+00> : vector<8x32xf32>
      %195 = tpu.matmul %193, %194, %cst_122 {dimension_numbers = #tpu.dot_dimension_numbers<[1], [0], [0], [1], [0, 0, 1, 1], [], []>} : vector<8x8xbf16>, vector<8x32xbf16>, vector<8x32xf32> -> vector<8x32xf32>
      %196 = arith.addf %185, %195 : vector<8x32xf32>
      %c2_123 = arith.constant 2 : index
      %c0_124 = arith.constant 0 : index
      %c0_125 = arith.constant 0 : index
      %197 = vector.load %arg14[%c2_123, %c0_124, %c0_125] : memref<4x8x1xf32, #tpu.memory_space<vmem>>, vector<1x8x1xf32>
      %198 = vector.shape_cast %197 : vector<1x8x1xf32> to vector<8x1xf32>
      %199 = tpu.reciprocal %198 {approx = true} : vector<8x1xf32> -> vector<8x1xf32>
      %c2_126 = arith.constant 2 : index
      %c0_127 = arith.constant 0 : index
      %c0_128 = arith.constant 0 : index
      %200 = vector.load %arg15[%c2_126, %c0_127, %c0_128] : memref<4x8x8xf32, #tpu.memory_space<vmem>>, vector<1x8x8xf32>
      %201 = vector.shape_cast %200 : vector<1x8x8xf32> to vector<8x8xf32>
      %202 = vector.broadcast %199 : vector<8x1xf32> to vector<8x8xf32>
      %203 = arith.mulf %201, %202 : vector<8x8xf32>
      %204 = arith.truncf %203 : vector<8x8xf32> to vector<8x8xbf16>
      %c16 = arith.constant 16 : index
      %c0_129 = arith.constant 0 : index
      %205 = vector.load %arg8[%c16, %c0_129] : memref<32x32xbf16, #tpu.memory_space<vmem>>, vector<8x32xbf16>
      %cst_130 = arith.constant dense<0.000000e+00> : vector<8x32xf32>
      %206 = tpu.matmul %204, %205, %cst_130 {dimension_numbers = #tpu.dot_dimension_numbers<[1], [0], [0], [1], [0, 0, 1, 1], [], []>} : vector<8x8xbf16>, vector<8x32xbf16>, vector<8x32xf32> -> vector<8x32xf32>
      %207 = arith.addf %196, %206 : vector<8x32xf32>
      %c3_131 = arith.constant 3 : index
      %c0_132 = arith.constant 0 : index
      %c0_133 = arith.constant 0 : index
      %208 = vector.load %arg14[%c3_131, %c0_132, %c0_133] : memref<4x8x1xf32, #tpu.memory_space<vmem>>, vector<1x8x1xf32>
      %209 = vector.shape_cast %208 : vector<1x8x1xf32> to vector<8x1xf32>
      %210 = tpu.reciprocal %209 {approx = true} : vector<8x1xf32> -> vector<8x1xf32>
      %c3_134 = arith.constant 3 : index
      %c0_135 = arith.constant 0 : index
      %c0_136 = arith.constant 0 : index
      %211 = vector.load %arg15[%c3_134, %c0_135, %c0_136] : memref<4x8x8xf32, #tpu.memory_space<vmem>>, vector<1x8x8xf32>
      %212 = vector.shape_cast %211 : vector<1x8x8xf32> to vector<8x8xf32>
      %213 = vector.broadcast %210 : vector<8x1xf32> to vector<8x8xf32>
      %214 = arith.mulf %212, %213 : vector<8x8xf32>
      %215 = arith.truncf %214 : vector<8x8xf32> to vector<8x8xbf16>
      %c24 = arith.constant 24 : index
      %c0_137 = arith.constant 0 : index
      %216 = vector.load %arg8[%c24, %c0_137] : memref<32x32xbf16, #tpu.memory_space<vmem>>, vector<8x32xbf16>
      %cst_138 = arith.constant dense<0.000000e+00> : vector<8x32xf32>
      %217 = tpu.matmul %215, %216, %cst_138 {dimension_numbers = #tpu.dot_dimension_numbers<[1], [0], [0], [1], [0, 0, 1, 1], [], []>} : vector<8x8xbf16>, vector<8x32xbf16>, vector<8x32xf32> -> vector<8x32xf32>
      %218 = arith.addf %207, %217 : vector<8x32xf32>
      %c0_139 = arith.constant 0 : index
      %c0_140 = arith.constant 0 : index
      %c0_141 = arith.constant 0 : index
      %219 = vector.load %arg7[%c0_139, %c0_140, %c0_141] : memref<1x8x32xbf16, #tpu.memory_space<vmem>>, vector<1x8x32xbf16>
      %220 = vector.shape_cast %219 : vector<1x8x32xbf16> to vector<8x32xbf16>
      %221 = arith.extf %220 : vector<8x32xbf16> to vector<8x32xf32>
      %222 = arith.addf %221, %218 : vector<8x32xf32>
      %c0_142 = arith.constant 0 : index
      %c0_143 = arith.constant 0 : index
      %223 = vector.load %arg9[%c0_142, %c0_143] : memref<1x32xf32, #tpu.memory_space<vmem>>, vector<1x32xf32>
      %224 = vector.broadcast %223 : vector<1x32xf32> to vector<8x32xf32>
      %225 = arith.addf %222, %224 : vector<8x32xf32>
      %cst_144 = arith.constant dense<0.000000e+00> : vector<8xf32>
      %226 = vector.multi_reduction <add>, %225, %cst_144 [1] : vector<8x32xf32> to vector<8xf32>
      %227 = vector.shape_cast %226 : vector<8xf32> to vector<8x1xf32>
      %cst_145 = arith.constant 3.200000e+01 : f32
      %228 = vector.broadcast %cst_145 : f32 to vector<8x1xf32>
      %229 = arith.divf %227, %228 : vector<8x1xf32>
      %230 = vector.broadcast %229 : vector<8x1xf32> to vector<8x32xf32>
      %231 = arith.subf %225, %230 : vector<8x32xf32>
      %232 = arith.mulf %231, %231 : vector<8x32xf32>
      %cst_146 = arith.constant dense<0.000000e+00> : vector<8xf32>
      %233 = vector.multi_reduction <add>, %232, %cst_146 [1] : vector<8x32xf32> to vector<8xf32>
      %234 = vector.shape_cast %233 : vector<8xf32> to vector<8x1xf32>
      %cst_147 = arith.constant 3.200000e+01 : f32
      %235 = vector.broadcast %cst_147 : f32 to vector<8x1xf32>
      %236 = arith.divf %234, %235 : vector<8x1xf32>
      %237 = vector.broadcast %229 : vector<8x1xf32> to vector<8x32xf32>
      %238 = arith.subf %225, %237 : vector<8x32xf32>
      %cst_148 = arith.constant 9.99999974E-6 : f32
      %239 = vector.broadcast %cst_148 : f32 to vector<8x1xf32>
      %240 = arith.addf %236, %239 : vector<8x1xf32>
      %241 = math.rsqrt %240 : vector<8x1xf32>
      %242 = vector.broadcast %241 : vector<8x1xf32> to vector<8x32xf32>
      %243 = arith.mulf %238, %242 : vector<8x32xf32>
      %c0_149 = arith.constant 0 : index
      %c0_150 = arith.constant 0 : index
      %244 = vector.load %arg10[%c0_149, %c0_150] : memref<1x32xf32, #tpu.memory_space<vmem>>, vector<1x32xf32>
      %245 = vector.broadcast %244 : vector<1x32xf32> to vector<8x32xf32>
      %246 = arith.mulf %243, %245 : vector<8x32xf32>
      %c0_151 = arith.constant 0 : index
      %c0_152 = arith.constant 0 : index
      %247 = vector.load %arg11[%c0_151, %c0_152] : memref<1x32xf32, #tpu.memory_space<vmem>>, vector<1x32xf32>
      %248 = vector.broadcast %247 : vector<1x32xf32> to vector<8x32xf32>
      %249 = arith.addf %246, %248 : vector<8x32xf32>
      %250 = arith.truncf %249 : vector<8x32xf32> to vector<8x32xbf16>
      %c0_153 = arith.constant 0 : index
      %c0_154 = arith.constant 0 : index
      %c0_155 = arith.constant 0 : index
      %251 = vector.load %arg12[%c0_153, %c0_154, %c0_155] : memref<1x8x32xbf16, #tpu.memory_space<vmem>>, vector<1x8x32xbf16>
      %252 = vector.shape_cast %251 : vector<1x8x32xbf16> to vector<8x32xbf16>
      %253 = vector.shape_cast %250 : vector<8x32xbf16> to vector<1x8x32xbf16>
      tpu.vector_store %arg12[%c0_153, %c0_154, %c0_155], %253 {strides = array<i32>} : memref<1x8x32xbf16, #tpu.memory_space<vmem>>, vector<1x8x32xbf16>,
    } else {
    }
    return
  }
  func.func @transform_0(%arg0: i32, %arg1: i32, %arg2: i32) -> (i32, i32, i32, i32) {
    %c0_i32 = arith.constant 0 : i32
    %c0_i32_0 = arith.constant 0 : i32
    %c0_i32_1 = arith.constant 0 : i32
    return %c0_i32, %arg0, %arg1, %c0_i32_0 : i32, i32, i32, i32
  }
  func.func @transform_1(%arg0: i32, %arg1: i32, %arg2: i32) -> (i32, i32, i32, i32) {
    %c0_i32 = arith.constant 0 : i32
    %c0_i32_0 = arith.constant 0 : i32
    %c0_i32_1 = arith.constant 0 : i32
    return %c0_i32, %arg0, %arg2, %c0_i32_0 : i32, i32, i32, i32
  }
  func.func @transform_2(%arg0: i32, %arg1: i32, %arg2: i32) -> (i32, i32, i32, i32) {
    %c1_i32 = arith.constant 1 : i32
    %c0_i32 = arith.constant 0 : i32
    %c0_i32_0 = arith.constant 0 : i32
    return %c1_i32, %arg0, %arg2, %c0_i32 : i32, i32, i32, i32
  }
  func.func @transform_3(%arg0: i32, %arg1: i32, %arg2: i32) -> (i32, i32, i32) {
    %c0_i32 = arith.constant 0 : i32
    %c0_i32_0 = arith.constant 0 : i32
    return %arg0, %c0_i32, %arg2 : i32, i32, i32
  }
  func.func @transform_4(%arg0: i32, %arg1: i32, %arg2: i32) -> (i32, i32, i32) {
    %c0_i32 = arith.constant 0 : i32
    %c0_i32_0 = arith.constant 0 : i32
    return %arg0, %arg1, %c0_i32 : i32, i32, i32
  }
  func.func @transform_5(%arg0: i32, %arg1: i32, %arg2: i32) -> (i32, i32) {
    %c0_i32 = arith.constant 0 : i32
    %c0_i32_0 = arith.constant 0 : i32
    %c0_i32_1 = arith.constant 0 : i32
    return %c0_i32, %c0_i32_0 : i32, i32
  }
  func.func @transform_6(%arg0: i32, %arg1: i32, %arg2: i32) -> (i32, i32) {
    %c0_i32 = arith.constant 0 : i32
    %c0_i32_0 = arith.constant 0 : i32
    %c0_i32_1 = arith.constant 0 : i32
    return %c0_i32, %c0_i32_0 : i32, i32
  }
  func.func @transform_7(%arg0: i32, %arg1: i32, %arg2: i32) -> (i32, i32) {
    %c0_i32 = arith.constant 0 : i32
    %c0_i32_0 = arith.constant 0 : i32
    %c0_i32_1 = arith.constant 0 : i32
    return %c0_i32, %c0_i32_0 : i32, i32
  }
  func.func @transform_8(%arg0: i32, %arg1: i32, %arg2: i32) -> (i32, i32) {
    %c0_i32 = arith.constant 0 : i32
    %c0_i32_0 = arith.constant 0 : i32
    %c0_i32_1 = arith.constant 0 : i32
    return %c0_i32, %c0_i32_0 : i32, i32
  }
  func.func @transform_9(%arg0: i32, %arg1: i32, %arg2: i32) -> (i32, i32, i32) {
    %c0_i32 = arith.constant 0 : i32
    %c0_i32_0 = arith.constant 0 : i32
    return %arg0, %arg1, %c0_i32 : i32, i32, i32
  }
}

</mosaic_0001>

<bundles_post_ra>
// kernel: transformer_forward.19
= control target key start
LH: loop header
LB: loop body
LE: loop exit
PB: predicated region body
PF: predicated region fallthrough
CT: control target
= control target key end

     0   :  { %v340_v0 = vmov 0.0   ;;  %vm341_vm0 = vmmov 0   ;;  %vm45_vm1 = vcmask 261120   ;;  %vm98_vm2 = vcmask 257024   ;;  %s419_s1 = inlined_call_operand.vmem [shape: bf16[3,32,32], index: 1, kind: input, shape index: {}]   ;;  %s420_s0 = inlined_call_operand.vmem [shape: bf16[16,32], index: 0, kind: input, shape index: {}]   ;;  %s421_s2 = inlined_call_operand.vmem [shape: f32[3,1,32], index: 2, kind: input, shape index: {}]   ;;  %s422_s3 = inlined_call_operand.vmem [shape: bf16[3,16,32], index: 3, kind: output, shape index: {}]  }
   0x1   :  { %307 = vmatprep.subr.bf16.mxu0 %v340_v0  ;;  %v333_v1 = vld [vmem:[%s419_s1] sm:$0xff]   ;;  %315 = vmatprep.subr.bf16.mxu1 %v340_v0  ;;  %v334_v2 = vld [vmem:[%s419_s1 + $0x8] sm:$0xff]   ;;  %v335_v3 = vld [vmem:[%s419_s1 + $0x10] sm:$0xff]  }
   0x2   :  { %311 = vmatprep.mubr.msk.bf16.mxu0 %vm341_vm0, %v340_v0  ;;  %319 = vmatprep.mubr.msk.bf16.mxu1 %vm341_vm0, %v340_v0  ;;  %v336_v4 = vld [vmem:[%s420_s0] sm:$0xff]   ;;  %v338_v5 = vld [vmem:[%s419_s1 + $0x18] sm:$0xff]   ;;  %v339_v7 = vld [vmem:[%s419_s1 + $0x28] sm:$0xff]  }
   0x3   :  { %308 = vmatpush3.bf16.msra.mxu0 %v333_v1  ;;  %316 = vmatpush3.bf16.msra.mxu1 %v335_v3  ;;  %v337_v6 = vld [vmem:[%s419_s1 + $0x20] sm:$0xff]  }
   0x4   :  { %309 = vmatprep.subr.bf16.mxu0 %v340_v0  ;;  %317 = vmatprep.subr.bf16.mxu1 %v340_v0  ;;  %v259_v8 = vld [vmem:[%s421_s2] ss:$0 sm:$0xff]  ;;  %v271_v10 = vld [vmem:[%s421_s2 + $0x1] ss:$0 sm:$0xff]  ;;  %v284_v25 = vld [vmem:[%s421_s2 + $0x2] ss:$0 sm:$0xff] }
   0x7   :  { %310 = vmatpush3.bf16.msra.mxu0 %v334_v2  ;;  %318 = vmatpush3.bf16.msra.mxu1 %v338_v5 }
   0x8   :  { %323 = vmatprep.subr.bf16.mxu0 %v340_v0 }
   0xa   :  { %312 = vmatmul.mubr.msk.bf16.vlgmr.msra.gmra.mrb[0].mxu0 %vm45_vm1, %v336_v4  ;;  %320 = vmatmul.mubr.msk.bf16.vlgmr.msra.gmra.mrb[0].mxu1 %vm45_vm1, %v336_v4 }
   0xb   :  { %324 = vmatpush3.bf16.msra.mxu0 %v337_v6  ;;  %327 = vmatprep.mubr.msk.bf16.mxu0 %vm341_vm0, %v340_v0 }
   0xc   :  { %325 = vmatprep.subr.bf16.mxu0 %v340_v0 }
   0xf   :  { %326 = vmatpush3.bf16.msra.mxu0 %v339_v7 }
  0x12   :  { %328 = vmatmul.mubr.msk.bf16.vlgmr.msra.gmra.mrb[4].mxu0 %vm45_vm1, %v336_v4 }
  0xdd   :  { %v83_v9 = vpop.f32.mrb[0].mxu0  ;;  %v160_v14 = vpop.f32.mrb[0].mxu1 }
  0xde   :  { %v84_v11 = vadd.f32 %v259_v8, %v83_v9  ;;  %v313_v12 = vpop.f32.mrb[1].mxu0  ;;  %v161_v18 = vadd.f32 %v271_v10, %v160_v14  ;;  %v321_v19 = vpop.f32.mrb[1].mxu1 }
  0xdf   :  { %v86_v13 = vpop.f32.mrb[2].mxu0  ;;  %v163_v20 = vpop.f32.mrb[2].mxu1 }
  0xe0   :  { %v292_v15 = vpack.c.bf16 %v84_v11, %v84_v11  ;;  %v87_v16 = vadd.f32 %v259_v8, %v86_v13  ;;  %v314_v17 = vpop.f32.mrb[3].mxu0  ;;  %v294_v22 = vpack.c.bf16 %v161_v18, %v161_v18  ;;  %v164_v23 = vadd.f32 %v271_v10, %v163_v20  ;;  %v322_v24 = vpop.f32.mrb[3].mxu1 }
  0xe2   :  { %99 = vst.msk [vmem:[%s422_s3] sm:$0xf] %vm98_vm2, %v292_v15  ;;  %v293_v21 = vpack.c.bf16 %v87_v16, %v87_v16  ;;  %277 = vst.msk [vmem:[%s422_s3 + $0x8] sm:$0xf] %vm98_vm2, %v294_v22  ;;  %v295_v26 = vpack.c.bf16 %v164_v23, %v164_v23 }
  0xe4   :  { %100 = vst.msk [vmem:[%s422_s3 + $0x4] sm:$0xf] %vm98_vm2, %v293_v21  ;;  %278 = vst.msk [vmem:[%s422_s3 + $0xc] sm:$0xf] %vm98_vm2, %v295_v26 }
  0xe5   :  { %v237_v27 = vpop.f32.mrb[4].mxu0 }
  0xe6   :  { %v238_v28 = vadd.f32 %v284_v25, %v237_v27  ;;  %v329_v29 = vpop.f32.mrb[5].mxu0 }
  0xe7   :  { %v240_v30 = vpop.f32.mrb[6].mxu0 }
  0xe8   :  { %v296_v31 = vpack.c.bf16 %v238_v28, %v238_v28  ;;  %v241_v32 = vadd.f32 %v284_v25, %v240_v30  ;;  %v330_v33 = vpop.f32.mrb[7].mxu0 }
  0xea   :  { %290 = vst.msk [vmem:[%s422_s3 + $0x10] sm:$0xf] %vm98_vm2, %v296_v31  ;;  %v297_v34 = vpack.c.bf16 %v241_v32, %v241_v32 }
  0xec   :  { %291 = vst.msk [vmem:[%s422_s3 + $0x14] sm:$0xf] %vm98_vm2, %v297_v34 }

// kernel: transformer_forward.21
= control target key start
LH: loop header
LB: loop body
LE: loop exit
PB: predicated region body
PF: predicated region fallthrough
CT: control target
= control target key end

     0   :  { %vm31_vm0 = vcmask 261120   ;;  %v332_v0 = vmov 0.0   ;;  %vm333_vm1 = vmmov 0   ;;  %vm146_vm2 = vcmask 523264   ;;  %s422_s1 = inlined_call_operand.vmem [shape: bf16[32,64], index: 1, kind: input, shape index: {}]   ;;  %s423_s0 = inlined_call_operand.vmem [shape: bf16[16,32], index: 0, kind: input, shape index: {}]   ;;  %s424_s3 = inlined_call_operand.vmem [shape: bf16[64,32], index: 3, kind: input, shape index: {}]   ;;  %s425_s2 = inlined_call_operand.vmem [shape: f32[1,64], index: 2, kind: input, shape index: {}]   ;;  %s426_s4 = inlined_call_operand.vmem [shape: f32[1,32], index: 4, kind: input, shape index: {}]   ;;  %s427_s5 = inlined_call_operand.vmem [shape: f32[1,32], index: 5, kind: input, shape index: {}]   ;;  %s428_s6 = inlined_call_operand.vmem [shape: f32[1,32], index: 6, kind: input, shape index: {}]   ;;  %s429_s7 = inlined_call_operand.vmem [shape: bf16[16,32], index: 7, kind: output, shape index: {}]  }
   0x1   :  { %298 = vmatprep.subr.bf16.mxu0 %v332_v0  ;;  %v320_v1 = vld [vmem:[%s422_s1] sm:$0xff]   ;;  %302 = vmatprep.mubr.msk.bf16.mxu0 %vm333_vm1, %v332_v0  ;;  %32 = vst.msk [vmem:[#allocation2] sm:$0xff] %vm31_vm0, %v332_v0  ;;  %33 = vst.msk [vmem:[#allocation2 + $0x8] sm:$0xff] %vm31_vm0, %v332_v0  ;;  %v321_v2 = vld [vmem:[%s422_s1 + $0x8] sm:$0xff]   ;;  %vm266_vm3 = vcmask 257024  }
   0x2   :  { %306 = vmatprep.subr.bf16.mxu1 %v332_v0  ;;  %314 = vmatprep.mubr.msk.bf16.mxu1 %vm333_vm1, %v332_v0  ;;  %v34_v3 = vld [vmem:[%s423_s0] sm:$0xff]   ;;  %v324_v5 = vld [vmem:[%s424_s3 + $0x8] sm:$0xff]   ;;  %v325_v6 = vld [vmem:[%s424_s3 + $0x10] sm:$0xff]  }
   0x3   :  { %299 = vmatpush3.bf16.msra.mxu0 %v320_v1  ;;  %v323_v4 = vld [vmem:[%s424_s3] sm:$0xff]   ;;  %v326_v7 = vld [vmem:[%s424_s3 + $0x18] sm:$0xff]   ;;  %v198_v26 = vunpack.c.l.bf16 %v34_v3  ;;  %v199_v27 = vunpack.c.h.bf16 %v34_v3 }
   0x4   :  { %300 = vmatprep.subr.bf16.mxu0 %v332_v0  ;;  %307 = vmatpush3.bf16.msra.mxu1 %v323_v4  ;;  %v273_v8 = vld [vmem:[%s425_s2] ss:$0 sm:$0xff] }
   0x5   :  { %308 = vmatprep.subr.bf16.mxu1 %v332_v0  ;;  %v283_v29 = vld [vmem:[%s426_s4] ss:$0 sm:$0xff] }
   0x6   :  { %v284_v54 = vld [vmem:[%s427_s5] ss:$0 sm:$0xff] }
   0x7   :  { %301 = vmatpush3.bf16.msra.mxu0 %v321_v2  ;;  %v285_v56 = vld [vmem:[%s428_s6] ss:$0 sm:$0xff] }
   0x8   :  { %309 = vmatpush3.bf16.msra.mxu1 %v324_v5  ;;  %v112_v18 = vld [vmem:[#allocation2] sm:$0xff]  ;;  %v113_v20 = vld [vmem:[#allocation2 + $0x8] sm:$0xff] }
   0x9   :  { %310 = vmatprep.subr.bf16.mxu1 %v332_v0 }
   0xa   :  { %303 = vmatmul.mubr.msk.bf16.vlgmr.msra.gmra.mrb[0].mxu0 %vm31_vm0, %v34_v3 }
   0xc   :  { %311 = vmatpush3.bf16.msra.mxu1 %v325_v6 }
   0xd   :  { %312 = vmatprep.subr.bf16.mxu1 %v332_v0 }
  0x10   :  { %313 = vmatpush3.bf16.msra.mxu1 %v326_v7 }
  0xdd   :  { %v102_v9 = vpop.f32.mrb[0].mxu0 }
  0xde   :  { %v103_v10 = vadd.f32 %v273_v8, %v102_v9  ;;  %v304_v11 = vpop.f32.mrb[1].mxu0 }
  0xdf   :  { %v105_v12 = vpop.f32.mrb[2].mxu0 }
  0xe0   :  { %v106_v13 = vadd.f32 %v273_v8, %v105_v12  ;;  %v305_v14 = vpop.f32.mrb[3].mxu0  ;;  %v109_v15 = vmax.f32 %v103_v10, 0.0 }
  0xe2   :  { %v110_v16 = vmax.f32 %v106_v13, 0.0 }
  0xe4   :  { %v111_v17 = vpack.c.bf16 %v110_v16, %v109_v15 }
  0xe6   :  { %315 = vmatmul.mubr.msk.bf16.vlgmr.msra.gmra.mrb[0].mxu1 %vm146_vm2, %v111_v17 }
 0x1b9   :  { %v184_v19 = vpop.f32.mrb[0].mxu1 }
 0x1ba   :  { %v191_v21 = vadd.f32 %v184_v19, %v112_v18  ;;  %v316_v22 = vpop.f32.mrb[1].mxu1 }
 0x1bb   :  { %v187_v23 = vpop.f32.mrb[2].mxu1 }
 0x1bc   :  { %193 = vst.msk [vmem:[#allocation2] sm:$0xff] %vm31_vm0, %v191_v21  ;;  %v192_v24 = vadd.f32 %v187_v23, %v113_v20  ;;  %v317_v25 = vpop.f32.mrb[3].mxu1 }
 0x1be   :  { %194 = vst.msk [vmem:[#allocation2 + $0x8] sm:$0xff] %vm31_vm0, %v192_v24 }
 0x1c3   :  { %v200_v28 = vld [vmem:[#allocation2] sm:$0xff] }
 0x1c4   :  { %v202_v30 = vadd.f32 %v200_v28, %v198_v26 }
 0x1c5   :  { %v201_v31 = vld [vmem:[#allocation2 + $0x8] sm:$0xff] }
 0x1c6   :  { %v211_v32 = vadd.f32 %v283_v29, %v202_v30  ;;  %v203_v33 = vadd.f32 %v201_v31, %v199_v27 }
 0x1c8   :  { %v213_v34 = vsel %vm31_vm0, %v211_v32, 0.0  ;;  %v212_v35 = vadd.f32 %v283_v29, %v203_v33 }
 0x1c9   :  { %214 = vadd.xlane.f32.xlu0 %v213_v34 }
 0x1ca   :  { %v216_v36 = vsel %vm31_vm0, %v212_v35, 0.0 }
 0x1cd   :  { %217 = vadd.xlane.f32.xlu0 %v216_v36 }
 0x256   :  { %v215_v37 = vpop.xlane.xlu0 %214 }
 0x257   :  { %v220_v38 = vmul.f32 0.03125, %v215_v37 }
 0x259   :  { %v222_v39 = vsub.f32 %v211_v32, %v220_v38 }
 0x25a   :  { %v218_v40 = vpop.xlane.xlu0 %217 }
 0x25b   :  { %v221_v41 = vmul.f32 0.03125, %v218_v40  ;;  %v224_v42 = vmul.f32 %v222_v39, %v222_v39 }
 0x25d   :  { %v223_v43 = vsub.f32 %v212_v35, %v221_v41  ;;  %v226_v44 = vsel %vm31_vm0, %v224_v42, 0.0 }
 0x25e   :  { %227 = vadd.xlane.f32.xlu1 %v226_v44 }
 0x25f   :  { %v225_v45 = vmul.f32 %v223_v43, %v223_v43 }
 0x261   :  { %v229_v46 = vsel %vm31_vm0, %v225_v45, 0.0 }
 0x262   :  { %230 = vadd.xlane.f32.xlu1 %v229_v46 }
 0x2eb   :  { %v228_v47 = vpop.xlane.xlu1 %227 }
 0x2ec   :  { %v232_v48 = vmul.f32 0.03125, %v228_v47 }
 0x2ee   :  { %v234_v49 = vadd.f32 1e-05, %v232_v48 }
 0x2ef   :  { %v231_v50 = vpop.xlane.xlu1 %230 }
 0x2f0   :  { %328 = vrsqrt.f32 %v234_v49  ;;  %v233_v51 = vmul.f32 0.03125, %v231_v50 }
 0x2f2   :  { %v235_v52 = vadd.f32 1e-05, %v233_v51 }
 0x2f4   :  { %330 = vrsqrt.f32 %v235_v52 }
 0x2fa   :  { %v329_v53 = vpop.eup %328 }
 0x2fb   :  { %v238_v55 = vmul.f32 %v329_v53, %v222_v39 }
 0x2fd   :  { %v247_v57 = vmul.f32 %v284_v54, %v238_v55 }
 0x2fe   :  { %v331_v58 = vpop.eup %330 }
 0x2ff   :  { %v256_v59 = vadd.f32 %v285_v56, %v247_v57  ;;  %v239_v60 = vmul.f32 %v331_v58, %v223_v43 }
 0x301   :  { %v288_v61 = vpack.c.bf16 %v256_v59, %v256_v59  ;;  %v248_v62 = vmul.f32 %v284_v54, %v239_v60 }
 0x303   :  { %267 = vst.msk [vmem:[%s429_s7] sm:$0xf] %vm266_vm3, %v288_v61  ;;  %v257_v63 = vadd.f32 %v285_v56, %v248_v62 }
 0x305   :  { %v289_v0 = vpack.c.bf16 %v257_v63, %v257_v63 }
 0x307   :  { %268 = vst.msk [vmem:[%s429_s7 + $0x4] sm:$0xf] %vm266_vm3, %v289_v0 }

// kernel: transformer_forward.28
= control target key start
LH: loop header
LB: loop body
LE: loop exit
PB: predicated region body
PF: predicated region fallthrough
CT: control target
= control target key end

     0   :  { %v235_v0 = vmov 0.0   ;;  %vm236_vm0 = vmmov 0   ;;  %vm45_vm1 = vcmask 261120   ;;  %vm98_vm2 = vcmask 257024   ;;  %s294_s1 = inlined_call_operand.vmem [shape: bf16[2,32,32], index: 1, kind: input, shape index: {}]   ;;  %s295_s0 = inlined_call_operand.vmem [shape: bf16[16,32], index: 0, kind: input, shape index: {}]   ;;  %s296_s2 = inlined_call_operand.vmem [shape: f32[2,1,32], index: 2, kind: input, shape index: {}]   ;;  %s297_s3 = inlined_call_operand.vmem [shape: bf16[2,16,32], index: 3, kind: output, shape index: {}]  }
   0x1   :  { %212 = vmatprep.subr.bf16.mxu0 %v235_v0  ;;  %220 = vmatprep.subr.bf16.mxu1 %v235_v0  ;;  %v230_v1 = vld [vmem:[%s294_s1] sm:$0xff]   ;;  %v231_v2 = vld [vmem:[%s294_s1 + $0x10] sm:$0xff]   ;;  %v232_v3 = vld [vmem:[%s294_s1 + $0x8] sm:$0xff]  }
   0x2   :  { %216 = vmatprep.mubr.msk.bf16.mxu0 %vm236_vm0, %v235_v0  ;;  %224 = vmatprep.mubr.msk.bf16.mxu1 %vm236_vm0, %v235_v0  ;;  %v233_v4 = vld [vmem:[%s294_s1 + $0x18] sm:$0xff]   ;;  %v234_v5 = vld [vmem:[%s295_s0] sm:$0xff]  }
   0x3   :  { %213 = vmatpush3.bf16.msra.mxu0 %v230_v1  ;;  %221 = vmatpush3.bf16.msra.mxu1 %v231_v2  ;;  %v182_v6 = vld [vmem:[%s296_s2] ss:$0 sm:$0xff]  ;;  %v194_v7 = vld [vmem:[%s296_s2 + $0x1] ss:$0 sm:$0xff] }
   0x4   :  { %214 = vmatprep.subr.bf16.mxu0 %v235_v0  ;;  %222 = vmatprep.subr.bf16.mxu1 %v235_v0 }
   0x7   :  { %215 = vmatpush3.bf16.msra.mxu0 %v232_v3  ;;  %223 = vmatpush3.bf16.msra.mxu1 %v233_v4 }
   0xa   :  { %217 = vmatmul.mubr.msk.bf16.vlgmr.msra.gmra.mrb[0].mxu0 %vm45_vm1, %v234_v5  ;;  %225 = vmatmul.mubr.msk.bf16.vlgmr.msra.gmra.mrb[0].mxu1 %vm45_vm1, %v234_v5 }
  0xdd   :  { %v83_v8 = vpop.f32.mrb[0].mxu0  ;;  %v160_v10 = vpop.f32.mrb[0].mxu1 }
  0xde   :  { %v84_v9 = vadd.f32 %v182_v6, %v83_v8  ;;  %v218_v11 = vpop.f32.mrb[1].mxu0  ;;  %v161_v12 = vadd.f32 %v194_v7, %v160_v10  ;;  %v226_v13 = vpop.f32.mrb[1].mxu1 }
  0xdf   :  { %v86_v14 = vpop.f32.mrb[2].mxu0  ;;  %v163_v17 = vpop.f32.mrb[2].mxu1 }
  0xe0   :  { %v202_v15 = vpack.c.bf16 %v84_v9, %v84_v9  ;;  %v87_v16 = vadd.f32 %v182_v6, %v86_v14  ;;  %v219_v18 = vpop.f32.mrb[3].mxu0  ;;  %v204_v19 = vpack.c.bf16 %v161_v12, %v161_v12  ;;  %v164_v20 = vadd.f32 %v194_v7, %v163_v17  ;;  %v227_v21 = vpop.f32.mrb[3].mxu1 }
  0xe2   :  { %99 = vst.msk [vmem:[%s297_s3] sm:$0xf] %vm98_vm2, %v202_v15  ;;  %v203_v22 = vpack.c.bf16 %v87_v16, %v87_v16  ;;  %200 = vst.msk [vmem:[%s297_s3 + $0x8] sm:$0xf] %vm98_vm2, %v204_v19  ;;  %v205_v23 = vpack.c.bf16 %v164_v20, %v164_v20 }
  0xe4   :  { %100 = vst.msk [vmem:[%s297_s3 + $0x4] sm:$0xf] %vm98_vm2, %v203_v22  ;;  %201 = vst.msk [vmem:[%s297_s3 + $0xc] sm:$0xf] %vm98_vm2, %v205_v23 }

// kernel: transformer_forward.20
= control target key start
LH: loop header
LB: loop body
LE: loop exit
PB: predicated region body
PF: predicated region fallthrough
CT: control target
= control target key end

     0   :  { %s1750_s30 = smov 0   ;;  %s1752_s10 = smov 0   ;;  %s1963_s0 = inlined_call_operand.vmem [shape: bf16[3,2,8,32], index: 0, kind: input, shape index: {}, may-alias: {0,1,2}]   ;;  %s1964_s1 = inlined_call_operand.vmem [shape: bf16[3,2,8,32], index: 1, kind: input, shape index: {}, may-alias: {0,1,2}]   ;;  %s1965_s2 = inlined_call_operand.vmem [shape: bf16[3,2,8,32], index: 2, kind: input, shape index: {}, may-alias: {0,1,2}]   ;;  %s1966_s3 = inlined_call_operand.vmem [shape: f32[2,1,8], index: 3, kind: input, shape index: {}]   ;;  %s1967_s4 = inlined_call_operand.vmem [shape: bf16[2,8,32], index: 4, kind: input, shape index: {}]   ;;  %s1968_s5 = inlined_call_operand.vmem [shape: bf16[32,32], index: 5, kind: input, shape index: {}]   ;;  %s1969_s6 = inlined_call_operand.vmem [shape: f32[1,32], index: 6, kind: input, shape index: {}]   ;;  %s1970_s7 = inlined_call_operand.vmem [shape: f32[1,32], index: 7, kind: input, shape index: {}]   ;;  %s1971_s8 = inlined_call_operand.vmem [shape: f32[1,32], index: 8, kind: input, shape index: {}]   ;;  %s1972_s9 = inlined_call_operand.vmem [shape: bf16[2,8,32], index: 9, kind: output, shape index: {}]  }
   0x1   :  { %s1754_s11 = smov 0  }
   0x2 LB: > { %s38_s12 = sadd.s32 1, %s1687_s10  ;;  %p1483_p0 = scmp.ge.s32.totalorder %s1691_s11, 1  ;;  %s1691_s11 = sphi %s1754_s11, %s19_s11   ;;  %s1687_s10 = sphi %s1752_s10, %s1974_s10   ;;  %s1683_s30 = sphi %s1750_s30, %s1973_s30  }
   0x3   : > { %p40_p1 = scmp.ge.s32.totalorder %s38_s12, 2  ;;  %p369_p2 = scmp.lt.s32.totalorder %s1691_s11, 3 }
   0x5   : > { %s1976_s12 = smov (%p40_p1, %s38_s12), 0  ;;  %p370_p3 = pnand %p1483_p0, %p369_p2 }
   0x6   : > { %p438_p4 = scmp.lt.s32.totalorder (!%p370_p3), %s1683_s30, 1  ;;  %vm495_vm0 = vcmask (!%p370_p3), 64512   ;;  %v1693_v0 = vmov (!%p370_p3), 0.0   ;;  %vm1694_vm1 = vmmov (!%p370_p3), 0   ;;  %vm486_vm2 = vcmask (!%p370_p3), 7168   ;;  %s1697_s23 = smov (!%p370_p3), 120  }
   0x7   : > { %373 = sbr.rel (%p370_p3) target bundleno = 1890 (0x762), region = 56  ;;  %1536 = vmatprep.subr.bf16.mxu0 (!%p370_p3), %v1693_v0  ;;  %496 = vst.msk [vmem:[#allocation4] sm:$0xff] (!%p370_p3), %vm495_vm0, %v1693_v0  ;;  %497 = vst.msk [vmem:[#allocation4 + $0x8] sm:$0xff] (!%p370_p3), %vm495_vm0, %v1693_v0  ;;  %1538 = vmatprep.mubr.msk.bf16.mxu0 (!%p370_p3), %vm1694_vm1, %v1693_v0  ;;  %v1695_v4 = vmov (!%p370_p3), -1e+30   ;;  %v1696_v13 = vmov (!%p370_p3), 0  }
   0x8   : > { %498 = vst.msk [vmem:[#allocation4 + $0x10] sm:$0xff] (!%p370_p3), %vm495_vm0, %v1693_v0  ;;  %499 = vst.msk [vmem:[#allocation4 + $0x18] sm:$0xff] (!%p370_p3), %vm495_vm0, %v1693_v0  ;;  %1542 = vmatprep.subr.bf16.mxu1 (!%p370_p3), %v1693_v0  ;;  %1544 = vmatprep.mubr.msk.bf16.mxu1 (!%p370_p3), %vm1694_vm1, %v1693_v0  ;;  %s1698_s24 = smov (!%p370_p3), 112   ;;  %s1699_s25 = smov (!%p370_p3), 104   ;;  %vm594_vm3 = vcmask (!%p370_p3), 1043456   ;;  %vm1305_vm4 = vcmask (!%p370_p3), 261120  }
   0x9   : > { %487 = vst.msk [vmem:[#allocation2] sm:$0xff] (!%p370_p3), %vm486_vm2, %v1695_v4  ;;  %488 = vst.msk [vmem:[#allocation2 + $0x8] sm:$0xff] (!%p370_p3), %vm486_vm2, %v1695_v4  ;;  %1639 = vset.pattern.permute.xlu0 (!%p370_p3), %v1696_v13  ;;  %1640 = vset.pattern.permute.xlu1 (!%p370_p3), %v1696_v13  ;;  %vm1337_vm5 = vcmask (!%p370_p3), 257024  }
   0xa   : > { %489 = vst.msk [vmem:[#allocation2 + $0x10] sm:$0xff] (!%p370_p3), %vm486_vm2, %v1695_v4  ;;  %490 = vst.msk [vmem:[#allocation2 + $0x18] sm:$0xff] (!%p370_p3), %vm486_vm2, %v1695_v4 }
   0xb   : > { %491 = vst.msk [vmem:[#allocation3] sm:$0xff] (!%p370_p3), %vm486_vm2, %v1693_v0  ;;  %492 = vst.msk [vmem:[#allocation3 + $0x8] sm:$0xff] (!%p370_p3), %vm486_vm2, %v1693_v0 }
   0xc   : > { %493 = vst.msk [vmem:[#allocation3 + $0x10] sm:$0xff] (!%p370_p3), %vm486_vm2, %v1693_v0  ;;  %494 = vst.msk [vmem:[#allocation3 + $0x18] sm:$0xff] (!%p370_p3), %vm486_vm2, %v1693_v0 }
   0xe   : > { %s1978_s30 = smov (!%p438_p4, %s1683_s30), 1 }
   0xf   : > { %s1782_s13 = sshll.u32 %s1978_s30, 2  ;;  %s466_s22 = scalar_lea.vmem %s1966_s3, %s1978_s30 }
  0x10   : > { %s1404_s16 = scalar_lea.vmem %s1964_s1, %s1782_s13  ;;  %s444_s19 = scalar_lea.vmem %s1963_s0, %s1782_s13  ;;  %v1812_v6 = vld [vmem:[%s466_s22] ss:$0 sm:$0xff]  ;;  %v700_v61 = vld [vmem:[#allocation2 + $0x8] sm:$0xff] }
  0x11   : > { %v1489_v1 = vld [vmem:[%s1404_s16 + $0x8] sm:$0xf]  ;;  %v500_v3 = vld [vmem:[%s444_s19] sm:$0xf]  ;;  %s1408_s28 = scalar_lea.vmem %s1965_s2, %s1782_s13  ;;  %s473_s22 = scalar_lea.vmem %s1967_s4, %s1782_s13 }
  0x12   : > { %v509_v2 = vsel %vm495_vm0, %v1489_v1, 0  ;;  %v1495_v14 = vcombine.low %v1489_v1, %v1489_v1  ;;  %v1494_v15 = vcombine.low %v500_v3, %v500_v3  ;;  %v1822_v16 = vld [vmem:[#allocation2] sm:$0xff]  ;;  %v1836_v20 = vld [vmem:[%s1408_s28 + $0x10] sm:$0xf]  ;;  %s480_s14 = scalar_lea.vmem %s1972_s9, %s1782_s13 }
  0x13   : > { %1537 = vmatpush3.bf16.xpose.msra.mxu0 %v509_v2  ;;  %v596_v21 = vsel %vm594_vm3, %v1836_v20, 0  ;;  %v840_v2 = vld [vmem:[#allocation2 + $0x10] sm:$0xff] }
  0x14   : > { %1554 = vmatprep.subr.bf16.mxu0 %v1693_v0  ;;  %649 = vrot.lane.b32.xlu1 %v1495_v14, %s1697_s23 }
  0x15   : > { %1543 = vmatpush3.bf16.msra.mxu1 %v596_v21 }
  0x16   : > { %1548 = vmatprep.subr.bf16.mxu1 %v1693_v0 }
  0x18   : > { %644 = vrot.lane.b32.xlu1 %v1494_v15, %s1697_s23 }
  0x1a   : > { %1539 = vmatmul.mubr.msk.bf16.vlgmr.msra.gmra.mrb[0].mxu0 %vm495_vm0, %v500_v3 }
  0x1b   : > { %1556 = vmatprep.mubr.msk.bf16.mxu0 %vm1694_vm1, %v1693_v0 }
  0x1c   : > { %789 = vrot.lane.b32.xlu1 %v1495_v14, %s1698_s24 }
  0x20   : > { %787 = vrot.lane.b32.xlu1 %v1494_v15, %s1698_s24 }
  0x24   : > { %926 = vrot.lane.b32.xlu1 %v1495_v14, %s1699_s25 }
  0x28   : > { %924 = vrot.lane.b32.xlu1 %v1494_v15, %s1699_s25 }
  0x86   : > { %v650_v25 = vpop.permute.xlu1 %649 }
  0x87   : > { %v655_v28 = vsel %vm495_vm0, %v650_v25, 0 }
  0x8a   : > { %v645_v26 = vpop.permute.xlu1 %644 }
  0x8e   : > { %v790_v30 = vpop.permute.xlu1 %789 }
  0x8f   : > { %v795_v32 = vsel %vm495_vm0, %v790_v30, 0 }
  0x92   : > { %v788_v31 = vpop.permute.xlu1 %787 }
  0x96   : > { %v927_v33 = vpop.permute.xlu1 %926 }
  0x97   : > { %v932_v34 = vsel %vm495_vm0, %v927_v33, 0 }
  0x9a   : > { %v925_v35 = vpop.permute.xlu1 %924 }
  0xed   : > { %v545_v5 = vpop.f32.mrb[0].mxu0 }
  0xee   : > { %v551_v7 = vmul.f32 0.35355338, %v545_v5  ;;  %v1540_v8 = vpop.f32.mrb[1].mxu0 }
  0xef   : > { %v548_v9 = vpop.f32.mrb[2].mxu0 }
  0xf0   : > { %v1541_v10 = vpop.f32.mrb[3].mxu0  ;;  %v558_v11 = vadd.f32 %v1812_v6, %v551_v7  ;;  %v977_v7 = vld [vmem:[#allocation2 + $0x18] sm:$0xff]  ;;  %v1497_v9 = vcombine.low %v1836_v20, %v1836_v20 }
  0xf2   : > { %v560_v12 = vsel %vm495_vm0, %v558_v11, -inf }
  0xf3   : > { %561 = vmax.xlane.f32.xlu0 %v560_v12 }
 0x180   : > { %v562_v17 = vpop.xlane.xlu0 %561 }
 0x181   : > { %v1825_v18 = vmax.f32 %v1822_v16, %v562_v17 }
 0x183   : > { %v564_v19 = vsub.f32 %v1822_v16, %v1825_v18  ;;  %640 = vst.msk [vmem:[#allocation2] sm:$0xff] %vm486_vm2, %v1825_v18  ;;  %569 = vperm.xlu0 %1639, %v1825_v18  }
 0x202   : > { %v570_v22 = vpop.permute.xlu0 %569 }
 0x203   : > { %v572_v23 = vsub.f32 %v558_v11, %v570_v22 }
 0x205   : > { %v573_v24 = vmul.f32 1.442695, %v572_v23 }
 0x207   : > { %1643 = vpow2.f32 %v573_v24 }
 0x211   : > { %v1841_v27 = vpop.eup %1643 }
 0x212   : > { %v590_v29 = vpack.c.bf16 %v1841_v27, %v1841_v27  ;;  %v577_v11 = vsel %vm495_vm0, %v1841_v27, 0.0 }
 0x214   : > { %1545 = vmatmul.mubr.msk.bf16.vlgmr.msra.gmra.mrb[0].mxu1 %vm495_vm0, %v590_v29 }
 0x215   : > { %1549 = vmatpush3.bf16.xpose.msra.mxu1 %v655_v28  ;;  %1550 = vmatprep.mubr.msk.bf16.mxu1 %vm1694_vm1, %v1693_v0 }
 0x216   : > { %1560 = vmatprep.subr.bf16.mxu1 %v1693_v0 }
 0x21c   : > { %1551 = vmatmul.mubr.msk.bf16.vlgmr.msra.gmra.mrb[4].mxu1 %vm495_vm0, %v645_v26 }
 0x21d   : > { %1561 = vmatpush3.bf16.xpose.msra.mxu1 %v795_v32  ;;  %1562 = vmatprep.mubr.msk.bf16.mxu1 %vm1694_vm1, %v1693_v0 }
 0x21e   : > { %1572 = vmatprep.subr.bf16.mxu1 %v1693_v0 }
 0x224   : > { %1563 = vmatmul.mubr.msk.bf16.vlgmr.msra.gmra.mrb[8].mxu1 %vm495_vm0, %v788_v31 }
 0x225   : > { %1573 = vmatpush3.bf16.xpose.msra.mxu1 %v932_v34  ;;  %1574 = vmatprep.mubr.msk.bf16.mxu1 %vm1694_vm1, %v1693_v0 }
 0x226   : > { %1584 = vmatprep.subr.bf16.mxu1 %v1693_v0 }
 0x22c   : > { %1575 = vmatmul.mubr.msk.bf16.vlgmr.msra.gmra.mrb[12].mxu1 %vm495_vm0, %v925_v35 }
 0x22d   : > { %1586 = vmatprep.mubr.msk.bf16.mxu1 %vm1694_vm1, %v1693_v0 }
 0x2e7   : > { %v1863_v36 = vpop.f32.mrb[0].mxu1 }
 0x2e8   : > { %v1546_v37 = vpop.f32.mrb[1].mxu1 }
 0x2e9   : > { %v635_v38 = vpop.f32.mrb[2].mxu1 }
 0x2ea   : > { %v1547_v39 = vpop.f32.mrb[3].mxu1 }
 0x2ef   : > { %v691_v40 = vpop.f32.mrb[4].mxu1 }
 0x2f0   : > { %v697_v41 = vmul.f32 0.35355338, %v691_v40  ;;  %v1552_v42 = vpop.f32.mrb[5].mxu1  ;;  %v565_v40 = vmul.f32 1.442695, %v564_v19 }
 0x2f1   : > { %v694_v43 = vpop.f32.mrb[6].mxu1 }
 0x2f2   : > { %v1553_v44 = vpop.f32.mrb[7].mxu1  ;;  %v698_v45 = vadd.f32 %v1812_v6, %v697_v41 }
 0x2f4   : > { %v701_v46 = vsel %vm495_vm0, %v698_v45, -inf }
 0x2f5   : > { %702 = vmax.xlane.f32.xlu1 %v701_v46  ;;  %v575_v46 = vld [vmem:[#allocation3] sm:$0xff] }
 0x2f7   : > { %v831_v47 = vpop.f32.mrb[8].mxu1 }
 0x2f8   : > { %v837_v48 = vmul.f32 0.35355338, %v831_v47  ;;  %v1564_v49 = vpop.f32.mrb[9].mxu1 }
 0x2f9   : > { %v834_v50 = vpop.f32.mrb[10].mxu1 }
 0x2fa   : > { %v1565_v51 = vpop.f32.mrb[11].mxu1  ;;  %v838_v52 = vadd.f32 %v1812_v6, %v837_v48 }
 0x2fb   : > { %v1074_v51 = vld [vmem:[%s1968_s5] sm:$0xf] }
 0x2fc   : > { %v841_v53 = vsel %vm495_vm0, %v838_v52, -inf }
 0x2fd   : > { %842 = vmax.xlane.f32.xlu0 %v841_v53  ;;  %v717_v53 = vld [vmem:[#allocation3 + $0x8] sm:$0xff] }
 0x2ff   : > { %v968_v54 = vpop.f32.mrb[12].mxu1 }
 0x300   : > { %v974_v55 = vmul.f32 0.35355338, %v968_v54  ;;  %v1576_v56 = vpop.f32.mrb[13].mxu1 }
 0x301   : > { %v971_v57 = vpop.f32.mrb[14].mxu1 }
 0x302   : > { %v1577_v58 = vpop.f32.mrb[15].mxu1  ;;  %v975_v59 = vadd.f32 %v1812_v6, %v974_v55  ;;  %v857_v57 = vld [vmem:[#allocation3 + $0x10] sm:$0xff] }
 0x304   : > { %v978_v60 = vsel %vm495_vm0, %v975_v59, -inf }
 0x305   : > { %979 = vmax.xlane.f32.xlu1 %v978_v60 }
 0x382   : > { %v703_v62 = vpop.xlane.xlu1 %702 }
 0x383   : > { %v704_v63 = vmax.f32 %v700_v61, %v703_v62  ;;  %v994_v62 = vld [vmem:[#allocation3 + $0x18] sm:$0xff] }
 0x385   : > { %v705_v1 = vsub.f32 %v700_v61, %v704_v63  ;;  %786 = vst.msk [vmem:[#allocation2 + $0x8] sm:$0xff] %vm486_vm2, %v704_v63  ;;  %710 = vperm.xlu1 %1640, %v704_v63  }
 0x387   : > { %v706_v38 = vmul.f32 1.442695, %v705_v1 }
 0x38a   : > { %v843_v3 = vpop.xlane.xlu0 %842 }
 0x38b   : > { %v844_v4 = vmax.f32 %v840_v2, %v843_v3  ;;  %v583_v3 = vld [vmem:[#allocation4] sm:$0xff] }
 0x38d   : > { %v845_v5 = vsub.f32 %v840_v2, %v844_v4  ;;  %923 = vst.msk [vmem:[#allocation2 + $0x10] sm:$0xff] %vm486_vm2, %v844_v4  ;;  %850 = vperm.xlu0 %1639, %v844_v4  }
 0x38f   : > { %v846_v42 = vmul.f32 1.442695, %v845_v5 }
 0x392   : > { %v980_v8 = vpop.xlane.xlu1 %979 }
 0x393   : > { %v981_v6 = vmax.f32 %v977_v7, %v980_v8 }
 0x395   : > { %v982_v10 = vsub.f32 %v977_v7, %v981_v6  ;;  %1060 = vst.msk [vmem:[#allocation2 + $0x18] sm:$0xff] %vm486_vm2, %v981_v6  ;;  %987 = vperm.xlu1 %1640, %v981_v6   ;;  %v1085_v6 = vld [vmem:[%s1968_s5 + $0x4] sm:$0xf] }
 0x397   : > { %v983_v41 = vmul.f32 1.442695, %v982_v10 }
 0x399   : > { %736 = vrot.lane.b32.xlu1 %v1497_v9, %s1697_s23 }
 0x39d   : > { %873 = vrot.lane.b32.xlu1 %v1497_v9, %s1698_s24 }
 0x3a1   : > { %1010 = vrot.lane.b32.xlu1 %v1497_v9, %s1699_s25  ;;  %v1090_v9 = vsel %vm594_vm3, %v1085_v6, 0  ;;  %v1294_v6 = vld [vmem:[%s473_s22] sm:$0xf] }
 0x3a2   : > { %1585 = vmatpush3.bf16.msra.mxu1 %v1090_v9  ;;  %v1295_v9 = vunpack.c.l.bf16 %v1294_v6 }
 0x3a3   : > { %1596 = vmatprep.subr.bf16.mxu1 %v1693_v0 }
 0x3ac   : > { %578 = vadd.xlane.f32.xlu0 %v577_v11 }
 0x404   : > { %v711_v12 = vpop.permute.xlu1 %710 }
 0x405   : > { %v713_v13 = vsub.f32 %v698_v45, %v711_v12 }
 0x407   : > { %v714_v14 = vmul.f32 1.442695, %v713_v13 }
 0x409   : > { %1645 = vpow2.f32 %v714_v14 }
 0x40c   : > { %v851_v15 = vpop.permute.xlu0 %850 }
 0x40d   : > { %v853_v17 = vsub.f32 %v838_v52, %v851_v15  ;;  %v1136_v52 = vsel %vm594_vm3, %v1074_v51, 0 }
 0x40f   : > { %v854_v20 = vmul.f32 1.442695, %v853_v17 }
 0x411   : > { %1647 = vpow2.f32 %v854_v20 }
 0x413   : > { %v1646_v21 = vpop.eup %1645 }
 0x414   : > { %v988_v22 = vpop.permute.xlu1 %987  ;;  %v719_v23 = vsel %vm495_vm0, %v1646_v21, 0.0  ;;  %v732_v29 = vpack.c.bf16 %v1646_v21, %v1646_v21  ;;  %v1246_v21 = vld [vmem:[%s1968_s5 + $0xc] sm:$0xf] }
 0x415   : > { %v990_v24 = vsub.f32 %v975_v59, %v988_v22  ;;  %720 = vadd.xlane.f32.xlu1 %v719_v23  ;;  %v1251_v23 = vsel %vm594_vm3, %v1246_v21, 0 }
 0x417   : > { %v991_v25 = vmul.f32 1.442695, %v990_v24  ;;  %v725_v24 = vld [vmem:[#allocation4 + $0x8] sm:$0xff] }
 0x418   : > { %v737_v26 = vpop.permute.xlu1 %736 }
 0x419   : > { %1649 = vpow2.f32 %v991_v25  ;;  %v742_v27 = vsel %vm594_vm3, %v737_v26, 0 }
 0x41a   : > { %1555 = vmatpush3.bf16.msra.mxu0 %v742_v27  ;;  %1651 = vpow2.f32 %v706_v38 }
 0x41b   : > { %v1648_v28 = vpop.eup %1647  ;;  %1566 = vmatprep.subr.bf16.mxu0 %v1693_v0  ;;  %1653 = vpow2.f32 %v565_v40  ;;  %v1002_v40 = vld [vmem:[#allocation4 + $0x18] sm:$0xff] }
 0x41c   : > { %v859_v30 = vsel %vm495_vm0, %v1648_v28, 0.0  ;;  %v874_v31 = vpop.permute.xlu1 %873  ;;  %v872_v35 = vpack.c.bf16 %v1648_v28, %v1648_v28  ;;  %1655 = vpow2.f32 %v983_v41 }
 0x41d   : > { %1557 = vmatmul.mubr.msk.bf16.vlgmr.msra.gmra.mrb[4].mxu0 %vm495_vm0, %v732_v29  ;;  %860 = vadd.xlane.f32.xlu0 %v859_v30  ;;  %v879_v32 = vsel %vm594_vm3, %v874_v31, 0  ;;  %1657 = vpow2.f32 %v846_v42  ;;  %v865_v31 = vld [vmem:[#allocation4 + $0x10] sm:$0xff] }
 0x41e   : > { %1567 = vmatpush3.bf16.msra.mxu0 %v879_v32  ;;  %1568 = vmatprep.mubr.msk.bf16.mxu0 %vm1694_vm1, %v1693_v0 }
 0x41f   : > { %1578 = vmatprep.subr.bf16.mxu0 %v1693_v0 }
 0x420   : > { %v1011_v33 = vpop.permute.xlu1 %1010 }
 0x421   : > { %v1016_v37 = vsel %vm594_vm3, %v1011_v33, 0 }
 0x423   : > { %v1650_v34 = vpop.eup %1649 }
 0x424   : > { %v996_v39 = vsel %vm495_vm0, %v1650_v34, 0.0  ;;  %v1009_v43 = vpack.c.bf16 %v1650_v34, %v1650_v34  ;;  %v1652_v44 = vpop.eup %1651 }
 0x425   : > { %997 = vadd.xlane.f32.xlu1 %v996_v39  ;;  %1569 = vmatmul.mubr.msk.bf16.vlgmr.msra.gmra.mrb[8].mxu0 %vm495_vm0, %v872_v35  ;;  %v1654_v45 = vpop.eup %1653  ;;  %v718_v54 = vmul.f32 %v1652_v44, %v717_v53 }
 0x426   : > { %1579 = vmatpush3.bf16.msra.mxu0 %v1016_v37  ;;  %1580 = vmatprep.mubr.msk.bf16.mxu0 %vm1694_vm1, %v1693_v0  ;;  %v1656_v16 = vpop.eup %1655  ;;  %v576_v18 = vmul.f32 %v1654_v45, %v575_v46 }
 0x427   : > { %1590 = vmatprep.subr.bf16.mxu0 %v1693_v0  ;;  %v1658_v19 = vpop.eup %1657  ;;  %v995_v63 = vmul.f32 %v1656_v16, %v994_v62 }
 0x428   : > { %v858_v58 = vmul.f32 %v1658_v19, %v857_v57 }
 0x42d   : > { %1581 = vmatmul.mubr.msk.bf16.vlgmr.msra.gmra.mrb[12].mxu0 %vm495_vm0, %v1009_v43 }
 0x42e   : > { %1592 = vmatprep.mubr.msk.bf16.mxu0 %vm1694_vm1, %v1693_v0  ;;  %1591 = vmatpush3.bf16.msra.mxu0 %v1136_v52 }
 0x42f   : > { %1602 = vmatprep.subr.bf16.mxu0 %v1693_v0 }
 0x433   : > { %728 = vperm.xlu0 %1639, %v1652_v44  }
 0x436   : > { %586 = vperm.xlu1 %1640, %v1654_v45  }
 0x437   : > { %1005 = vperm.xlu0 %1639, %v1656_v16  }
 0x439   : > { %v579_v47 = vpop.xlane.xlu0 %578 }
 0x43a   : > { %v580_v48 = vadd.f32 %v579_v47, %v576_v18  ;;  %868 = vperm.xlu1 %1640, %v1658_v19   ;;  %v1188_v19 = vld [vmem:[%s1968_s5 + $0x8] sm:$0xf] }
 0x43c   : > { %582 = vst.msk [vmem:[#allocation3] sm:$0xff] %vm486_vm2, %v580_v48 }
 0x443   : > { %v1064_v49 = vld [vmem:[#allocation3] sm:$0xff] }
 0x444   : > { %1659 = vrcp.f32 %v1064_v49  ;;  %v1193_v49 = vsel %vm594_vm3, %v1188_v19, 0 }
 0x44e   : > { %v1660_v50 = vpop.eup %1659 }
 0x44f   : > { %1069 = vperm.xlu0 %1639, %v1660_v50  }
 0x4a2   : > { %v721_v55 = vpop.xlane.xlu1 %720 }
 0x4a3   : > { %v722_v56 = vadd.f32 %v721_v55, %v718_v54 }
 0x4a5   : > { %723 = vst.msk [vmem:[#allocation3 + $0x8] sm:$0xff] %vm486_vm2, %v722_v56 }
 0x4aa   : > { %v861_v59 = vpop.xlane.xlu0 %860 }
 0x4ab   : > { %v862_v60 = vadd.f32 %v861_v59, %v858_v58 }
 0x4ac   : > { %v1075_v61 = vld [vmem:[#allocation3 + $0x8] sm:$0xff] }
 0x4ad   : > { %863 = vst.msk [vmem:[#allocation3 + $0x10] sm:$0xff] %vm486_vm2, %v862_v60  ;;  %1661 = vrcp.f32 %v1075_v61 }
 0x4b2   : > { %v998_v1 = vpop.xlane.xlu1 %997  ;;  %v729_v13 = vpop.permute.xlu0 %728 }
 0x4b3   : > { %v999_v2 = vadd.f32 %v998_v1, %v995_v63  ;;  %v731_v25 = vmul.f32 %v729_v13, %v725_v24 }
 0x4b4   : > { %v1178_v4 = vld [vmem:[#allocation3 + $0x10] sm:$0xff] }
 0x4b5   : > { %1000 = vst.msk [vmem:[#allocation3 + $0x18] sm:$0xff] %vm486_vm2, %v999_v2  ;;  %1663 = vrcp.f32 %v1178_v4 }
 0x4b6   : > { %v587_v5 = vpop.permute.xlu1 %586  ;;  %v1006_v15 = vpop.permute.xlu0 %1005 }
 0x4b7   : > { %v1662_v7 = vpop.eup %1661  ;;  %v589_v8 = vmul.f32 %v587_v5, %v583_v3  ;;  %v1008_v41 = vmul.f32 %v1006_v15, %v1002_v40 }
 0x4b8   : > { %1080 = vperm.xlu1 %1640, %v1662_v7  }
 0x4b9   : > { %v638_v10 = vadd.f32 %v1863_v36, %v589_v8 }
 0x4ba   : > { %v869_v32 = vpop.permute.xlu1 %868 }
 0x4bb   : > { %639 = vst.msk [vmem:[#allocation4] sm:$0xff] %vm495_vm0, %v638_v10  ;;  %v871_v33 = vmul.f32 %v869_v32, %v865_v31  ;;  %v1509_v32 = vld [vmem:[%s1971_s8] ss:$0 sm:$0xff] }
 0x4bc   : > { %v1236_v11 = vld [vmem:[#allocation3 + $0x18] sm:$0xff] }
 0x4bd   : > { %1665 = vrcp.f32 %v1236_v11 }
 0x4bf   : > { %v1664_v12 = vpop.eup %1663 }
 0x4c0   : > { %1183 = vperm.xlu1 %1640, %v1664_v12  }
 0x4c2   : > { %v1066_v17 = vld [vmem:[#allocation4] sm:$0xff] }
 0x4c7   : > { %v1666_v14 = vpop.eup %1665 }
 0x4c8   : > { %1241 = vperm.xlu0 %1639, %v1666_v14   ;;  %v1507_v14 = vld [vmem:[%s1969_s6] ss:$0 sm:$0xff] }
 0x4ce   : > { %v1070_v20 = vpop.permute.xlu0 %1069 }
 0x4cf   : > { %v1072_v36 = vmul.f32 %v1070_v20, %v1066_v17 }
 0x4d1   : > { %v1073_v22 = vpack.c.bf16 %v1072_v36, %v1072_v36 }
 0x4d3   : > { %1593 = vmatmul.mubr.msk.bf16.vlgmr.msra.gmra.mrb[16].mxu0 %vm495_vm0, %v1073_v22 }
 0x4d4   : > { %1603 = vmatpush3.bf16.msra.mxu0 %v1251_v23  ;;  %1604 = vmatprep.mubr.msk.bf16.mxu0 %vm1694_vm1, %v1693_v0 }
 0x4f0   : > { %v778_v26 = vpop.f32.mrb[4].mxu0 }
 0x4f1   : > { %v784_v27 = vadd.f32 %v778_v26, %v731_v25  ;;  %v1558_v28 = vpop.f32.mrb[5].mxu0 }
 0x4f2   : > { %v781_v29 = vpop.f32.mrb[6].mxu0 }
 0x4f3   : > { %785 = vst.msk [vmem:[#allocation4 + $0x8] sm:$0xff] %vm495_vm0, %v784_v27  ;;  %v1559_v30 = vpop.f32.mrb[7].mxu0 }
 0x4f4   : > { %v1508_v30 = vld [vmem:[%s1970_s7] ss:$0 sm:$0xff] }
 0x4f8   : > { %v915_v34 = vpop.f32.mrb[8].mxu0 }
 0x4f9   : > { %v921_v35 = vadd.f32 %v915_v34, %v871_v33  ;;  %v1570_v37 = vpop.f32.mrb[9].mxu0 }
 0x4fa   : > { %v918_v38 = vpop.f32.mrb[10].mxu0  ;;  %v1077_v18 = vld [vmem:[#allocation4 + $0x8] sm:$0xff] }
 0x4fb   : > { %922 = vst.msk [vmem:[#allocation4 + $0x10] sm:$0xff] %vm495_vm0, %v921_v35  ;;  %v1571_v39 = vpop.f32.mrb[11].mxu0 }
 0x500   : > { %v1052_v42 = vpop.f32.mrb[12].mxu0 }
 0x501   : > { %v1058_v43 = vadd.f32 %v1052_v42, %v1008_v41  ;;  %v1582_v44 = vpop.f32.mrb[13].mxu0 }
 0x502   : > { %v1055_v45 = vpop.f32.mrb[14].mxu0  ;;  %v1180_v51 = vld [vmem:[#allocation4 + $0x10] sm:$0xff] }
 0x503   : > { %1059 = vst.msk [vmem:[#allocation4 + $0x18] sm:$0xff] %vm495_vm0, %v1058_v43  ;;  %v1583_v46 = vpop.f32.mrb[15].mxu0 }
 0x50a   : > { %v1238_v55 = vld [vmem:[#allocation4 + $0x18] sm:$0xff] }
 0x537   : > { %v1081_v16 = vpop.permute.xlu1 %1080 }
 0x538   : > { %v1083_v47 = vmul.f32 %v1081_v16, %v1077_v18 }
 0x53a   : > { %v1084_v48 = vpack.c.bf16 %v1083_v47, %v1083_v47 }
 0x53c   : > { %1587 = vmatmul.mubr.msk.bf16.vlgmr.msra.gmra.mrb[16].mxu1 %vm495_vm0, %v1084_v48 }
 0x53d   : > { %1597 = vmatpush3.bf16.msra.mxu1 %v1193_v49  ;;  %1598 = vmatprep.mubr.msk.bf16.mxu1 %vm1694_vm1, %v1693_v0 }
 0x53f   : > { %v1184_v50 = vpop.permute.xlu1 %1183 }
 0x540   : > { %v1186_v52 = vmul.f32 %v1184_v50, %v1180_v51 }
 0x542   : > { %v1187_v53 = vpack.c.bf16 %v1186_v52, %v1186_v52 }
 0x544   : > { %1599 = vmatmul.mubr.msk.bf16.vlgmr.msra.gmra.mrb[20].mxu1 %vm495_vm0, %v1187_v53 }
 0x547   : > { %v1242_v54 = vpop.permute.xlu0 %1241 }
 0x548   : > { %v1244_v56 = vmul.f32 %v1242_v54, %v1238_v55 }
 0x54a   : > { %v1245_v57 = vpack.c.bf16 %v1244_v56, %v1244_v56 }
 0x54c   : > { %1605 = vmatmul.mubr.msk.bf16.vlgmr.msra.gmra.mrb[20].mxu0 %vm495_vm0, %v1245_v57 }
 0x5a6   : > { %v1172_v58 = vpop.f32.mrb[16].mxu0 }
 0x5a7   : > { %v1594_v59 = vpop.f32.mrb[17].mxu0 }
 0x5a8   : > { %v1175_v60 = vpop.f32.mrb[18].mxu0 }
 0x5a9   : > { %v1595_v61 = vpop.f32.mrb[19].mxu0 }
 0x60f   : > { %v1126_v62 = vpop.f32.mrb[16].mxu1 }
 0x610   : > { %v1173_v63 = vadd.f32 %v1172_v58, %v1126_v62  ;;  %v1588_v0 = vpop.f32.mrb[17].mxu1 }
 0x611   : > { %v1129_v1 = vpop.f32.mrb[18].mxu1 }
 0x612   : > { %v1589_v2 = vpop.f32.mrb[19].mxu1 }
 0x617   : > { %v1229_v3 = vpop.f32.mrb[20].mxu1 }
 0x618   : > { %v1235_v4 = vadd.f32 %v1229_v3, %v1173_v63  ;;  %v1600_v5 = vpop.f32.mrb[21].mxu1 }
 0x619   : > { %v1232_v7 = vpop.f32.mrb[22].mxu1 }
 0x61a   : > { %v1601_v8 = vpop.f32.mrb[23].mxu1 }
 0x61f   : > { %v1287_v10 = vpop.f32.mrb[20].mxu0 }
 0x620   : > { %v1293_v11 = vadd.f32 %v1287_v10, %v1235_v4  ;;  %v1606_v12 = vpop.f32.mrb[21].mxu0 }
 0x621   : > { %v1290_v13 = vpop.f32.mrb[22].mxu0 }
 0x622   : > { %v1296_v15 = vadd.f32 %v1295_v9, %v1293_v11  ;;  %v1607_v17 = vpop.f32.mrb[23].mxu0 }
 0x624   : > { %v1304_v20 = vadd.f32 %v1507_v14, %v1296_v15 }
 0x626   : > { %v1306_v21 = vsel %vm1305_vm4, %v1304_v20, 0.0 }
 0x627   : > { %1307 = vadd.xlane.f32.xlu1 %v1306_v21 }
 0x6b4   : > { %v1308_v36 = vpop.xlane.xlu1 %1307 }
 0x6b5   : > { %v1310_v22 = vmul.f32 0.03125, %v1308_v36 }
 0x6b7   : > { %v1311_v23 = vsub.f32 %v1304_v20, %v1310_v22 }
 0x6b9   : > { %v1312_v24 = vmul.f32 %v1311_v23, %v1311_v23 }
 0x6bb   : > { %v1313_v25 = vsel %vm1305_vm4, %v1312_v24, 0.0 }
 0x6bc   : > { %1314 = vadd.xlane.f32.xlu0 %v1313_v25 }
 0x749   : > { %v1315_v26 = vpop.xlane.xlu0 %1314 }
 0x74a   : > { %v1316_v27 = vmul.f32 0.03125, %v1315_v26 }
 0x74c   : > { %v1317_v28 = vadd.f32 1e-05, %v1316_v27 }
 0x74e   : > { %1667 = vrsqrt.f32 %v1317_v28 }
 0x758   : > { %v1668_v29 = vpop.eup %1667 }
 0x759   : > { %v1319_v31 = vmul.f32 %v1668_v29, %v1311_v23 }
 0x75b   : > { %v1327_v33 = vmul.f32 %v1508_v30, %v1319_v31 }
 0x75d   : > { %v1335_v34 = vadd.f32 %v1509_v32, %v1327_v33 }
 0x75f   : > { %v1336_v35 = vpack.c.bf16 %v1335_v34, %v1335_v34 }
 0x761   : > { %1338 = vst.msk [vmem:[%s480_s14] sm:$0xf] %vm1337_vm5, %v1336_v35 }
 0x762 PF: > { %s19_s11 = sadd.s32 1, %s1691_s11   ;;  %s1973_s30 = smov %s1687_s10 }
 0x763   : > { %p16_p5 = scmp.ge.s32.totalorder %s19_s11, 4   ;;  %s1974_s10 = smov %s1976_s12 }
 0x765   :  { %18 = sbr.rel (!%p16_p5) target bundleno = 2 (0x2), region = 115 }

// kernel: transformer_forward.27
= control target key start
LH: loop header
LB: loop body
LE: loop exit
PB: predicated region body
PF: predicated region fallthrough
CT: control target
= control target key end

     0   :  { %v130_v0 = vmov 0.0   ;;  %vm131_vm0 = vmmov 0   ;;  %vm45_vm1 = vcmask 261120   ;;  %vm98_vm2 = vcmask 257024   ;;  %s170_s1 = inlined_call_operand.vmem [shape: bf16[1,32,32], index: 1, kind: input, shape index: {}]   ;;  %s171_s0 = inlined_call_operand.vmem [shape: bf16[16,32], index: 0, kind: input, shape index: {}]   ;;  %s172_s2 = inlined_call_operand.vmem [shape: f32[1,1,32], index: 2, kind: input, shape index: {}]   ;;  %s173_s3 = inlined_call_operand.vmem [shape: bf16[1,16,32], index: 3, kind: output, shape index: {}]  }
   0x1   :  { %117 = vmatprep.subr.bf16.mxu0 %v130_v0  ;;  %v127_v1 = vld [vmem:[%s170_s1] sm:$0xff]   ;;  %121 = vmatprep.mubr.msk.bf16.mxu0 %vm131_vm0, %v130_v0  ;;  %v128_v2 = vld [vmem:[%s170_s1 + $0x8] sm:$0xff]  }
   0x2   :  { %118 = vmatpush3.bf16.msra.mxu0 %v127_v1  ;;  %v129_v3 = vld [vmem:[%s171_s0] sm:$0xff]  }
   0x3   :  { %119 = vmatprep.subr.bf16.mxu0 %v130_v0  ;;  %v105_v4 = vld [vmem:[%s172_s2] ss:$0 sm:$0xff] }
   0x6   :  { %120 = vmatpush3.bf16.msra.mxu0 %v128_v2 }
   0x9   :  { %122 = vmatmul.mubr.msk.bf16.vlgmr.msra.gmra.mrb[0].mxu0 %vm45_vm1, %v129_v3 }
  0xdc   :  { %v83_v5 = vpop.f32.mrb[0].mxu0 }
  0xdd   :  { %v84_v6 = vadd.f32 %v105_v4, %v83_v5  ;;  %v123_v7 = vpop.f32.mrb[1].mxu0 }
  0xde   :  { %v86_v8 = vpop.f32.mrb[2].mxu0 }
  0xdf   :  { %v112_v9 = vpack.c.bf16 %v84_v6, %v84_v6  ;;  %v87_v10 = vadd.f32 %v105_v4, %v86_v8  ;;  %v124_v11 = vpop.f32.mrb[3].mxu0 }
  0xe1   :  { %99 = vst.msk [vmem:[%s173_s3] sm:$0xf] %vm98_vm2, %v112_v9  ;;  %v113_v12 = vpack.c.bf16 %v87_v10, %v87_v10 }
  0xe3   :  { %100 = vst.msk [vmem:[%s173_s3 + $0x4] sm:$0xf] %vm98_vm2, %v113_v12 }

// kernel: transformer_forward.37
= control target key start
LH: loop header
LB: loop body
LE: loop exit
PB: predicated region body
PF: predicated region fallthrough
CT: control target
= control target key end

     0   :  { %v157_v1 = vmov 0.0   ;;  %vm158_vm0 = vmmov 0   ;;  %s206_s0 = inlined_call_operand.vmem [shape: bf16[16,32], index: 0, kind: input, shape index: {}]   ;;  %s207_s1 = inlined_call_operand.vmem [shape: bf16[32,32], index: 1, kind: input, shape index: {}]   ;;  %s208_s2 = inlined_call_operand.vmem [shape: f32[1,32], index: 2, kind: input, shape index: {}]   ;;  %s209_s3 = inlined_call_operand.hbm [shape: f32[16,32], index: 3, kind: output, shape index: {}]  }
   0x1   :  { %v130_v0 = vld [vmem:[%s207_s1] sm:$0xff]   ;;  %117 = vmatprep.subr.bf16.mxu0 %v157_v1  ;;  %v131_v2 = vld [vmem:[%s207_s1 + $0x8] sm:$0xff]   ;;  %121 = vmatprep.mubr.msk.bf16.mxu0 %vm158_vm0, %v157_v1 }
   0x2   :  { %118 = vmatpush3.bf16.msra.mxu0 %v130_v0 }
   0x3   :  { %119 = vmatprep.subr.bf16.mxu0 %v157_v1 }
   0x4   :  { %8 = vsyncpa [#allocation3], 0  ;;  %v132_v3 = vld [vmem:[%s206_s0] sm:$0xff]   ;;  %vm46_vm1 = vcmask 261120   ;;  %s159_s20 = smov [#allocation2]  }
   0x5   :  { %v109_v4 = vld [vmem:[%s208_s2] ss:$0 sm:$0xff]  ;;  %s98_s21 = sshll.u32 %s159_s20, 4  ;;  %s99_s21 = int_to_ptr.vmem [resolvable:$true] %s98_s21 }
   0x6   :  { %120 = vmatpush3.bf16.msra.mxu0 %v131_v2  ;;  %s133_s1 = scalar_lea.vmem %s99_s21, 256  ;;  %p138_p1 = scmp.lt.s32.totalorder %s99_s21, %s99_s21 }
   0x7   :  { %p134_p0 = scmp.ne.s32.totalorder %s99_s21, %s133_s1  ;;  %p139_p2 = scmp.lt.s32.totalorder %s133_s1, %s133_s1 }
   0x9   :  { %122 = vmatmul.mubr.msk.bf16.vlgmr.msra.gmra.mrb[0].mxu0 %vm46_vm1, %v132_v3  ;;  %p140_p3 = por %p139_p2, %p138_p1 }
   0xb   :  { %p141_p4 = pnand %p140_p3, %p134_p0 }
  0xdc   :  { %v84_v5 = vpop.f32.mrb[0].mxu0 }
  0xdd   :  { %v85_v6 = vadd.f32 %v109_v4, %v84_v5  ;;  %v123_v7 = vpop.f32.mrb[1].mxu0 }
  0xde   :  { %v87_v8 = vpop.f32.mrb[2].mxu0 }
  0xdf   :  { %91 = vst.msk [vmem:[#allocation2] sm:$0xff] %vm46_vm1, %v85_v6  ;;  %v88_v9 = vadd.f32 %v109_v4, %v87_v8  ;;  %v124_v10 = vpop.f32.mrb[3].mxu0 }
  0xe1   :  { %92 = vst.msk [vmem:[#allocation2 + $0x8] sm:$0xff] %vm46_vm1, %v88_v9 }
  0xe2   :  { %144 = shalt.err (!%p141_p4)
}
  0xe3   :  { %s145_s22 = scalar_lea.hbm %s209_s3, 256 }
  0xe4   :  { %p146_p5 = scmp.ne.s32.totalorder %s209_s3, %s145_s22  ;;  %p149_p6 = scmp.lt.u32.totalorder %s145_s22, %s209_s3 }
  0xe6   :  { %p151_p7 = pnand %p149_p6, %p146_p5 }
  0xe8   :  { %154 = shalt.err (!%p151_p7)
}
  0xe9   :  { %s160_s27 = smov 128   ;;  %s161_s28 = smov 8  }
  0xea   :  { %104 = dma.vmem_to_hbm [thread:$0]  %s99_s21, 256, %s209_s3, [#allocation3], %s160_s27, %s160_s27, %s161_s28  }
  0xeb   :  { %155 = dma.done.wait [#allocation3], 256  }
  0xec   :  { %156 = vsyncadd [#allocation3], 4294967040 }
  0xed   :  { %108 = vsyncpa [#allocation3], 1 }

// kernel: transformer_forward.26
= control target key start
LH: loop header
LB: loop body
LE: loop exit
PB: predicated region body
PF: predicated region fallthrough
CT: control target
= control target key end

     0   :  { %s1765_s30 = smov 0   ;;  %s1767_s10 = smov 0   ;;  %s1978_s0 = inlined_call_operand.vmem [shape: bf16[3,2,8,32], index: 0, kind: input, shape index: {}, may-alias: {0,1,2}]   ;;  %s1979_s1 = inlined_call_operand.vmem [shape: bf16[3,2,8,32], index: 1, kind: input, shape index: {}, may-alias: {0,1,2}]   ;;  %s1980_s2 = inlined_call_operand.vmem [shape: bf16[3,2,8,32], index: 2, kind: input, shape index: {}, may-alias: {0,1,2}]   ;;  %s1981_s3 = inlined_call_operand.vmem [shape: f32[2,1,8], index: 3, kind: input, shape index: {}]   ;;  %s1982_s4 = inlined_call_operand.vmem [shape: bf16[2,8,32], index: 4, kind: input, shape index: {}]   ;;  %s1983_s5 = inlined_call_operand.vmem [shape: bf16[32,32], index: 5, kind: input, shape index: {}]   ;;  %s1984_s6 = inlined_call_operand.vmem [shape: f32[1,32], index: 6, kind: input, shape index: {}]   ;;  %s1985_s7 = inlined_call_operand.vmem [shape: f32[1,32], index: 7, kind: input, shape index: {}]   ;;  %s1986_s8 = inlined_call_operand.vmem [shape: f32[1,32], index: 8, kind: input, shape index: {}]   ;;  %s1987_s9 = inlined_call_operand.vmem [shape: bf16[2,8,32], index: 9, kind: output, shape index: {}]  }
   0x1   :  { %s1769_s11 = smov 0  }
   0x2 LB: > { %s38_s12 = sadd.s32 1, %s1701_s10  ;;  %p1496_p0 = scmp.ge.s32.totalorder %s1705_s11, 1  ;;  %s1705_s11 = sphi %s1769_s11, %s19_s11   ;;  %s1701_s10 = sphi %s1767_s10, %s1989_s10   ;;  %s1697_s30 = sphi %s1765_s30, %s1988_s30  }
   0x3   : > { %p40_p1 = scmp.ge.s32.totalorder %s38_s12, 2  ;;  %p369_p2 = scmp.lt.s32.totalorder %s1705_s11, 3 }
   0x5   : > { %s1991_s12 = smov (%p40_p1, %s38_s12), 0  ;;  %p370_p3 = pnand %p1496_p0, %p369_p2 }
   0x6   : > { %p438_p4 = scmp.lt.s32.totalorder (!%p370_p3), %s1697_s30, 1  ;;  %vm495_vm0 = vcmask (!%p370_p3), 64512   ;;  %v1707_v0 = vmov (!%p370_p3), 0.0   ;;  %vm1708_vm1 = vmmov (!%p370_p3), 0   ;;  %vm486_vm2 = vcmask (!%p370_p3), 7168   ;;  %s1712_s23 = smov (!%p370_p3), 120  }
   0x7   : > { %373 = sbr.rel (%p370_p3) target bundleno = 1890 (0x762), region = 56  ;;  %1549 = vmatprep.subr.bf16.mxu0 (!%p370_p3), %v1707_v0  ;;  %496 = vst.msk [vmem:[#allocation4] sm:$0xff] (!%p370_p3), %vm495_vm0, %v1707_v0  ;;  %497 = vst.msk [vmem:[#allocation4 + $0x8] sm:$0xff] (!%p370_p3), %vm495_vm0, %v1707_v0  ;;  %1551 = vmatprep.mubr.msk.bf16.mxu0 (!%p370_p3), %vm1708_vm1, %v1707_v0  ;;  %v1709_v4 = vmov (!%p370_p3), -1e+30   ;;  %v504_v5 = vlaneseq (!%p370_p3)  ;;  %v1711_v19 = vmov (!%p370_p3), 0  }
   0x8   : > { %498 = vst.msk [vmem:[#allocation4 + $0x10] sm:$0xff] (!%p370_p3), %vm495_vm0, %v1707_v0  ;;  %499 = vst.msk [vmem:[#allocation4 + $0x18] sm:$0xff] (!%p370_p3), %vm495_vm0, %v1707_v0  ;;  %1555 = vmatprep.subr.bf16.mxu1 (!%p370_p3), %v1707_v0  ;;  %1557 = vmatprep.mubr.msk.bf16.mxu1 (!%p370_p3), %vm1708_vm1, %v1707_v0  ;;  %v1710_v9 = vmov (!%p370_p3), -1e+09   ;;  %s1713_s24 = smov (!%p370_p3), 112   ;;  %s1714_s25 = smov (!%p370_p3), 104  }
   0x9   : > { %487 = vst.msk [vmem:[#allocation2] sm:$0xff] (!%p370_p3), %vm486_vm2, %v1709_v4  ;;  %488 = vst.msk [vmem:[#allocation2 + $0x8] sm:$0xff] (!%p370_p3), %vm486_vm2, %v1709_v4  ;;  %v505_v6 = vshrl.u32 (!%p370_p3), %v504_v5, 7  ;;  %v510_v7 = vand.u32 (!%p370_p3), 127, %v504_v5  ;;  %1653 = vset.pattern.permute.xlu0 (!%p370_p3), %v1711_v19  ;;  %1654 = vset.pattern.permute.xlu1 (!%p370_p3), %v1711_v19  ;;  %vm607_vm4 = vcmask (!%p370_p3), 1043456   ;;  %vm1318_vm5 = vcmask (!%p370_p3), 261120  }
   0xa   : > { %489 = vst.msk [vmem:[#allocation2 + $0x10] sm:$0xff] (!%p370_p3), %vm486_vm2, %v1709_v4  ;;  %490 = vst.msk [vmem:[#allocation2 + $0x18] sm:$0xff] (!%p370_p3), %vm486_vm2, %v1709_v4  ;;  %vm1350_vm6 = vcmask (!%p370_p3), 257024  }
   0xb   : > { %491 = vst.msk [vmem:[#allocation3] sm:$0xff] (!%p370_p3), %vm486_vm2, %v1707_v0  ;;  %492 = vst.msk [vmem:[#allocation3 + $0x8] sm:$0xff] (!%p370_p3), %vm486_vm2, %v1707_v0  ;;  %vm514_vm3 = vcmp.le.s32.totalorder (!%p370_p3), %v510_v7, %v505_v6 }
   0xc   : > { %493 = vst.msk [vmem:[#allocation3 + $0x10] sm:$0xff] (!%p370_p3), %vm486_vm2, %v1707_v0  ;;  %494 = vst.msk [vmem:[#allocation3 + $0x18] sm:$0xff] (!%p370_p3), %vm486_vm2, %v1707_v0  ;;  %v515_v10 = vsel (!%p370_p3), %vm514_vm3, 0.0, %v1710_v9 }
   0xe   : > { %s1993_s30 = smov (!%p438_p4, %s1697_s30), 1 }
   0xf   : > { %s1797_s13 = sshll.u32 %s1993_s30, 2  ;;  %s466_s22 = scalar_lea.vmem %s1981_s3, %s1993_s30 }
  0x10   : > { %s1417_s16 = scalar_lea.vmem %s1979_s1, %s1797_s13  ;;  %s444_s19 = scalar_lea.vmem %s1978_s0, %s1797_s13  ;;  %v1504_v8 = vld [vmem:[%s466_s22] ss:$0 sm:$0xff]  ;;  %v713_v4 = vld [vmem:[#allocation2 + $0x8] sm:$0xff] }
  0x11   : > { %v1502_v1 = vld [vmem:[%s1417_s16 + $0x8] sm:$0xf]  ;;  %v500_v3 = vld [vmem:[%s444_s19] sm:$0xf]  ;;  %v1827_v11 = vadd.f32 %v1504_v8, %v515_v10  ;;  %s1421_s28 = scalar_lea.vmem %s1980_s2, %s1797_s13  ;;  %v853_v8 = vld [vmem:[#allocation2 + $0x10] sm:$0xff]  ;;  %s473_s22 = scalar_lea.vmem %s1982_s4, %s1797_s13 }
  0x12   : > { %v528_v2 = vsel %vm495_vm0, %v1502_v1, 0  ;;  %v1508_v20 = vcombine.low %v1502_v1, %v1502_v1  ;;  %v1507_v21 = vcombine.low %v500_v3, %v500_v3  ;;  %v1837_v22 = vld [vmem:[#allocation2] sm:$0xff]  ;;  %v1851_v26 = vld [vmem:[%s1421_s28 + $0x10] sm:$0xf]  ;;  %s480_s14 = scalar_lea.vmem %s1987_s9, %s1797_s13 }
  0x13   : > { %1550 = vmatpush3.bf16.xpose.msra.mxu0 %v528_v2  ;;  %v609_v27 = vsel %vm607_vm4, %v1851_v26, 0 }
  0x14   : > { %1567 = vmatprep.subr.bf16.mxu0 %v1707_v0  ;;  %662 = vrot.lane.b32.xlu1 %v1508_v20, %s1712_s23 }
  0x15   : > { %1556 = vmatpush3.bf16.msra.mxu1 %v609_v27 }
  0x16   : > { %1561 = vmatprep.subr.bf16.mxu1 %v1707_v0 }
  0x18   : > { %657 = vrot.lane.b32.xlu1 %v1507_v21, %s1712_s23 }
  0x1a   : > { %1552 = vmatmul.mubr.msk.bf16.vlgmr.msra.gmra.mrb[0].mxu0 %vm495_vm0, %v500_v3 }
  0x1b   : > { %1569 = vmatprep.mubr.msk.bf16.mxu0 %vm1708_vm1, %v1707_v0 }
  0x1c   : > { %802 = vrot.lane.b32.xlu1 %v1508_v20, %s1713_s24 }
  0x20   : > { %800 = vrot.lane.b32.xlu1 %v1507_v21, %s1713_s24 }
  0x24   : > { %939 = vrot.lane.b32.xlu1 %v1508_v20, %s1714_s25 }
  0x28   : > { %937 = vrot.lane.b32.xlu1 %v1507_v21, %s1714_s25 }
  0x86   : > { %v663_v31 = vpop.permute.xlu1 %662 }
  0x87   : > { %v668_v34 = vsel %vm495_vm0, %v663_v31, 0 }
  0x8a   : > { %v658_v32 = vpop.permute.xlu1 %657 }
  0x8e   : > { %v803_v36 = vpop.permute.xlu1 %802 }
  0x8f   : > { %v808_v38 = vsel %vm495_vm0, %v803_v36, 0 }
  0x92   : > { %v801_v37 = vpop.permute.xlu1 %800 }
  0x96   : > { %v940_v39 = vpop.permute.xlu1 %939 }
  0x97   : > { %v945_v40 = vsel %vm495_vm0, %v940_v39, 0 }
  0x9a   : > { %v938_v41 = vpop.permute.xlu1 %937 }
  0xed   : > { %v564_v12 = vpop.f32.mrb[0].mxu0 }
  0xee   : > { %v570_v13 = vmul.f32 0.35355338, %v564_v12  ;;  %v1553_v14 = vpop.f32.mrb[1].mxu0 }
  0xef   : > { %v567_v15 = vpop.f32.mrb[2].mxu0 }
  0xf0   : > { %v1554_v16 = vpop.f32.mrb[3].mxu0  ;;  %v571_v17 = vadd.f32 %v570_v13, %v1827_v11  ;;  %v990_v13 = vld [vmem:[#allocation2 + $0x18] sm:$0xff]  ;;  %v1510_v15 = vcombine.low %v1851_v26, %v1851_v26 }
  0xf2   : > { %v573_v18 = vsel %vm495_vm0, %v571_v17, -inf }
  0xf3   : > { %574 = vmax.xlane.f32.xlu0 %v573_v18 }
 0x180   : > { %v575_v23 = vpop.xlane.xlu0 %574 }
 0x181   : > { %v1840_v24 = vmax.f32 %v1837_v22, %v575_v23 }
 0x183   : > { %v577_v25 = vsub.f32 %v1837_v22, %v1840_v24  ;;  %653 = vst.msk [vmem:[#allocation2] sm:$0xff] %vm486_vm2, %v1840_v24  ;;  %582 = vperm.xlu0 %1653, %v1840_v24  }
 0x202   : > { %v583_v28 = vpop.permute.xlu0 %582 }
 0x203   : > { %v585_v29 = vsub.f32 %v571_v17, %v583_v28 }
 0x205   : > { %v586_v30 = vmul.f32 1.442695, %v585_v29 }
 0x207   : > { %1657 = vpow2.f32 %v586_v30 }
 0x211   : > { %v1856_v33 = vpop.eup %1657 }
 0x212   : > { %v603_v35 = vpack.c.bf16 %v1856_v33, %v1856_v33  ;;  %v590_v17 = vsel %vm495_vm0, %v1856_v33, 0.0 }
 0x214   : > { %1558 = vmatmul.mubr.msk.bf16.vlgmr.msra.gmra.mrb[0].mxu1 %vm495_vm0, %v603_v35 }
 0x215   : > { %1562 = vmatpush3.bf16.xpose.msra.mxu1 %v668_v34  ;;  %1563 = vmatprep.mubr.msk.bf16.mxu1 %vm1708_vm1, %v1707_v0 }
 0x216   : > { %1573 = vmatprep.subr.bf16.mxu1 %v1707_v0 }
 0x21c   : > { %1564 = vmatmul.mubr.msk.bf16.vlgmr.msra.gmra.mrb[4].mxu1 %vm495_vm0, %v658_v32 }
 0x21d   : > { %1574 = vmatpush3.bf16.xpose.msra.mxu1 %v808_v38  ;;  %1575 = vmatprep.mubr.msk.bf16.mxu1 %vm1708_vm1, %v1707_v0 }
 0x21e   : > { %1585 = vmatprep.subr.bf16.mxu1 %v1707_v0 }
 0x224   : > { %1576 = vmatmul.mubr.msk.bf16.vlgmr.msra.gmra.mrb[8].mxu1 %vm495_vm0, %v801_v37 }
 0x225   : > { %1586 = vmatpush3.bf16.xpose.msra.mxu1 %v945_v40  ;;  %1587 = vmatprep.mubr.msk.bf16.mxu1 %vm1708_vm1, %v1707_v0 }
 0x226   : > { %1597 = vmatprep.subr.bf16.mxu1 %v1707_v0 }
 0x22c   : > { %1588 = vmatmul.mubr.msk.bf16.vlgmr.msra.gmra.mrb[12].mxu1 %vm495_vm0, %v938_v41 }
 0x22d   : > { %1599 = vmatprep.mubr.msk.bf16.mxu1 %vm1708_vm1, %v1707_v0 }
 0x2e7   : > { %v1878_v42 = vpop.f32.mrb[0].mxu1 }
 0x2e8   : > { %v1559_v43 = vpop.f32.mrb[1].mxu1 }
 0x2e9   : > { %v648_v44 = vpop.f32.mrb[2].mxu1 }
 0x2ea   : > { %v1560_v45 = vpop.f32.mrb[3].mxu1 }
 0x2ef   : > { %v704_v46 = vpop.f32.mrb[4].mxu1 }
 0x2f0   : > { %v710_v47 = vmul.f32 0.35355338, %v704_v46  ;;  %v1565_v48 = vpop.f32.mrb[5].mxu1  ;;  %v578_v46 = vmul.f32 1.442695, %v577_v25 }
 0x2f1   : > { %v707_v49 = vpop.f32.mrb[6].mxu1 }
 0x2f2   : > { %v1566_v50 = vpop.f32.mrb[7].mxu1  ;;  %v711_v51 = vadd.f32 %v710_v47, %v1827_v11 }
 0x2f4   : > { %v714_v52 = vsel %vm495_vm0, %v711_v51, -inf }
 0x2f5   : > { %715 = vmax.xlane.f32.xlu1 %v714_v52  ;;  %v588_v52 = vld [vmem:[#allocation3] sm:$0xff] }
 0x2f7   : > { %v844_v53 = vpop.f32.mrb[8].mxu1 }
 0x2f8   : > { %v850_v54 = vmul.f32 0.35355338, %v844_v53  ;;  %v1577_v55 = vpop.f32.mrb[9].mxu1 }
 0x2f9   : > { %v847_v56 = vpop.f32.mrb[10].mxu1 }
 0x2fa   : > { %v1578_v57 = vpop.f32.mrb[11].mxu1  ;;  %v851_v58 = vadd.f32 %v850_v54, %v1827_v11 }
 0x2fb   : > { %v1087_v57 = vld [vmem:[%s1983_s5] sm:$0xf] }
 0x2fc   : > { %v854_v59 = vsel %vm495_vm0, %v851_v58, -inf }
 0x2fd   : > { %855 = vmax.xlane.f32.xlu0 %v854_v59  ;;  %v730_v59 = vld [vmem:[#allocation3 + $0x8] sm:$0xff] }
 0x2ff   : > { %v981_v60 = vpop.f32.mrb[12].mxu1 }
 0x300   : > { %v987_v61 = vmul.f32 0.35355338, %v981_v60  ;;  %v1589_v62 = vpop.f32.mrb[13].mxu1 }
 0x301   : > { %v984_v63 = vpop.f32.mrb[14].mxu1 }
 0x302   : > { %v1590_v1 = vpop.f32.mrb[15].mxu1  ;;  %v988_v2 = vadd.f32 %v987_v61, %v1827_v11  ;;  %v870_v63 = vld [vmem:[#allocation3 + $0x10] sm:$0xff] }
 0x304   : > { %v991_v3 = vsel %vm495_vm0, %v988_v2, -inf }
 0x305   : > { %992 = vmax.xlane.f32.xlu1 %v991_v3 }
 0x382   : > { %v716_v5 = vpop.xlane.xlu1 %715 }
 0x383   : > { %v717_v6 = vmax.f32 %v713_v4, %v716_v5  ;;  %v1007_v5 = vld [vmem:[#allocation3 + $0x18] sm:$0xff] }
 0x385   : > { %v718_v7 = vsub.f32 %v713_v4, %v717_v6  ;;  %799 = vst.msk [vmem:[#allocation2 + $0x8] sm:$0xff] %vm486_vm2, %v717_v6  ;;  %723 = vperm.xlu1 %1654, %v717_v6  }
 0x387   : > { %v719_v44 = vmul.f32 1.442695, %v718_v7 }
 0x38a   : > { %v856_v9 = vpop.xlane.xlu0 %855 }
 0x38b   : > { %v857_v10 = vmax.f32 %v853_v8, %v856_v9  ;;  %v596_v9 = vld [vmem:[#allocation4] sm:$0xff] }
 0x38d   : > { %v858_v12 = vsub.f32 %v853_v8, %v857_v10  ;;  %936 = vst.msk [vmem:[#allocation2 + $0x10] sm:$0xff] %vm486_vm2, %v857_v10  ;;  %863 = vperm.xlu0 %1653, %v857_v10  }
 0x38f   : > { %v859_v48 = vmul.f32 1.442695, %v858_v12 }
 0x392   : > { %v993_v14 = vpop.xlane.xlu1 %992 }
 0x393   : > { %v994_v11 = vmax.f32 %v990_v13, %v993_v14 }
 0x395   : > { %v995_v16 = vsub.f32 %v990_v13, %v994_v11  ;;  %1073 = vst.msk [vmem:[#allocation2 + $0x18] sm:$0xff] %vm486_vm2, %v994_v11  ;;  %1000 = vperm.xlu1 %1654, %v994_v11   ;;  %v1098_v11 = vld [vmem:[%s1983_s5 + $0x4] sm:$0xf] }
 0x397   : > { %v996_v47 = vmul.f32 1.442695, %v995_v16 }
 0x399   : > { %749 = vrot.lane.b32.xlu1 %v1510_v15, %s1712_s23 }
 0x39d   : > { %886 = vrot.lane.b32.xlu1 %v1510_v15, %s1713_s24 }
 0x3a1   : > { %1023 = vrot.lane.b32.xlu1 %v1510_v15, %s1714_s25  ;;  %v1103_v15 = vsel %vm607_vm4, %v1098_v11, 0  ;;  %v1307_v11 = vld [vmem:[%s473_s22] sm:$0xf] }
 0x3a2   : > { %1598 = vmatpush3.bf16.msra.mxu1 %v1103_v15  ;;  %v1308_v15 = vunpack.c.l.bf16 %v1307_v11 }
 0x3a3   : > { %1609 = vmatprep.subr.bf16.mxu1 %v1707_v0 }
 0x3ac   : > { %591 = vadd.xlane.f32.xlu0 %v590_v17 }
 0x404   : > { %v724_v18 = vpop.permute.xlu1 %723 }
 0x405   : > { %v726_v19 = vsub.f32 %v711_v51, %v724_v18 }
 0x407   : > { %v727_v20 = vmul.f32 1.442695, %v726_v19 }
 0x409   : > { %1659 = vpow2.f32 %v727_v20 }
 0x40c   : > { %v864_v21 = vpop.permute.xlu0 %863 }
 0x40d   : > { %v866_v23 = vsub.f32 %v851_v58, %v864_v21  ;;  %v1149_v58 = vsel %vm607_vm4, %v1087_v57, 0 }
 0x40f   : > { %v867_v26 = vmul.f32 1.442695, %v866_v23 }
 0x411   : > { %1661 = vpow2.f32 %v867_v26 }
 0x413   : > { %v1660_v27 = vpop.eup %1659 }
 0x414   : > { %v1001_v28 = vpop.permute.xlu1 %1000  ;;  %v732_v29 = vsel %vm495_vm0, %v1660_v27, 0.0  ;;  %v745_v35 = vpack.c.bf16 %v1660_v27, %v1660_v27  ;;  %v1259_v27 = vld [vmem:[%s1983_s5 + $0xc] sm:$0xf] }
 0x415   : > { %v1003_v30 = vsub.f32 %v988_v2, %v1001_v28  ;;  %733 = vadd.xlane.f32.xlu1 %v732_v29  ;;  %v1264_v29 = vsel %vm607_vm4, %v1259_v27, 0 }
 0x417   : > { %v1004_v31 = vmul.f32 1.442695, %v1003_v30  ;;  %v738_v30 = vld [vmem:[#allocation4 + $0x8] sm:$0xff] }
 0x418   : > { %v750_v32 = vpop.permute.xlu1 %749 }
 0x419   : > { %1663 = vpow2.f32 %v1004_v31  ;;  %v755_v33 = vsel %vm607_vm4, %v750_v32, 0 }
 0x41a   : > { %1568 = vmatpush3.bf16.msra.mxu0 %v755_v33  ;;  %1665 = vpow2.f32 %v719_v44 }
 0x41b   : > { %v1662_v34 = vpop.eup %1661  ;;  %1579 = vmatprep.subr.bf16.mxu0 %v1707_v0  ;;  %1667 = vpow2.f32 %v578_v46  ;;  %v1015_v46 = vld [vmem:[#allocation4 + $0x18] sm:$0xff] }
 0x41c   : > { %v872_v36 = vsel %vm495_vm0, %v1662_v34, 0.0  ;;  %v887_v37 = vpop.permute.xlu1 %886  ;;  %v885_v41 = vpack.c.bf16 %v1662_v34, %v1662_v34  ;;  %1669 = vpow2.f32 %v996_v47 }
 0x41d   : > { %1570 = vmatmul.mubr.msk.bf16.vlgmr.msra.gmra.mrb[4].mxu0 %vm495_vm0, %v745_v35  ;;  %873 = vadd.xlane.f32.xlu0 %v872_v36  ;;  %v892_v38 = vsel %vm607_vm4, %v887_v37, 0  ;;  %1671 = vpow2.f32 %v859_v48  ;;  %v878_v37 = vld [vmem:[#allocation4 + $0x10] sm:$0xff] }
 0x41e   : > { %1580 = vmatpush3.bf16.msra.mxu0 %v892_v38  ;;  %1581 = vmatprep.mubr.msk.bf16.mxu0 %vm1708_vm1, %v1707_v0 }
 0x41f   : > { %1591 = vmatprep.subr.bf16.mxu0 %v1707_v0 }
 0x420   : > { %v1024_v39 = vpop.permute.xlu1 %1023 }
 0x421   : > { %v1029_v43 = vsel %vm607_vm4, %v1024_v39, 0 }
 0x423   : > { %v1664_v40 = vpop.eup %1663 }
 0x424   : > { %v1009_v45 = vsel %vm495_vm0, %v1664_v40, 0.0  ;;  %v1022_v49 = vpack.c.bf16 %v1664_v40, %v1664_v40  ;;  %v1666_v50 = vpop.eup %1665 }
 0x425   : > { %1010 = vadd.xlane.f32.xlu1 %v1009_v45  ;;  %1582 = vmatmul.mubr.msk.bf16.vlgmr.msra.gmra.mrb[8].mxu0 %vm495_vm0, %v885_v41  ;;  %v1668_v51 = vpop.eup %1667  ;;  %v731_v60 = vmul.f32 %v1666_v50, %v730_v59 }
 0x426   : > { %1592 = vmatpush3.bf16.msra.mxu0 %v1029_v43  ;;  %1593 = vmatprep.mubr.msk.bf16.mxu0 %vm1708_vm1, %v1707_v0  ;;  %v1670_v22 = vpop.eup %1669  ;;  %v589_v24 = vmul.f32 %v1668_v51, %v588_v52 }
 0x427   : > { %1603 = vmatprep.subr.bf16.mxu0 %v1707_v0  ;;  %v1672_v25 = vpop.eup %1671  ;;  %v1008_v6 = vmul.f32 %v1670_v22, %v1007_v5 }
 0x428   : > { %v871_v1 = vmul.f32 %v1672_v25, %v870_v63 }
 0x42d   : > { %1594 = vmatmul.mubr.msk.bf16.vlgmr.msra.gmra.mrb[12].mxu0 %vm495_vm0, %v1022_v49 }
 0x42e   : > { %1605 = vmatprep.mubr.msk.bf16.mxu0 %vm1708_vm1, %v1707_v0  ;;  %1604 = vmatpush3.bf16.msra.mxu0 %v1149_v58 }
 0x42f   : > { %1615 = vmatprep.subr.bf16.mxu0 %v1707_v0 }
 0x433   : > { %741 = vperm.xlu0 %1653, %v1666_v50  }
 0x436   : > { %599 = vperm.xlu1 %1654, %v1668_v51  }
 0x437   : > { %1018 = vperm.xlu0 %1653, %v1670_v22  }
 0x439   : > { %v592_v53 = vpop.xlane.xlu0 %591 }
 0x43a   : > { %v593_v54 = vadd.f32 %v592_v53, %v589_v24  ;;  %881 = vperm.xlu1 %1654, %v1672_v25   ;;  %v1201_v25 = vld [vmem:[%s1983_s5 + $0x8] sm:$0xf] }
 0x43c   : > { %595 = vst.msk [vmem:[#allocation3] sm:$0xff] %vm486_vm2, %v593_v54 }
 0x443   : > { %v1077_v55 = vld [vmem:[#allocation3] sm:$0xff] }
 0x444   : > { %1673 = vrcp.f32 %v1077_v55  ;;  %v1206_v55 = vsel %vm607_vm4, %v1201_v25, 0 }
 0x44e   : > { %v1674_v56 = vpop.eup %1673 }
 0x44f   : > { %1082 = vperm.xlu0 %1653, %v1674_v56  }
 0x4a2   : > { %v734_v61 = vpop.xlane.xlu1 %733 }
 0x4a3   : > { %v735_v62 = vadd.f32 %v734_v61, %v731_v60 }
 0x4a5   : > { %736 = vst.msk [vmem:[#allocation3 + $0x8] sm:$0xff] %vm486_vm2, %v735_v62 }
 0x4aa   : > { %v874_v2 = vpop.xlane.xlu0 %873 }
 0x4ab   : > { %v875_v3 = vadd.f32 %v874_v2, %v871_v1 }
 0x4ac   : > { %v1088_v4 = vld [vmem:[#allocation3 + $0x8] sm:$0xff] }
 0x4ad   : > { %876 = vst.msk [vmem:[#allocation3 + $0x10] sm:$0xff] %vm486_vm2, %v875_v3  ;;  %1675 = vrcp.f32 %v1088_v4 }
 0x4b2   : > { %v1011_v7 = vpop.xlane.xlu1 %1010  ;;  %v742_v19 = vpop.permute.xlu0 %741 }
 0x4b3   : > { %v1012_v8 = vadd.f32 %v1011_v7, %v1008_v6  ;;  %v744_v31 = vmul.f32 %v742_v19, %v738_v30 }
 0x4b4   : > { %v1191_v10 = vld [vmem:[#allocation3 + $0x10] sm:$0xff] }
 0x4b5   : > { %1013 = vst.msk [vmem:[#allocation3 + $0x18] sm:$0xff] %vm486_vm2, %v1012_v8  ;;  %1677 = vrcp.f32 %v1191_v10 }
 0x4b6   : > { %v600_v12 = vpop.permute.xlu1 %599  ;;  %v1019_v21 = vpop.permute.xlu0 %1018 }
 0x4b7   : > { %v1676_v13 = vpop.eup %1675  ;;  %v602_v14 = vmul.f32 %v600_v12, %v596_v9  ;;  %v1021_v47 = vmul.f32 %v1019_v21, %v1015_v46 }
 0x4b8   : > { %1093 = vperm.xlu1 %1654, %v1676_v13  }
 0x4b9   : > { %v651_v16 = vadd.f32 %v1878_v42, %v602_v14 }
 0x4ba   : > { %v882_v38 = vpop.permute.xlu1 %881 }
 0x4bb   : > { %652 = vst.msk [vmem:[#allocation4] sm:$0xff] %vm495_vm0, %v651_v16  ;;  %v884_v39 = vmul.f32 %v882_v38, %v878_v37  ;;  %v1522_v38 = vld [vmem:[%s1986_s8] ss:$0 sm:$0xff] }
 0x4bc   : > { %v1249_v17 = vld [vmem:[#allocation3 + $0x18] sm:$0xff] }
 0x4bd   : > { %1679 = vrcp.f32 %v1249_v17 }
 0x4bf   : > { %v1678_v18 = vpop.eup %1677 }
 0x4c0   : > { %1196 = vperm.xlu1 %1654, %v1678_v18  }
 0x4c2   : > { %v1079_v23 = vld [vmem:[#allocation4] sm:$0xff] }
 0x4c7   : > { %v1680_v20 = vpop.eup %1679 }
 0x4c8   : > { %1254 = vperm.xlu0 %1653, %v1680_v20   ;;  %v1520_v20 = vld [vmem:[%s1984_s6] ss:$0 sm:$0xff] }
 0x4ce   : > { %v1083_v26 = vpop.permute.xlu0 %1082 }
 0x4cf   : > { %v1085_v42 = vmul.f32 %v1083_v26, %v1079_v23 }
 0x4d1   : > { %v1086_v28 = vpack.c.bf16 %v1085_v42, %v1085_v42 }
 0x4d3   : > { %1606 = vmatmul.mubr.msk.bf16.vlgmr.msra.gmra.mrb[16].mxu0 %vm495_vm0, %v1086_v28 }
 0x4d4   : > { %1616 = vmatpush3.bf16.msra.mxu0 %v1264_v29  ;;  %1617 = vmatprep.mubr.msk.bf16.mxu0 %vm1708_vm1, %v1707_v0 }
 0x4f0   : > { %v791_v32 = vpop.f32.mrb[4].mxu0 }
 0x4f1   : > { %v797_v33 = vadd.f32 %v791_v32, %v744_v31  ;;  %v1571_v34 = vpop.f32.mrb[5].mxu0 }
 0x4f2   : > { %v794_v35 = vpop.f32.mrb[6].mxu0 }
 0x4f3   : > { %798 = vst.msk [vmem:[#allocation4 + $0x8] sm:$0xff] %vm495_vm0, %v797_v33  ;;  %v1572_v36 = vpop.f32.mrb[7].mxu0 }
 0x4f4   : > { %v1521_v36 = vld [vmem:[%s1985_s7] ss:$0 sm:$0xff] }
 0x4f8   : > { %v928_v40 = vpop.f32.mrb[8].mxu0 }
 0x4f9   : > { %v934_v41 = vadd.f32 %v928_v40, %v884_v39  ;;  %v1583_v43 = vpop.f32.mrb[9].mxu0 }
 0x4fa   : > { %v931_v44 = vpop.f32.mrb[10].mxu0  ;;  %v1090_v24 = vld [vmem:[#allocation4 + $0x8] sm:$0xff] }
 0x4fb   : > { %935 = vst.msk [vmem:[#allocation4 + $0x10] sm:$0xff] %vm495_vm0, %v934_v41  ;;  %v1584_v45 = vpop.f32.mrb[11].mxu0 }
 0x500   : > { %v1065_v48 = vpop.f32.mrb[12].mxu0 }
 0x501   : > { %v1071_v49 = vadd.f32 %v1065_v48, %v1021_v47  ;;  %v1595_v50 = vpop.f32.mrb[13].mxu0 }
 0x502   : > { %v1068_v51 = vpop.f32.mrb[14].mxu0  ;;  %v1193_v57 = vld [vmem:[#allocation4 + $0x10] sm:$0xff] }
 0x503   : > { %1072 = vst.msk [vmem:[#allocation4 + $0x18] sm:$0xff] %vm495_vm0, %v1071_v49  ;;  %v1596_v52 = vpop.f32.mrb[15].mxu0 }
 0x50a   : > { %v1251_v61 = vld [vmem:[#allocation4 + $0x18] sm:$0xff] }
 0x537   : > { %v1094_v22 = vpop.permute.xlu1 %1093 }
 0x538   : > { %v1096_v53 = vmul.f32 %v1094_v22, %v1090_v24 }
 0x53a   : > { %v1097_v54 = vpack.c.bf16 %v1096_v53, %v1096_v53 }
 0x53c   : > { %1600 = vmatmul.mubr.msk.bf16.vlgmr.msra.gmra.mrb[16].mxu1 %vm495_vm0, %v1097_v54 }
 0x53d   : > { %1610 = vmatpush3.bf16.msra.mxu1 %v1206_v55  ;;  %1611 = vmatprep.mubr.msk.bf16.mxu1 %vm1708_vm1, %v1707_v0 }
 0x53f   : > { %v1197_v56 = vpop.permute.xlu1 %1196 }
 0x540   : > { %v1199_v58 = vmul.f32 %v1197_v56, %v1193_v57 }
 0x542   : > { %v1200_v59 = vpack.c.bf16 %v1199_v58, %v1199_v58 }
 0x544   : > { %1612 = vmatmul.mubr.msk.bf16.vlgmr.msra.gmra.mrb[20].mxu1 %vm495_vm0, %v1200_v59 }
 0x547   : > { %v1255_v60 = vpop.permute.xlu0 %1254 }
 0x548   : > { %v1257_v62 = vmul.f32 %v1255_v60, %v1251_v61 }
 0x54a   : > { %v1258_v63 = vpack.c.bf16 %v1257_v62, %v1257_v62 }
 0x54c   : > { %1618 = vmatmul.mubr.msk.bf16.vlgmr.msra.gmra.mrb[20].mxu0 %vm495_vm0, %v1258_v63 }
 0x5a6   : > { %v1185_v1 = vpop.f32.mrb[16].mxu0 }
 0x5a7   : > { %v1607_v2 = vpop.f32.mrb[17].mxu0 }
 0x5a8   : > { %v1188_v3 = vpop.f32.mrb[18].mxu0 }
 0x5a9   : > { %v1608_v4 = vpop.f32.mrb[19].mxu0 }
 0x60f   : > { %v1139_v5 = vpop.f32.mrb[16].mxu1 }
 0x610   : > { %v1186_v6 = vadd.f32 %v1185_v1, %v1139_v5  ;;  %v1601_v0 = vpop.f32.mrb[17].mxu1 }
 0x611   : > { %v1142_v7 = vpop.f32.mrb[18].mxu1 }
 0x612   : > { %v1602_v8 = vpop.f32.mrb[19].mxu1 }
 0x617   : > { %v1242_v9 = vpop.f32.mrb[20].mxu1 }
 0x618   : > { %v1248_v10 = vadd.f32 %v1242_v9, %v1186_v6  ;;  %v1613_v12 = vpop.f32.mrb[21].mxu1 }
 0x619   : > { %v1245_v13 = vpop.f32.mrb[22].mxu1 }
 0x61a   : > { %v1614_v14 = vpop.f32.mrb[23].mxu1 }
 0x61f   : > { %v1300_v16 = vpop.f32.mrb[20].mxu0 }
 0x620   : > { %v1306_v17 = vadd.f32 %v1300_v16, %v1248_v10  ;;  %v1619_v18 = vpop.f32.mrb[21].mxu0 }
 0x621   : > { %v1303_v19 = vpop.f32.mrb[22].mxu0 }
 0x622   : > { %v1309_v21 = vadd.f32 %v1308_v15, %v1306_v17  ;;  %v1620_v23 = vpop.f32.mrb[23].mxu0 }
 0x624   : > { %v1317_v26 = vadd.f32 %v1520_v20, %v1309_v21 }
 0x626   : > { %v1319_v27 = vsel %vm1318_vm5, %v1317_v26, 0.0 }
 0x627   : > { %1320 = vadd.xlane.f32.xlu1 %v1319_v27 }
 0x6b4   : > { %v1321_v42 = vpop.xlane.xlu1 %1320 }
 0x6b5   : > { %v1323_v28 = vmul.f32 0.03125, %v1321_v42 }
 0x6b7   : > { %v1324_v29 = vsub.f32 %v1317_v26, %v1323_v28 }
 0x6b9   : > { %v1325_v30 = vmul.f32 %v1324_v29, %v1324_v29 }
 0x6bb   : > { %v1326_v31 = vsel %vm1318_vm5, %v1325_v30, 0.0 }
 0x6bc   : > { %1327 = vadd.xlane.f32.xlu0 %v1326_v31 }
 0x749   : > { %v1328_v32 = vpop.xlane.xlu0 %1327 }
 0x74a   : > { %v1329_v33 = vmul.f32 0.03125, %v1328_v32 }
 0x74c   : > { %v1330_v34 = vadd.f32 1e-05, %v1329_v33 }
 0x74e   : > { %1681 = vrsqrt.f32 %v1330_v34 }
 0x758   : > { %v1682_v35 = vpop.eup %1681 }
 0x759   : > { %v1332_v37 = vmul.f32 %v1682_v35, %v1324_v29 }
 0x75b   : > { %v1340_v39 = vmul.f32 %v1521_v36, %v1332_v37 }
 0x75d   : > { %v1348_v40 = vadd.f32 %v1522_v38, %v1340_v39 }
 0x75f   : > { %v1349_v41 = vpack.c.bf16 %v1348_v40, %v1348_v40 }
 0x761   : > { %1351 = vst.msk [vmem:[%s480_s14] sm:$0xf] %vm1350_vm6, %v1349_v41 }
 0x762 PF: > { %s19_s11 = sadd.s32 1, %s1705_s11   ;;  %s1988_s30 = smov %s1701_s10 }
 0x763   : > { %p16_p5 = scmp.ge.s32.totalorder %s19_s11, 4   ;;  %s1989_s10 = smov %s1991_s12 }
 0x765   :  { %18 = sbr.rel (!%p16_p5) target bundleno = 2 (0x2), region = 115 }

// kernel: transformer_forward.29
= control target key start
LH: loop header
LB: loop body
LE: loop exit
PB: predicated region body
PF: predicated region fallthrough
CT: control target
= control target key end

     0   :  { %s1743_s30 = smov 0   ;;  %s1745_s10 = smov 0   ;;  %s1956_s0 = inlined_call_operand.vmem [shape: bf16[1,2,8,32], index: 0, kind: input, shape index: {}]   ;;  %s1957_s1 = inlined_call_operand.vmem [shape: bf16[2,2,8,32], index: 1, kind: input, shape index: {}, may-alias: {1,2}]   ;;  %s1958_s2 = inlined_call_operand.vmem [shape: bf16[2,2,8,32], index: 2, kind: input, shape index: {}, may-alias: {1,2}]   ;;  %s1959_s3 = inlined_call_operand.vmem [shape: f32[2,1,8], index: 3, kind: input, shape index: {}]   ;;  %s1960_s4 = inlined_call_operand.vmem [shape: bf16[2,8,32], index: 4, kind: input, shape index: {}]   ;;  %s1961_s5 = inlined_call_operand.vmem [shape: bf16[32,32], index: 5, kind: input, shape index: {}]   ;;  %s1962_s6 = inlined_call_operand.vmem [shape: f32[1,32], index: 6, kind: input, shape index: {}]   ;;  %s1963_s7 = inlined_call_operand.vmem [shape: f32[1,32], index: 7, kind: input, shape index: {}]   ;;  %s1964_s8 = inlined_call_operand.vmem [shape: f32[1,32], index: 8, kind: input, shape index: {}]   ;;  %s1965_s9 = inlined_call_operand.vmem [shape: bf16[2,8,32], index: 9, kind: output, shape index: {}]  }
   0x1   :  { %s1747_s11 = smov 0  }
   0x2 LB: > { %s38_s12 = sadd.s32 1, %s1680_s10  ;;  %p1477_p0 = scmp.ge.s32.totalorder %s1684_s11, 1  ;;  %s1684_s11 = sphi %s1747_s11, %s19_s11   ;;  %s1680_s10 = sphi %s1745_s10, %s1967_s10   ;;  %s1676_s30 = sphi %s1743_s30, %s1966_s30  }
   0x3   : > { %p40_p1 = scmp.ge.s32.totalorder %s38_s12, 2  ;;  %p368_p2 = scmp.lt.s32.totalorder %s1684_s11, 3 }
   0x5   : > { %s1969_s12 = smov (%p40_p1, %s38_s12), 0  ;;  %p369_p3 = pnand %p1477_p0, %p368_p2 }
   0x6   : > { %p436_p4 = scmp.lt.s32.totalorder (!%p369_p3), %s1676_s30, 1  ;;  %vm492_vm0 = vcmask (!%p369_p3), 64512   ;;  %v1686_v0 = vmov (!%p369_p3), 0.0   ;;  %vm1687_vm1 = vmmov (!%p369_p3), 0   ;;  %vm483_vm2 = vcmask (!%p369_p3), 7168   ;;  %s1690_s23 = smov (!%p369_p3), 120  }
   0x7   : > { %372 = sbr.rel (%p369_p3) target bundleno = 1890 (0x762), region = 56  ;;  %1529 = vmatprep.subr.bf16.mxu0 (!%p369_p3), %v1686_v0  ;;  %493 = vst.msk [vmem:[#allocation4] sm:$0xff] (!%p369_p3), %vm492_vm0, %v1686_v0  ;;  %494 = vst.msk [vmem:[#allocation4 + $0x8] sm:$0xff] (!%p369_p3), %vm492_vm0, %v1686_v0  ;;  %1531 = vmatprep.mubr.msk.bf16.mxu0 (!%p369_p3), %vm1687_vm1, %v1686_v0  ;;  %v1688_v4 = vmov (!%p369_p3), -1e+30   ;;  %v1689_v13 = vmov (!%p369_p3), 0  }
   0x8   : > { %495 = vst.msk [vmem:[#allocation4 + $0x10] sm:$0xff] (!%p369_p3), %vm492_vm0, %v1686_v0  ;;  %496 = vst.msk [vmem:[#allocation4 + $0x18] sm:$0xff] (!%p369_p3), %vm492_vm0, %v1686_v0  ;;  %1535 = vmatprep.subr.bf16.mxu1 (!%p369_p3), %v1686_v0  ;;  %1537 = vmatprep.mubr.msk.bf16.mxu1 (!%p369_p3), %vm1687_vm1, %v1686_v0  ;;  %s1691_s24 = smov (!%p369_p3), 112   ;;  %s1692_s25 = smov (!%p369_p3), 104   ;;  %vm591_vm3 = vcmask (!%p369_p3), 1043456   ;;  %vm1302_vm4 = vcmask (!%p369_p3), 261120  }
   0x9   : > { %484 = vst.msk [vmem:[#allocation2] sm:$0xff] (!%p369_p3), %vm483_vm2, %v1688_v4  ;;  %485 = vst.msk [vmem:[#allocation2 + $0x8] sm:$0xff] (!%p369_p3), %vm483_vm2, %v1688_v4  ;;  %1632 = vset.pattern.permute.xlu0 (!%p369_p3), %v1689_v13  ;;  %1633 = vset.pattern.permute.xlu1 (!%p369_p3), %v1689_v13  ;;  %vm1334_vm5 = vcmask (!%p369_p3), 257024  }
   0xa   : > { %486 = vst.msk [vmem:[#allocation2 + $0x10] sm:$0xff] (!%p369_p3), %vm483_vm2, %v1688_v4  ;;  %487 = vst.msk [vmem:[#allocation2 + $0x18] sm:$0xff] (!%p369_p3), %vm483_vm2, %v1688_v4 }
   0xb   : > { %488 = vst.msk [vmem:[#allocation3] sm:$0xff] (!%p369_p3), %vm483_vm2, %v1686_v0  ;;  %489 = vst.msk [vmem:[#allocation3 + $0x8] sm:$0xff] (!%p369_p3), %vm483_vm2, %v1686_v0 }
   0xc   : > { %490 = vst.msk [vmem:[#allocation3 + $0x10] sm:$0xff] (!%p369_p3), %vm483_vm2, %v1686_v0  ;;  %491 = vst.msk [vmem:[#allocation3 + $0x18] sm:$0xff] (!%p369_p3), %vm483_vm2, %v1686_v0 }
   0xe   : > { %s1971_s30 = smov (!%p436_p4, %s1676_s30), 1 }
   0xf   : > { %s1775_s13 = sshll.u32 %s1971_s30, 2  ;;  %s463_s22 = scalar_lea.vmem %s1959_s3, %s1971_s30 }
  0x10   : > { %s449_s16 = scalar_lea.vmem %s1957_s1, %s1775_s13  ;;  %s442_s19 = scalar_lea.vmem %s1956_s0, %s1775_s13  ;;  %v1805_v6 = vld [vmem:[%s463_s22] ss:$0 sm:$0xff]  ;;  %v697_v61 = vld [vmem:[#allocation2 + $0x8] sm:$0xff] }
  0x11   : > { %v498_v1 = vld [vmem:[%s449_s16] sm:$0xf]  ;;  %s1402_s28 = scalar_lea.vmem %s1958_s2, %s1775_s13  ;;  %s470_s22 = scalar_lea.vmem %s1960_s4, %s1775_s13 }
  0x12   : > { %v506_v2 = vsel %vm492_vm0, %v498_v1, 0  ;;  %v497_v3 = vld [vmem:[%s442_s19] sm:$0xf]  ;;  %v1488_v14 = vcombine.low %v498_v1, %v498_v1  ;;  %v1829_v20 = vld [vmem:[%s1402_s28 + $0x8] sm:$0xf]  ;;  %s477_s14 = scalar_lea.vmem %s1965_s9, %s1775_s13 }
  0x13   : > { %1530 = vmatpush3.bf16.xpose.msra.mxu0 %v506_v2  ;;  %v1487_v15 = vcombine.low %v497_v3, %v497_v3  ;;  %v1815_v16 = vld [vmem:[#allocation2] sm:$0xff]  ;;  %v593_v21 = vsel %vm591_vm3, %v1829_v20, 0  ;;  %v837_v2 = vld [vmem:[#allocation2 + $0x10] sm:$0xff] }
  0x14   : > { %1547 = vmatprep.subr.bf16.mxu0 %v1686_v0  ;;  %646 = vrot.lane.b32.xlu1 %v1488_v14, %s1690_s23 }
  0x15   : > { %1536 = vmatpush3.bf16.msra.mxu1 %v593_v21 }
  0x16   : > { %1541 = vmatprep.subr.bf16.mxu1 %v1686_v0 }
  0x18   : > { %641 = vrot.lane.b32.xlu1 %v1487_v15, %s1690_s23 }
  0x1a   : > { %1532 = vmatmul.mubr.msk.bf16.vlgmr.msra.gmra.mrb[0].mxu0 %vm492_vm0, %v497_v3 }
  0x1b   : > { %1549 = vmatprep.mubr.msk.bf16.mxu0 %vm1687_vm1, %v1686_v0 }
  0x1c   : > { %786 = vrot.lane.b32.xlu1 %v1488_v14, %s1691_s24 }
  0x20   : > { %784 = vrot.lane.b32.xlu1 %v1487_v15, %s1691_s24 }
  0x24   : > { %923 = vrot.lane.b32.xlu1 %v1488_v14, %s1692_s25 }
  0x28   : > { %921 = vrot.lane.b32.xlu1 %v1487_v15, %s1692_s25 }
  0x86   : > { %v647_v25 = vpop.permute.xlu1 %646 }
  0x87   : > { %v652_v28 = vsel %vm492_vm0, %v647_v25, 0 }
  0x8a   : > { %v642_v26 = vpop.permute.xlu1 %641 }
  0x8e   : > { %v787_v30 = vpop.permute.xlu1 %786 }
  0x8f   : > { %v792_v32 = vsel %vm492_vm0, %v787_v30, 0 }
  0x92   : > { %v785_v31 = vpop.permute.xlu1 %784 }
  0x96   : > { %v924_v33 = vpop.permute.xlu1 %923 }
  0x97   : > { %v929_v34 = vsel %vm492_vm0, %v924_v33, 0 }
  0x9a   : > { %v922_v35 = vpop.permute.xlu1 %921 }
  0xed   : > { %v542_v5 = vpop.f32.mrb[0].mxu0 }
  0xee   : > { %v548_v7 = vmul.f32 0.35355338, %v542_v5  ;;  %v1533_v8 = vpop.f32.mrb[1].mxu0 }
  0xef   : > { %v545_v9 = vpop.f32.mrb[2].mxu0 }
  0xf0   : > { %v1534_v10 = vpop.f32.mrb[3].mxu0  ;;  %v555_v11 = vadd.f32 %v1805_v6, %v548_v7  ;;  %v974_v7 = vld [vmem:[#allocation2 + $0x18] sm:$0xff]  ;;  %v1490_v9 = vcombine.low %v1829_v20, %v1829_v20 }
  0xf2   : > { %v557_v12 = vsel %vm492_vm0, %v555_v11, -inf }
  0xf3   : > { %558 = vmax.xlane.f32.xlu0 %v557_v12 }
 0x180   : > { %v559_v17 = vpop.xlane.xlu0 %558 }
 0x181   : > { %v1818_v18 = vmax.f32 %v1815_v16, %v559_v17 }
 0x183   : > { %v561_v19 = vsub.f32 %v1815_v16, %v1818_v18  ;;  %637 = vst.msk [vmem:[#allocation2] sm:$0xff] %vm483_vm2, %v1818_v18  ;;  %566 = vperm.xlu0 %1632, %v1818_v18  }
 0x202   : > { %v567_v22 = vpop.permute.xlu0 %566 }
 0x203   : > { %v569_v23 = vsub.f32 %v555_v11, %v567_v22 }
 0x205   : > { %v570_v24 = vmul.f32 1.442695, %v569_v23 }
 0x207   : > { %1636 = vpow2.f32 %v570_v24 }
 0x211   : > { %v1834_v27 = vpop.eup %1636 }
 0x212   : > { %v587_v29 = vpack.c.bf16 %v1834_v27, %v1834_v27  ;;  %v574_v11 = vsel %vm492_vm0, %v1834_v27, 0.0 }
 0x214   : > { %1538 = vmatmul.mubr.msk.bf16.vlgmr.msra.gmra.mrb[0].mxu1 %vm492_vm0, %v587_v29 }
 0x215   : > { %1542 = vmatpush3.bf16.xpose.msra.mxu1 %v652_v28  ;;  %1543 = vmatprep.mubr.msk.bf16.mxu1 %vm1687_vm1, %v1686_v0 }
 0x216   : > { %1553 = vmatprep.subr.bf16.mxu1 %v1686_v0 }
 0x21c   : > { %1544 = vmatmul.mubr.msk.bf16.vlgmr.msra.gmra.mrb[4].mxu1 %vm492_vm0, %v642_v26 }
 0x21d   : > { %1554 = vmatpush3.bf16.xpose.msra.mxu1 %v792_v32  ;;  %1555 = vmatprep.mubr.msk.bf16.mxu1 %vm1687_vm1, %v1686_v0 }
 0x21e   : > { %1565 = vmatprep.subr.bf16.mxu1 %v1686_v0 }
 0x224   : > { %1556 = vmatmul.mubr.msk.bf16.vlgmr.msra.gmra.mrb[8].mxu1 %vm492_vm0, %v785_v31 }
 0x225   : > { %1566 = vmatpush3.bf16.xpose.msra.mxu1 %v929_v34  ;;  %1567 = vmatprep.mubr.msk.bf16.mxu1 %vm1687_vm1, %v1686_v0 }
 0x226   : > { %1577 = vmatprep.subr.bf16.mxu1 %v1686_v0 }
 0x22c   : > { %1568 = vmatmul.mubr.msk.bf16.vlgmr.msra.gmra.mrb[12].mxu1 %vm492_vm0, %v922_v35 }
 0x22d   : > { %1579 = vmatprep.mubr.msk.bf16.mxu1 %vm1687_vm1, %v1686_v0 }
 0x2e7   : > { %v1856_v36 = vpop.f32.mrb[0].mxu1 }
 0x2e8   : > { %v1539_v37 = vpop.f32.mrb[1].mxu1 }
 0x2e9   : > { %v632_v38 = vpop.f32.mrb[2].mxu1 }
 0x2ea   : > { %v1540_v39 = vpop.f32.mrb[3].mxu1 }
 0x2ef   : > { %v688_v40 = vpop.f32.mrb[4].mxu1 }
 0x2f0   : > { %v694_v41 = vmul.f32 0.35355338, %v688_v40  ;;  %v1545_v42 = vpop.f32.mrb[5].mxu1  ;;  %v562_v40 = vmul.f32 1.442695, %v561_v19 }
 0x2f1   : > { %v691_v43 = vpop.f32.mrb[6].mxu1 }
 0x2f2   : > { %v1546_v44 = vpop.f32.mrb[7].mxu1  ;;  %v695_v45 = vadd.f32 %v1805_v6, %v694_v41 }
 0x2f4   : > { %v698_v46 = vsel %vm492_vm0, %v695_v45, -inf }
 0x2f5   : > { %699 = vmax.xlane.f32.xlu1 %v698_v46  ;;  %v572_v46 = vld [vmem:[#allocation3] sm:$0xff] }
 0x2f7   : > { %v828_v47 = vpop.f32.mrb[8].mxu1 }
 0x2f8   : > { %v834_v48 = vmul.f32 0.35355338, %v828_v47  ;;  %v1557_v49 = vpop.f32.mrb[9].mxu1 }
 0x2f9   : > { %v831_v50 = vpop.f32.mrb[10].mxu1 }
 0x2fa   : > { %v1558_v51 = vpop.f32.mrb[11].mxu1  ;;  %v835_v52 = vadd.f32 %v1805_v6, %v834_v48 }
 0x2fb   : > { %v1071_v51 = vld [vmem:[%s1961_s5] sm:$0xf] }
 0x2fc   : > { %v838_v53 = vsel %vm492_vm0, %v835_v52, -inf }
 0x2fd   : > { %839 = vmax.xlane.f32.xlu0 %v838_v53  ;;  %v714_v53 = vld [vmem:[#allocation3 + $0x8] sm:$0xff] }
 0x2ff   : > { %v965_v54 = vpop.f32.mrb[12].mxu1 }
 0x300   : > { %v971_v55 = vmul.f32 0.35355338, %v965_v54  ;;  %v1569_v56 = vpop.f32.mrb[13].mxu1 }
 0x301   : > { %v968_v57 = vpop.f32.mrb[14].mxu1 }
 0x302   : > { %v1570_v58 = vpop.f32.mrb[15].mxu1  ;;  %v972_v59 = vadd.f32 %v1805_v6, %v971_v55  ;;  %v854_v57 = vld [vmem:[#allocation3 + $0x10] sm:$0xff] }
 0x304   : > { %v975_v60 = vsel %vm492_vm0, %v972_v59, -inf }
 0x305   : > { %976 = vmax.xlane.f32.xlu1 %v975_v60 }
 0x382   : > { %v700_v62 = vpop.xlane.xlu1 %699 }
 0x383   : > { %v701_v63 = vmax.f32 %v697_v61, %v700_v62  ;;  %v991_v62 = vld [vmem:[#allocation3 + $0x18] sm:$0xff] }
 0x385   : > { %v702_v1 = vsub.f32 %v697_v61, %v701_v63  ;;  %783 = vst.msk [vmem:[#allocation2 + $0x8] sm:$0xff] %vm483_vm2, %v701_v63  ;;  %707 = vperm.xlu1 %1633, %v701_v63  }
 0x387   : > { %v703_v38 = vmul.f32 1.442695, %v702_v1 }
 0x38a   : > { %v840_v3 = vpop.xlane.xlu0 %839 }
 0x38b   : > { %v841_v4 = vmax.f32 %v837_v2, %v840_v3  ;;  %v580_v3 = vld [vmem:[#allocation4] sm:$0xff] }
 0x38d   : > { %v842_v5 = vsub.f32 %v837_v2, %v841_v4  ;;  %920 = vst.msk [vmem:[#allocation2 + $0x10] sm:$0xff] %vm483_vm2, %v841_v4  ;;  %847 = vperm.xlu0 %1632, %v841_v4  }
 0x38f   : > { %v843_v42 = vmul.f32 1.442695, %v842_v5 }
 0x392   : > { %v977_v8 = vpop.xlane.xlu1 %976 }
 0x393   : > { %v978_v6 = vmax.f32 %v974_v7, %v977_v8 }
 0x395   : > { %v979_v10 = vsub.f32 %v974_v7, %v978_v6  ;;  %1057 = vst.msk [vmem:[#allocation2 + $0x18] sm:$0xff] %vm483_vm2, %v978_v6  ;;  %984 = vperm.xlu1 %1633, %v978_v6   ;;  %v1082_v6 = vld [vmem:[%s1961_s5 + $0x4] sm:$0xf] }
 0x397   : > { %v980_v41 = vmul.f32 1.442695, %v979_v10 }
 0x399   : > { %733 = vrot.lane.b32.xlu1 %v1490_v9, %s1690_s23 }
 0x39d   : > { %870 = vrot.lane.b32.xlu1 %v1490_v9, %s1691_s24 }
 0x3a1   : > { %1007 = vrot.lane.b32.xlu1 %v1490_v9, %s1692_s25  ;;  %v1087_v9 = vsel %vm591_vm3, %v1082_v6, 0  ;;  %v1291_v6 = vld [vmem:[%s470_s22] sm:$0xf] }
 0x3a2   : > { %1578 = vmatpush3.bf16.msra.mxu1 %v1087_v9  ;;  %v1292_v9 = vunpack.c.l.bf16 %v1291_v6 }
 0x3a3   : > { %1589 = vmatprep.subr.bf16.mxu1 %v1686_v0 }
 0x3ac   : > { %575 = vadd.xlane.f32.xlu0 %v574_v11 }
 0x404   : > { %v708_v12 = vpop.permute.xlu1 %707 }
 0x405   : > { %v710_v13 = vsub.f32 %v695_v45, %v708_v12 }
 0x407   : > { %v711_v14 = vmul.f32 1.442695, %v710_v13 }
 0x409   : > { %1638 = vpow2.f32 %v711_v14 }
 0x40c   : > { %v848_v15 = vpop.permute.xlu0 %847 }
 0x40d   : > { %v850_v17 = vsub.f32 %v835_v52, %v848_v15  ;;  %v1133_v52 = vsel %vm591_vm3, %v1071_v51, 0 }
 0x40f   : > { %v851_v20 = vmul.f32 1.442695, %v850_v17 }
 0x411   : > { %1640 = vpow2.f32 %v851_v20 }
 0x413   : > { %v1639_v21 = vpop.eup %1638 }
 0x414   : > { %v985_v22 = vpop.permute.xlu1 %984  ;;  %v716_v23 = vsel %vm492_vm0, %v1639_v21, 0.0  ;;  %v729_v29 = vpack.c.bf16 %v1639_v21, %v1639_v21  ;;  %v1243_v21 = vld [vmem:[%s1961_s5 + $0xc] sm:$0xf] }
 0x415   : > { %v987_v24 = vsub.f32 %v972_v59, %v985_v22  ;;  %717 = vadd.xlane.f32.xlu1 %v716_v23  ;;  %v1248_v23 = vsel %vm591_vm3, %v1243_v21, 0 }
 0x417   : > { %v988_v25 = vmul.f32 1.442695, %v987_v24  ;;  %v722_v24 = vld [vmem:[#allocation4 + $0x8] sm:$0xff] }
 0x418   : > { %v734_v26 = vpop.permute.xlu1 %733 }
 0x419   : > { %1642 = vpow2.f32 %v988_v25  ;;  %v739_v27 = vsel %vm591_vm3, %v734_v26, 0 }
 0x41a   : > { %1548 = vmatpush3.bf16.msra.mxu0 %v739_v27  ;;  %1644 = vpow2.f32 %v703_v38 }
 0x41b   : > { %v1641_v28 = vpop.eup %1640  ;;  %1559 = vmatprep.subr.bf16.mxu0 %v1686_v0  ;;  %1646 = vpow2.f32 %v562_v40  ;;  %v999_v40 = vld [vmem:[#allocation4 + $0x18] sm:$0xff] }
 0x41c   : > { %v856_v30 = vsel %vm492_vm0, %v1641_v28, 0.0  ;;  %v871_v31 = vpop.permute.xlu1 %870  ;;  %v869_v35 = vpack.c.bf16 %v1641_v28, %v1641_v28  ;;  %1648 = vpow2.f32 %v980_v41 }
 0x41d   : > { %1550 = vmatmul.mubr.msk.bf16.vlgmr.msra.gmra.mrb[4].mxu0 %vm492_vm0, %v729_v29  ;;  %857 = vadd.xlane.f32.xlu0 %v856_v30  ;;  %v876_v32 = vsel %vm591_vm3, %v871_v31, 0  ;;  %1650 = vpow2.f32 %v843_v42  ;;  %v862_v31 = vld [vmem:[#allocation4 + $0x10] sm:$0xff] }
 0x41e   : > { %1560 = vmatpush3.bf16.msra.mxu0 %v876_v32  ;;  %1561 = vmatprep.mubr.msk.bf16.mxu0 %vm1687_vm1, %v1686_v0 }
 0x41f   : > { %1571 = vmatprep.subr.bf16.mxu0 %v1686_v0 }
 0x420   : > { %v1008_v33 = vpop.permute.xlu1 %1007 }
 0x421   : > { %v1013_v37 = vsel %vm591_vm3, %v1008_v33, 0 }
 0x423   : > { %v1643_v34 = vpop.eup %1642 }
 0x424   : > { %v993_v39 = vsel %vm492_vm0, %v1643_v34, 0.0  ;;  %v1006_v43 = vpack.c.bf16 %v1643_v34, %v1643_v34  ;;  %v1645_v44 = vpop.eup %1644 }
 0x425   : > { %994 = vadd.xlane.f32.xlu1 %v993_v39  ;;  %1562 = vmatmul.mubr.msk.bf16.vlgmr.msra.gmra.mrb[8].mxu0 %vm492_vm0, %v869_v35  ;;  %v1647_v45 = vpop.eup %1646  ;;  %v715_v54 = vmul.f32 %v1645_v44, %v714_v53 }
 0x426   : > { %1572 = vmatpush3.bf16.msra.mxu0 %v1013_v37  ;;  %1573 = vmatprep.mubr.msk.bf16.mxu0 %vm1687_vm1, %v1686_v0  ;;  %v1649_v16 = vpop.eup %1648  ;;  %v573_v18 = vmul.f32 %v1647_v45, %v572_v46 }
 0x427   : > { %1583 = vmatprep.subr.bf16.mxu0 %v1686_v0  ;;  %v1651_v19 = vpop.eup %1650  ;;  %v992_v63 = vmul.f32 %v1649_v16, %v991_v62 }
 0x428   : > { %v855_v58 = vmul.f32 %v1651_v19, %v854_v57 }
 0x42d   : > { %1574 = vmatmul.mubr.msk.bf16.vlgmr.msra.gmra.mrb[12].mxu0 %vm492_vm0, %v1006_v43 }
 0x42e   : > { %1585 = vmatprep.mubr.msk.bf16.mxu0 %vm1687_vm1, %v1686_v0  ;;  %1584 = vmatpush3.bf16.msra.mxu0 %v1133_v52 }
 0x42f   : > { %1595 = vmatprep.subr.bf16.mxu0 %v1686_v0 }
 0x433   : > { %725 = vperm.xlu0 %1632, %v1645_v44  }
 0x436   : > { %583 = vperm.xlu1 %1633, %v1647_v45  }
 0x437   : > { %1002 = vperm.xlu0 %1632, %v1649_v16  }
 0x439   : > { %v576_v47 = vpop.xlane.xlu0 %575 }
 0x43a   : > { %v577_v48 = vadd.f32 %v576_v47, %v573_v18  ;;  %865 = vperm.xlu1 %1633, %v1651_v19   ;;  %v1185_v19 = vld [vmem:[%s1961_s5 + $0x8] sm:$0xf] }
 0x43c   : > { %579 = vst.msk [vmem:[#allocation3] sm:$0xff] %vm483_vm2, %v577_v48 }
 0x443   : > { %v1061_v49 = vld [vmem:[#allocation3] sm:$0xff] }
 0x444   : > { %1652 = vrcp.f32 %v1061_v49  ;;  %v1190_v49 = vsel %vm591_vm3, %v1185_v19, 0 }
 0x44e   : > { %v1653_v50 = vpop.eup %1652 }
 0x44f   : > { %1066 = vperm.xlu0 %1632, %v1653_v50  }
 0x4a2   : > { %v718_v55 = vpop.xlane.xlu1 %717 }
 0x4a3   : > { %v719_v56 = vadd.f32 %v718_v55, %v715_v54 }
 0x4a5   : > { %720 = vst.msk [vmem:[#allocation3 + $0x8] sm:$0xff] %vm483_vm2, %v719_v56 }
 0x4aa   : > { %v858_v59 = vpop.xlane.xlu0 %857 }
 0x4ab   : > { %v859_v60 = vadd.f32 %v858_v59, %v855_v58 }
 0x4ac   : > { %v1072_v61 = vld [vmem:[#allocation3 + $0x8] sm:$0xff] }
 0x4ad   : > { %860 = vst.msk [vmem:[#allocation3 + $0x10] sm:$0xff] %vm483_vm2, %v859_v60  ;;  %1654 = vrcp.f32 %v1072_v61 }
 0x4b2   : > { %v995_v1 = vpop.xlane.xlu1 %994  ;;  %v726_v13 = vpop.permute.xlu0 %725 }
 0x4b3   : > { %v996_v2 = vadd.f32 %v995_v1, %v992_v63  ;;  %v728_v25 = vmul.f32 %v726_v13, %v722_v24 }
 0x4b4   : > { %v1175_v4 = vld [vmem:[#allocation3 + $0x10] sm:$0xff] }
 0x4b5   : > { %997 = vst.msk [vmem:[#allocation3 + $0x18] sm:$0xff] %vm483_vm2, %v996_v2  ;;  %1656 = vrcp.f32 %v1175_v4 }
 0x4b6   : > { %v584_v5 = vpop.permute.xlu1 %583  ;;  %v1003_v15 = vpop.permute.xlu0 %1002 }
 0x4b7   : > { %v1655_v7 = vpop.eup %1654  ;;  %v586_v8 = vmul.f32 %v584_v5, %v580_v3  ;;  %v1005_v41 = vmul.f32 %v1003_v15, %v999_v40 }
 0x4b8   : > { %1077 = vperm.xlu1 %1633, %v1655_v7  }
 0x4b9   : > { %v635_v10 = vadd.f32 %v1856_v36, %v586_v8 }
 0x4ba   : > { %v866_v32 = vpop.permute.xlu1 %865 }
 0x4bb   : > { %636 = vst.msk [vmem:[#allocation4] sm:$0xff] %vm492_vm0, %v635_v10  ;;  %v868_v33 = vmul.f32 %v866_v32, %v862_v31  ;;  %v1502_v32 = vld [vmem:[%s1964_s8] ss:$0 sm:$0xff] }
 0x4bc   : > { %v1233_v11 = vld [vmem:[#allocation3 + $0x18] sm:$0xff] }
 0x4bd   : > { %1658 = vrcp.f32 %v1233_v11 }
 0x4bf   : > { %v1657_v12 = vpop.eup %1656 }
 0x4c0   : > { %1180 = vperm.xlu1 %1633, %v1657_v12  }
 0x4c2   : > { %v1063_v17 = vld [vmem:[#allocation4] sm:$0xff] }
 0x4c7   : > { %v1659_v14 = vpop.eup %1658 }
 0x4c8   : > { %1238 = vperm.xlu0 %1632, %v1659_v14   ;;  %v1500_v14 = vld [vmem:[%s1962_s6] ss:$0 sm:$0xff] }
 0x4ce   : > { %v1067_v20 = vpop.permute.xlu0 %1066 }
 0x4cf   : > { %v1069_v36 = vmul.f32 %v1067_v20, %v1063_v17 }
 0x4d1   : > { %v1070_v22 = vpack.c.bf16 %v1069_v36, %v1069_v36 }
 0x4d3   : > { %1586 = vmatmul.mubr.msk.bf16.vlgmr.msra.gmra.mrb[16].mxu0 %vm492_vm0, %v1070_v22 }
 0x4d4   : > { %1596 = vmatpush3.bf16.msra.mxu0 %v1248_v23  ;;  %1597 = vmatprep.mubr.msk.bf16.mxu0 %vm1687_vm1, %v1686_v0 }
 0x4f0   : > { %v775_v26 = vpop.f32.mrb[4].mxu0 }
 0x4f1   : > { %v781_v27 = vadd.f32 %v775_v26, %v728_v25  ;;  %v1551_v28 = vpop.f32.mrb[5].mxu0 }
 0x4f2   : > { %v778_v29 = vpop.f32.mrb[6].mxu0 }
 0x4f3   : > { %782 = vst.msk [vmem:[#allocation4 + $0x8] sm:$0xff] %vm492_vm0, %v781_v27  ;;  %v1552_v30 = vpop.f32.mrb[7].mxu0 }
 0x4f4   : > { %v1501_v30 = vld [vmem:[%s1963_s7] ss:$0 sm:$0xff] }
 0x4f8   : > { %v912_v34 = vpop.f32.mrb[8].mxu0 }
 0x4f9   : > { %v918_v35 = vadd.f32 %v912_v34, %v868_v33  ;;  %v1563_v37 = vpop.f32.mrb[9].mxu0 }
 0x4fa   : > { %v915_v38 = vpop.f32.mrb[10].mxu0  ;;  %v1074_v18 = vld [vmem:[#allocation4 + $0x8] sm:$0xff] }
 0x4fb   : > { %919 = vst.msk [vmem:[#allocation4 + $0x10] sm:$0xff] %vm492_vm0, %v918_v35  ;;  %v1564_v39 = vpop.f32.mrb[11].mxu0 }
 0x500   : > { %v1049_v42 = vpop.f32.mrb[12].mxu0 }
 0x501   : > { %v1055_v43 = vadd.f32 %v1049_v42, %v1005_v41  ;;  %v1575_v44 = vpop.f32.mrb[13].mxu0 }
 0x502   : > { %v1052_v45 = vpop.f32.mrb[14].mxu0  ;;  %v1177_v51 = vld [vmem:[#allocation4 + $0x10] sm:$0xff] }
 0x503   : > { %1056 = vst.msk [vmem:[#allocation4 + $0x18] sm:$0xff] %vm492_vm0, %v1055_v43  ;;  %v1576_v46 = vpop.f32.mrb[15].mxu0 }
 0x50a   : > { %v1235_v55 = vld [vmem:[#allocation4 + $0x18] sm:$0xff] }
 0x537   : > { %v1078_v16 = vpop.permute.xlu1 %1077 }
 0x538   : > { %v1080_v47 = vmul.f32 %v1078_v16, %v1074_v18 }
 0x53a   : > { %v1081_v48 = vpack.c.bf16 %v1080_v47, %v1080_v47 }
 0x53c   : > { %1580 = vmatmul.mubr.msk.bf16.vlgmr.msra.gmra.mrb[16].mxu1 %vm492_vm0, %v1081_v48 }
 0x53d   : > { %1590 = vmatpush3.bf16.msra.mxu1 %v1190_v49  ;;  %1591 = vmatprep.mubr.msk.bf16.mxu1 %vm1687_vm1, %v1686_v0 }
 0x53f   : > { %v1181_v50 = vpop.permute.xlu1 %1180 }
 0x540   : > { %v1183_v52 = vmul.f32 %v1181_v50, %v1177_v51 }
 0x542   : > { %v1184_v53 = vpack.c.bf16 %v1183_v52, %v1183_v52 }
 0x544   : > { %1592 = vmatmul.mubr.msk.bf16.vlgmr.msra.gmra.mrb[20].mxu1 %vm492_vm0, %v1184_v53 }
 0x547   : > { %v1239_v54 = vpop.permute.xlu0 %1238 }
 0x548   : > { %v1241_v56 = vmul.f32 %v1239_v54, %v1235_v55 }
 0x54a   : > { %v1242_v57 = vpack.c.bf16 %v1241_v56, %v1241_v56 }
 0x54c   : > { %1598 = vmatmul.mubr.msk.bf16.vlgmr.msra.gmra.mrb[20].mxu0 %vm492_vm0, %v1242_v57 }
 0x5a6   : > { %v1169_v58 = vpop.f32.mrb[16].mxu0 }
 0x5a7   : > { %v1587_v59 = vpop.f32.mrb[17].mxu0 }
 0x5a8   : > { %v1172_v60 = vpop.f32.mrb[18].mxu0 }
 0x5a9   : > { %v1588_v61 = vpop.f32.mrb[19].mxu0 }
 0x60f   : > { %v1123_v62 = vpop.f32.mrb[16].mxu1 }
 0x610   : > { %v1170_v63 = vadd.f32 %v1169_v58, %v1123_v62  ;;  %v1581_v0 = vpop.f32.mrb[17].mxu1 }
 0x611   : > { %v1126_v1 = vpop.f32.mrb[18].mxu1 }
 0x612   : > { %v1582_v2 = vpop.f32.mrb[19].mxu1 }
 0x617   : > { %v1226_v3 = vpop.f32.mrb[20].mxu1 }
 0x618   : > { %v1232_v4 = vadd.f32 %v1226_v3, %v1170_v63  ;;  %v1593_v5 = vpop.f32.mrb[21].mxu1 }
 0x619   : > { %v1229_v7 = vpop.f32.mrb[22].mxu1 }
 0x61a   : > { %v1594_v8 = vpop.f32.mrb[23].mxu1 }
 0x61f   : > { %v1284_v10 = vpop.f32.mrb[20].mxu0 }
 0x620   : > { %v1290_v11 = vadd.f32 %v1284_v10, %v1232_v4  ;;  %v1599_v12 = vpop.f32.mrb[21].mxu0 }
 0x621   : > { %v1287_v13 = vpop.f32.mrb[22].mxu0 }
 0x622   : > { %v1293_v15 = vadd.f32 %v1292_v9, %v1290_v11  ;;  %v1600_v17 = vpop.f32.mrb[23].mxu0 }
 0x624   : > { %v1301_v20 = vadd.f32 %v1500_v14, %v1293_v15 }
 0x626   : > { %v1303_v21 = vsel %vm1302_vm4, %v1301_v20, 0.0 }
 0x627   : > { %1304 = vadd.xlane.f32.xlu1 %v1303_v21 }
 0x6b4   : > { %v1305_v36 = vpop.xlane.xlu1 %1304 }
 0x6b5   : > { %v1307_v22 = vmul.f32 0.03125, %v1305_v36 }
 0x6b7   : > { %v1308_v23 = vsub.f32 %v1301_v20, %v1307_v22 }
 0x6b9   : > { %v1309_v24 = vmul.f32 %v1308_v23, %v1308_v23 }
 0x6bb   : > { %v1310_v25 = vsel %vm1302_vm4, %v1309_v24, 0.0 }
 0x6bc   : > { %1311 = vadd.xlane.f32.xlu0 %v1310_v25 }
 0x749   : > { %v1312_v26 = vpop.xlane.xlu0 %1311 }
 0x74a   : > { %v1313_v27 = vmul.f32 0.03125, %v1312_v26 }
 0x74c   : > { %v1314_v28 = vadd.f32 1e-05, %v1313_v27 }
 0x74e   : > { %1660 = vrsqrt.f32 %v1314_v28 }
 0x758   : > { %v1661_v29 = vpop.eup %1660 }
 0x759   : > { %v1316_v31 = vmul.f32 %v1661_v29, %v1308_v23 }
 0x75b   : > { %v1324_v33 = vmul.f32 %v1501_v30, %v1316_v31 }
 0x75d   : > { %v1332_v34 = vadd.f32 %v1502_v32, %v1324_v33 }
 0x75f   : > { %v1333_v35 = vpack.c.bf16 %v1332_v34, %v1332_v34 }
 0x761   : > { %1335 = vst.msk [vmem:[%s477_s14] sm:$0xf] %vm1334_vm5, %v1333_v35 }
 0x762 PF: > { %s19_s11 = sadd.s32 1, %s1684_s11   ;;  %s1966_s30 = smov %s1680_s10 }
 0x763   : > { %p16_p5 = scmp.ge.s32.totalorder %s19_s11, 4   ;;  %s1967_s10 = smov %s1969_s12 }
 0x765   :  { %18 = sbr.rel (!%p16_p5) target bundleno = 2 (0x2), region = 115 }

</bundles_post_ra>
